<compile_context>
chip_gen: v6e
topology: v6e:2x2x1
jax: 0.10.0
libtpu: 0.0.40
codegen_flags: <defaults>
</compile_context>

<pallas_src>
import functools

import jax
import jax.numpy as jnp
from jax.experimental import pallas as pl
from jax.experimental.pallas import tpu as pltpu


def linear_attention_kernel(x_ref, wqkv_ref, wout_ref, bout_ref, gw_ref, gb_ref,
                            mask_ref, o_ref, *, heads, dim_head, scale, eps,
                            vpu_qkv):
    # x block: (1, C, N); weights / mask are full-extent constant blocks.
    x = x_ref[0]                                              # (C, N) f32
    C, N = x.shape
    hidden = heads * dim_head

    # ---- to_qkv: 1x1 conv == (3*hidden, C) @ (C, N) --------------------------
    if vpu_qkv:
        # K = C tiny -> rank-C broadcast-MAC on the VPU (MXU would be
        # weight-load dominated).  Benchmark the threshold per generation.
        qkv = wqkv_ref[:, 0:1] * x[0:1, :]
        for c in range(1, C):
            qkv = qkv + wqkv_ref[:, c:c + 1] * x[c:c + 1, :]   # (3*hidden, N)
    else:
        qkv = jnp.dot(wqkv_ref[...].astype(jnp.bfloat16),
                      x.astype(jnp.bfloat16),
                      preferred_element_type=jnp.float32)      # (3*hidden, N)

    q_all = qkv[0:hidden, :]                                   # (hidden, N)
    k_all = qkv[hidden:2 * hidden, :]
    v_all = qkv[2 * hidden:3 * hidden, :]

    # ---- q softmax over dim_head, per head (segmented) ------------------------
    # Per-head max + per-head sum on a (heads, dim_head, N) view: sublane
    # reduces on the XLU/VPU, EUP reciprocal on only (heads, N) elements, and
    # q_den >= 1 by construction so approx reciprocal is always safe.
    q3 = q_all.reshape(heads, dim_head, N)
    q_max = jnp.max(q3, axis=1, keepdims=True)                 # (heads, 1, N)
    e_q = jnp.exp(q3 - q_max)                                  # (heads, dh, N)
    inv_qden = pl.reciprocal(jnp.sum(e_q, axis=1, keepdims=True), approx=True)
    q_norm_b = (e_q * inv_qden).astype(jnp.bfloat16).reshape(hidden, N)

    # ---- k softmax over N: exp now, denominator folded into the context -------
    k_max = jnp.max(k_all, axis=1, keepdims=True)              # (hidden, 1)
    e_k_b = jnp.exp(k_all - k_max).astype(jnp.bfloat16)        # (hidden, N) bf16
    # Denominator summed from the SAME bf16 values that feed the matmul.
    k_den = jnp.sum(e_k_b.astype(jnp.float32), axis=1, keepdims=True)  # (hidden,1)

    # ---- fused multi-head context: one full-width bf16 MXU matmul -------------
    # context[d, e] = sum_n e_k[d, n] * v[e, n]   (all heads at once)
    context = jax.lax.dot_general(
        e_k_b, v_all.astype(jnp.bfloat16),
        (((1,), (1,)), ((), ())),
        preferred_element_type=jnp.float32)                    # (hidden, hidden)

    # Fold block-diagonal head mask + k-softmax denominator + q scale into the
    # small N-independent context (EUP reciprocal, VPU multiplies).
    inv_kden = pl.reciprocal(k_den, approx=True) * jnp.float32(scale)
    ctx = context * mask_ref[...] * inv_kden                   # (hidden, hidden)

    # ---- associativity: fold to_out into the context ---------------------------
    #   out[e, n] = sum_d ctx[d, e] * q_norm[d, n]
    #   y[c, n]   = sum_e W_out[c, e] * out[e, n] + b[c]
    #             = sum_d W2[c, d] * q_norm[d, n] + b[c]
    # with W2 = W_out @ ctx^T, a tiny (C, hidden) x (hidden, hidden) matmul.
    # This removes an entire (hidden x hidden x N) matmul and all (hidden, N)
    # "out" temporaries.
    w2 = jax.lax.dot_general(
        wout_ref[...], ctx, (((1,), (1,)), ((), ())),
        preferred_element_type=jnp.float32)                    # (C, hidden) f32
    y = jnp.dot(w2.astype(jnp.bfloat16), q_norm_b,
                preferred_element_type=jnp.float32) + bout_ref[...]   # (C, N)

    # ---- GroupNorm(1, C): single group, single-pass stats, fused affine -------
    cnt = jnp.float32(C * N)
    mean = jnp.sum(y) / cnt
    var = jnp.maximum(jnp.sum(y * y) / cnt - mean * mean, 0.0)  # biased (PyTorch)
    inv_std = jax.lax.rsqrt(var + eps)
    a = gw_ref[...] * inv_std                                   # (C, 1)
    b = gb_ref[...] - mean * a                                  # (C, 1)
    o_ref[0] = (y * a + b).astype(o_ref.dtype)                  # one FMA epilogue


def _vmem_limit_bytes():
    # Generation-aware scoped-VMEM cap: ~3/4 of physical per-core VMEM
    # (48 MiB on v7x's 64 MiB parts, 96 MiB on v5e/v6e's 128 MiB parts).
    try:
        info = pltpu.get_tpu_info()
        cap = int(getattr(info, "vmem_capacity_bytes", 64 * 1024 * 1024))
    except Exception:
        cap = 64 * 1024 * 1024
    return (cap * 3) // 4


def linear_attention(x, w_qkv, w_out, b_out, gn_w, gn_b, *, heads, dim_head):
    B, C, H, W = x.shape
    N = H * W
    hidden = heads * dim_head
    x2 = x.reshape(B, C, N)

    # Block-diagonal head mask precomputed once in the wrapper (constant block).
    head_idx = jnp.arange(hidden, dtype=jnp.int32) // dim_head
    mask = (head_idx[:, None] == head_idx[None, :]).astype(jnp.float32)

    kernel = functools.partial(
        linear_attention_kernel,
        heads=heads, dim_head=dim_head,
        scale=float(dim_head) ** (-0.5), eps=1e-5,
        vpu_qkv=(C <= 4))

    out = pl.pallas_call(
        kernel,
        out_shape=jax.ShapeDtypeStruct((B, C, N), x.dtype),
        grid_spec=pltpu.PrefetchScalarGridSpec(
            num_scalar_prefetch=0,
            grid=(B,),
            in_specs=[
                pl.BlockSpec((1, C, N), lambda b: (b, 0, 0)),          # x
                pl.BlockSpec((3 * hidden, C), lambda b: (0, 0)),       # W_qkv
                pl.BlockSpec((C, hidden), lambda b: (0, 0)),           # W_out
                pl.BlockSpec((C, 1), lambda b: (0, 0)),                # b_out
                pl.BlockSpec((C, 1), lambda b: (0, 0)),                # gn weight
                pl.BlockSpec((C, 1), lambda b: (0, 0)),                # gn bias
                pl.BlockSpec((hidden, hidden), lambda b: (0, 0)),      # head mask
            ],
            out_specs=pl.BlockSpec((1, C, N), lambda b: (b, 0, 0)),
        ),
        compiler_params=pltpu.CompilerParams(
            dimension_semantics=("parallel",),
            vmem_limit_bytes=_vmem_limit_bytes()),
    )(x2, w_qkv, w_out, b_out.reshape(C, 1), gn_w.reshape(C, 1),
      gn_b.reshape(C, 1), mask)

    return out.reshape(B, C, H, W)


def linear_attention_reference(x, w_qkv, w_out, b_out, gn_w, gn_b, *, heads, dim_head):
    """Pure-JAX f32 reference matching the PyTorch forward semantics."""
    B, C, H, W = x.shape
    N = H * W
    hidden = heads * dim_head
    xf = x.reshape(B, C, N)
    qkv = jnp.einsum('oc,bcn->bon', w_qkv, xf)
    q, k, v = jnp.split(qkv, 3, axis=1)
    q = q.reshape(B, heads, dim_head, N)
    k = k.reshape(B, heads, dim_head, N)
    v = v.reshape(B, heads, dim_head, N)
    q = jax.nn.softmax(q, axis=-2) * (float(dim_head) ** -0.5)
    k = jax.nn.softmax(k, axis=-1)
    context = jnp.einsum('bhdn,bhen->bhde', k, v)
    out = jnp.einsum('bhde,bhdn->bhen', context, q)
    out = out.reshape(B, hidden, N)
    y = jnp.einsum('oc,bcn->bon', w_out, out) + b_out.reshape(1, C, 1)
    mean = y.mean(axis=(1, 2), keepdims=True)
    var = ((y - mean) ** 2).mean(axis=(1, 2), keepdims=True)
    y = (y - mean) / jnp.sqrt(var + 1e-5)
    y = y * gn_w.reshape(1, C, 1) + gn_b.reshape(1, C, 1)
    return y.reshape(B, C, H, W)


if __name__ == "__main__":
    B, DIM, H, W = 2, 4, 16, 16
    HEADS, DIM_HEAD = 4, 32
    HIDDEN = HEADS * DIM_HEAD

    key = jax.random.PRNGKey(0)
    kx, k1, k2, k3, k4, k5 = jax.random.split(key, 6)

    x = jax.random.normal(kx, (B, DIM, H, W), dtype=jnp.float32)
    # to_qkv: Conv2d(dim, 3*hidden, 1, bias=False) -> weight (3*hidden, dim)
    w_qkv = jax.random.normal(k1, (3 * HIDDEN, DIM), dtype=jnp.float32) * 0.1
    # to_out[0]: Conv2d(hidden, dim, 1) -> weight (dim, hidden), bias (dim,)
    w_out = jax.random.normal(k2, (DIM, HIDDEN), dtype=jnp.float32) * 0.1
    b_out = jax.random.normal(k3, (DIM,), dtype=jnp.float32) * 0.1
    # to_out[1]: GroupNorm(1, dim) affine params
    gn_w = 1.0 + 0.1 * jax.random.normal(k4, (DIM,), dtype=jnp.float32)
    gn_b = 0.1 * jax.random.normal(k5, (DIM,), dtype=jnp.float32)

    out = linear_attention(x, w_qkv, w_out, b_out, gn_w, gn_b,
                           heads=HEADS, dim_head=DIM_HEAD)
    out = jax.block_until_ready(out)

    ref = linear_attention_reference(x, w_qkv, w_out, b_out, gn_w, gn_b,
                                     heads=HEADS, dim_head=DIM_HEAD)
    ref = jax.block_until_ready(ref)

    assert out.shape == (B, DIM, H, W)
    # bf16 MXU operands + approx reciprocals -> relaxed tolerance vs f32 ref.
    assert jnp.allclose(out, ref, rtol=2e-2, atol=2e-2), float(jnp.max(jnp.abs(out - ref)))
    print("KERNEL_OK")
</pallas_src>

<mosaic_0001>
module attributes {stable_mosaic.version = 11 : i64} {
  func.func @linear_attention_kernel(%arg0: i32, %arg1: memref<1x4x256xf32, #tpu.memory_space<vmem>>, %arg2: memref<384x4xf32, #tpu.memory_space<vmem>>, %arg3: memref<4x128xf32, #tpu.memory_space<vmem>>, %arg4: memref<4x1xf32, #tpu.memory_space<vmem>>, %arg5: memref<4x1xf32, #tpu.memory_space<vmem>>, %arg6: memref<4x1xf32, #tpu.memory_space<vmem>>, %arg7: memref<128x128xf32, #tpu.memory_space<vmem>>, %arg8: memref<1x4x256xf32, #tpu.memory_space<vmem>>) attributes {dimension_semantics = [#tpu.dimension_semantics<parallel>], iteration_bounds = array<i64: 2>, scalar_prefetch = 0 : i64, scratch_operands = 0 : i64, tpu.core_type = #tpu.core_type<tc>, window_params = [{transform_indices = @transform_0, window_bounds = array<i64: 1, 4, 256>}, {pipeline_mode = #tpu.pipeline_mode<synchronous>, transform_indices = @transform_1, window_bounds = array<i64: 384, 4>}, {pipeline_mode = #tpu.pipeline_mode<synchronous>, transform_indices = @transform_2, window_bounds = array<i64: 4, 128>}, {pipeline_mode = #tpu.pipeline_mode<synchronous>, transform_indices = @transform_3, window_bounds = array<i64: 4, 1>}, {pipeline_mode = #tpu.pipeline_mode<synchronous>, transform_indices = @transform_4, window_bounds = array<i64: 4, 1>}, {pipeline_mode = #tpu.pipeline_mode<synchronous>, transform_indices = @transform_5, window_bounds = array<i64: 4, 1>}, {pipeline_mode = #tpu.pipeline_mode<synchronous>, transform_indices = @transform_6, window_bounds = array<i64: 128, 128>}, {transform_indices = @transform_7, window_bounds = array<i64: 1, 4, 256>}]} {
    %c0 = arith.constant 0 : index
    %c0_0 = arith.constant 0 : index
    %c0_1 = arith.constant 0 : index
    %0 = vector.load %arg1[%c0, %c0_0, %c0_1] : memref<1x4x256xf32, #tpu.memory_space<vmem>>, vector<1x4x256xf32>
    %1 = vector.shape_cast %0 : vector<1x4x256xf32> to vector<4x256xf32>
    %c0_2 = arith.constant 0 : index
    %c0_3 = arith.constant 0 : index
    %2 = vector.load %arg2[%c0_2, %c0_3] : memref<384x4xf32, #tpu.memory_space<vmem>>, vector<384x1xf32>
    %3 = vector.extract_strided_slice %1 {offsets = [0, 0], sizes = [1, 256], strides = [1, 1]} : vector<4x256xf32> to vector<1x256xf32>
    %4 = vector.broadcast %2 : vector<384x1xf32> to vector<384x256xf32>
    %5 = vector.broadcast %3 : vector<1x256xf32> to vector<384x256xf32>
    %6 = arith.mulf %4, %5 : vector<384x256xf32>
    %c0_4 = arith.constant 0 : index
    %c1 = arith.constant 1 : index
    %7 = vector.load %arg2[%c0_4, %c1] : memref<384x4xf32, #tpu.memory_space<vmem>>, vector<384x1xf32>
    %8 = vector.extract_strided_slice %1 {offsets = [1, 0], sizes = [1, 256], strides = [1, 1]} : vector<4x256xf32> to vector<1x256xf32>
    %9 = vector.broadcast %7 : vector<384x1xf32> to vector<384x256xf32>
    %10 = vector.broadcast %8 : vector<1x256xf32> to vector<384x256xf32>
    %11 = arith.mulf %9, %10 : vector<384x256xf32>
    %12 = arith.addf %6, %11 : vector<384x256xf32>
    %c0_5 = arith.constant 0 : index
    %c2 = arith.constant 2 : index
    %13 = vector.load %arg2[%c0_5, %c2] : memref<384x4xf32, #tpu.memory_space<vmem>>, vector<384x1xf32>
    %14 = vector.extract_strided_slice %1 {offsets = [2, 0], sizes = [1, 256], strides = [1, 1]} : vector<4x256xf32> to vector<1x256xf32>
    %15 = vector.broadcast %13 : vector<384x1xf32> to vector<384x256xf32>
    %16 = vector.broadcast %14 : vector<1x256xf32> to vector<384x256xf32>
    %17 = arith.mulf %15, %16 : vector<384x256xf32>
    %18 = arith.addf %12, %17 : vector<384x256xf32>
    %c0_6 = arith.constant 0 : index
    %c3 = arith.constant 3 : index
    %19 = vector.load %arg2[%c0_6, %c3] : memref<384x4xf32, #tpu.memory_space<vmem>>, vector<384x1xf32>
    %20 = vector.extract_strided_slice %1 {offsets = [3, 0], sizes = [1, 256], strides = [1, 1]} : vector<4x256xf32> to vector<1x256xf32>
    %21 = vector.broadcast %19 : vector<384x1xf32> to vector<384x256xf32>
    %22 = vector.broadcast %20 : vector<1x256xf32> to vector<384x256xf32>
    %23 = arith.mulf %21, %22 : vector<384x256xf32>
    %24 = arith.addf %18, %23 : vector<384x256xf32>
    %25 = vector.extract_strided_slice %24 {offsets = [0, 0], sizes = [128, 256], strides = [1, 1]} : vector<384x256xf32> to vector<128x256xf32>
    %26 = vector.extract_strided_slice %24 {offsets = [128, 0], sizes = [128, 256], strides = [1, 1]} : vector<384x256xf32> to vector<128x256xf32>
    %27 = vector.extract_strided_slice %24 {offsets = [256, 0], sizes = [128, 256], strides = [1, 1]} : vector<384x256xf32> to vector<128x256xf32>
    %28 = vector.shape_cast %25 : vector<128x256xf32> to vector<4x32x256xf32>
    %cst = arith.constant dense<0xFF800000> : vector<4x256xf32>
    %29 = vector.multi_reduction <maximumf>, %28, %cst [1] : vector<4x32x256xf32> to vector<4x256xf32>
    %30 = vector.shape_cast %29 : vector<4x256xf32> to vector<4x1x256xf32>
    %31 = vector.broadcast %30 : vector<4x1x256xf32> to vector<4x32x256xf32>
    %32 = arith.subf %28, %31 : vector<4x32x256xf32>
    %33 = math.exp %32 : vector<4x32x256xf32>
    %cst_7 = arith.constant dense<0.000000e+00> : vector<4x256xf32>
    %34 = vector.multi_reduction <add>, %33, %cst_7 [1] : vector<4x32x256xf32> to vector<4x256xf32>
    %35 = vector.shape_cast %34 : vector<4x256xf32> to vector<4x1x256xf32>
    %36 = tpu.reciprocal %35 {approx = true} : vector<4x1x256xf32> -> vector<4x1x256xf32>
    %37 = vector.broadcast %36 : vector<4x1x256xf32> to vector<4x32x256xf32>
    %38 = arith.mulf %33, %37 : vector<4x32x256xf32>
    %39 = arith.truncf %38 : vector<4x32x256xf32> to vector<4x32x256xbf16>
    %40 = vector.shape_cast %39 : vector<4x32x256xbf16> to vector<128x256xbf16>
    %cst_8 = arith.constant dense<0xFF800000> : vector<128xf32>
    %41 = vector.multi_reduction <maximumf>, %26, %cst_8 [1] : vector<128x256xf32> to vector<128xf32>
    %42 = vector.shape_cast %41 : vector<128xf32> to vector<128x1xf32>
    %43 = vector.broadcast %42 : vector<128x1xf32> to vector<128x256xf32>
    %44 = arith.subf %26, %43 : vector<128x256xf32>
    %45 = math.exp %44 : vector<128x256xf32>
    %46 = arith.truncf %45 : vector<128x256xf32> to vector<128x256xbf16>
    %47 = arith.extf %46 : vector<128x256xbf16> to vector<128x256xf32>
    %cst_9 = arith.constant dense<0.000000e+00> : vector<128xf32>
    %48 = vector.multi_reduction <add>, %47, %cst_9 [1] : vector<128x256xf32> to vector<128xf32>
    %49 = vector.shape_cast %48 : vector<128xf32> to vector<128x1xf32>
    %50 = arith.truncf %27 : vector<128x256xf32> to vector<128x256xbf16>
    %cst_10 = arith.constant dense<0.000000e+00> : vector<128x128xf32>
    %51 = tpu.matmul %46, %50, %cst_10 {dimension_numbers = #tpu.dot_dimension_numbers<[1], [1], [0], [0], [0, 0, 1, 0], [], []>} : vector<128x256xbf16>, vector<128x256xbf16>, vector<128x128xf32> -> vector<128x128xf32>
    %52 = tpu.reciprocal %49 {approx = true} : vector<128x1xf32> -> vector<128x1xf32>
    %cst_11 = arith.constant 0.176776692 : f32
    %53 = vector.broadcast %cst_11 : f32 to vector<128x1xf32>
    %54 = arith.mulf %52, %53 : vector<128x1xf32>
    %c0_12 = arith.constant 0 : index
    %c0_13 = arith.constant 0 : index
    %55 = vector.load %arg7[%c0_12, %c0_13] : memref<128x128xf32, #tpu.memory_space<vmem>>, vector<128x128xf32>
    %56 = arith.mulf %51, %55 : vector<128x128xf32>
    %57 = vector.broadcast %54 : vector<128x1xf32> to vector<128x128xf32>
    %58 = arith.mulf %56, %57 : vector<128x128xf32>
    %c0_14 = arith.constant 0 : index
    %c0_15 = arith.constant 0 : index
    %59 = vector.load %arg3[%c0_14, %c0_15] : memref<4x128xf32, #tpu.memory_space<vmem>>, vector<4x128xf32>
    %cst_16 = arith.constant dense<0.000000e+00> : vector<4x128xf32>
    %60 = tpu.matmul %59, %58, %cst_16 {dimension_numbers = #tpu.dot_dimension_numbers<[1], [1], [0], [0], [0, 0, 1, 0], [], []>} : vector<4x128xf32>, vector<128x128xf32>, vector<4x128xf32> -> vector<4x128xf32>
    %61 = arith.truncf %60 : vector<4x128xf32> to vector<4x128xbf16>
    %cst_17 = arith.constant dense<0.000000e+00> : vector<4x256xf32>
    %62 = tpu.matmul %61, %40, %cst_17 {dimension_numbers = #tpu.dot_dimension_numbers<[1], [0], [0], [1], [0, 0, 1, 1], [], []>} : vector<4x128xbf16>, vector<128x256xbf16>, vector<4x256xf32> -> vector<4x256xf32>
    %c0_18 = arith.constant 0 : index
    %c0_19 = arith.constant 0 : index
    %63 = vector.load %arg4[%c0_18, %c0_19] : memref<4x1xf32, #tpu.memory_space<vmem>>, vector<4x1xf32>
    %64 = vector.broadcast %63 : vector<4x1xf32> to vector<4x256xf32>
    %65 = arith.addf %62, %64 : vector<4x256xf32>
    %66 = vector.shape_cast %65 : vector<4x256xf32> to vector<1x4x256xf32>
    %cst_20 = arith.constant dense<0.000000e+00> : vector<1xf32>
    %67 = vector.multi_reduction <add>, %66, %cst_20 [1, 2] : vector<1x4x256xf32> to vector<1xf32>
    %68 = vector.shape_cast %67 : vector<1xf32> to vector<1x1x1xf32>
    %69 = vector.extract %68[0, 0, 0] : f32 from vector<1x1x1xf32>
    %cst_21 = arith.constant 1.024000e+03 : f32
    %70 = arith.divf %69, %cst_21 : f32
    %71 = arith.mulf %65, %65 : vector<4x256xf32>
    %72 = vector.shape_cast %71 : vector<4x256xf32> to vector<1x4x256xf32>
    %cst_22 = arith.constant dense<0.000000e+00> : vector<1xf32>
    %73 = vector.multi_reduction <add>, %72, %cst_22 [1, 2] : vector<1x4x256xf32> to vector<1xf32>
    %74 = vector.shape_cast %73 : vector<1xf32> to vector<1x1x1xf32>
    %75 = vector.extract %74[0, 0, 0] : f32 from vector<1x1x1xf32>
    %cst_23 = arith.constant 1.024000e+03 : f32
    %76 = arith.divf %75, %cst_23 : f32
    %77 = arith.mulf %70, %70 : f32
    %78 = arith.subf %76, %77 : f32
    %cst_24 = arith.constant 0.000000e+00 : f32
    %79 = arith.maximumf %78, %cst_24 : f32
    %cst_25 = arith.constant 9.99999974E-6 : f32
    %80 = arith.addf %79, %cst_25 : f32
    %81 = math.rsqrt %80 : f32
    %c0_26 = arith.constant 0 : index
    %c0_27 = arith.constant 0 : index
    %82 = vector.load %arg5[%c0_26, %c0_27] : memref<4x1xf32, #tpu.memory_space<vmem>>, vector<4x1xf32>
    %83 = vector.broadcast %81 : f32 to vector<4x1xf32>
    %84 = arith.mulf %82, %83 : vector<4x1xf32>
    %c0_28 = arith.constant 0 : index
    %c0_29 = arith.constant 0 : index
    %85 = vector.load %arg6[%c0_28, %c0_29] : memref<4x1xf32, #tpu.memory_space<vmem>>, vector<4x1xf32>
    %86 = vector.broadcast %70 : f32 to vector<4x1xf32>
    %87 = arith.mulf %86, %84 : vector<4x1xf32>
    %88 = arith.subf %85, %87 : vector<4x1xf32>
    %89 = vector.broadcast %84 : vector<4x1xf32> to vector<4x256xf32>
    %90 = arith.mulf %65, %89 : vector<4x256xf32>
    %91 = vector.broadcast %88 : vector<4x1xf32> to vector<4x256xf32>
    %92 = arith.addf %90, %91 : vector<4x256xf32>
    %c0_30 = arith.constant 0 : index
    %c0_31 = arith.constant 0 : index
    %c0_32 = arith.constant 0 : index
    %93 = vector.load %arg8[%c0_30, %c0_31, %c0_32] : memref<1x4x256xf32, #tpu.memory_space<vmem>>, vector<1x4x256xf32>
    %94 = vector.shape_cast %93 : vector<1x4x256xf32> to vector<4x256xf32>
    %95 = vector.shape_cast %92 : vector<4x256xf32> to vector<1x4x256xf32>
    tpu.vector_store %arg8[%c0_30, %c0_31, %c0_32], %95 {strides = array<i32>} : memref<1x4x256xf32, #tpu.memory_space<vmem>>, vector<1x4x256xf32>,
    return
  }
  func.func @transform_0(%arg0: i32) -> (i32, i32, i32) {
    %c0_i32 = arith.constant 0 : i32
    %c0_i32_0 = arith.constant 0 : i32
    %c0_i32_1 = arith.constant 0 : i32
    return %arg0, %c0_i32, %c0_i32_0 : i32, i32, i32
  }
  func.func @transform_1(%arg0: i32) -> (i32, i32) {
    %c0_i32 = arith.constant 0 : i32
    %c0_i32_0 = arith.constant 0 : i32
    %c0_i32_1 = arith.constant 0 : i32
    return %c0_i32, %c0_i32_0 : i32, i32
  }
  func.func @transform_2(%arg0: i32) -> (i32, i32) {
    %c0_i32 = arith.constant 0 : i32
    %c0_i32_0 = arith.constant 0 : i32
    %c0_i32_1 = arith.constant 0 : i32
    return %c0_i32, %c0_i32_0 : i32, i32
  }
  func.func @transform_3(%arg0: i32) -> (i32, i32) {
    %c0_i32 = arith.constant 0 : i32
    %c0_i32_0 = arith.constant 0 : i32
    %c0_i32_1 = arith.constant 0 : i32
    return %c0_i32, %c0_i32_0 : i32, i32
  }
  func.func @transform_4(%arg0: i32) -> (i32, i32) {
    %c0_i32 = arith.constant 0 : i32
    %c0_i32_0 = arith.constant 0 : i32
    %c0_i32_1 = arith.constant 0 : i32
    return %c0_i32, %c0_i32_0 : i32, i32
  }
  func.func @transform_5(%arg0: i32) -> (i32, i32) {
    %c0_i32 = arith.constant 0 : i32
    %c0_i32_0 = arith.constant 0 : i32
    %c0_i32_1 = arith.constant 0 : i32
    return %c0_i32, %c0_i32_0 : i32, i32
  }
  func.func @transform_6(%arg0: i32) -> (i32, i32) {
    %c0_i32 = arith.constant 0 : i32
    %c0_i32_0 = arith.constant 0 : i32
    %c0_i32_1 = arith.constant 0 : i32
    return %c0_i32, %c0_i32_0 : i32, i32
  }
  func.func @transform_7(%arg0: i32) -> (i32, i32, i32) {
    %c0_i32 = arith.constant 0 : i32
    %c0_i32_0 = arith.constant 0 : i32
    %c0_i32_1 = arith.constant 0 : i32
    return %arg0, %c0_i32, %c0_i32_0 : i32, i32, i32
  }
}

</mosaic_0001>

<bundles_post_ra>
// kernel: tpu_custom_call.1
= control target key start
LH: loop header
LB: loop body
LE: loop exit
PB: predicated region body
PF: predicated region fallthrough
CT: control target
= control target key end

     0   :  { %12 = vsyncpa [#allocation3], 0  ;;  %s5532_s0 = inlined_call_operand.vmem [shape: f32[2,4,256], index: 0, kind: input, shape index: {}]   ;;  %s5533_s1 = inlined_call_operand.vmem [shape: f32[384,4], index: 1, kind: input, shape index: {}]   ;;  %s5534_s2 = inlined_call_operand.vmem [shape: f32[4,128], index: 2, kind: input, shape index: {}]   ;;  %s5535_s3 = inlined_call_operand.vmem [shape: f32[4,1], index: 3, kind: input, shape index: {}]   ;;  %s5536_s4 = inlined_call_operand.vmem [shape: f32[4,1], index: 4, kind: input, shape index: {}]   ;;  %s5537_s5 = inlined_call_operand.vmem [shape: f32[4,1], index: 5, kind: input, shape index: {}]   ;;  %s5538_s6 = inlined_call_operand.vmem [shape: f32[128,128], index: 6, kind: input, shape index: {}]   ;;  %s5539_s7 = inlined_call_operand.hbm [shape: f32[2,4,256], index: 7, kind: output, shape index: {}]  }
   0x1   :  { %14 = vsyncpa [#allocation3 + $0x1], 0  ;;  %s3368_s24 = smov 0   ;;  %s3370_s25 = smov 0  }
   0x2   :  { %s3372_s26 = smov 0   ;;  %s3374_s27 = smov 0  }
   0x3 LB: > { %s3389_s28 = sadd.s32 4294967295, %s3318_s27   ;;  %s2876_s29 = sadd.s32 4294967294, %s3318_s27   ;;  %s3318_s27 = sphi %s3374_s27, %s5879_s27   ;;  %s3314_s26 = sphi %s3372_s26, %s5878_s26   ;;  %s3310_s25 = sphi %s3370_s25, %s5877_s25   ;;  %s3306_s24 = sphi %s3368_s24, %s5876_s24  }
   0x4   : > { %s3393_s30 = sadd.s32 1, %s3318_s27   ;;  %s179_s8 = sadd.s32 1, %s3314_s26 }
   0x5   : > { %s176_s9 = ssub.s32 %s3318_s27, %s3393_s30  ;;  %p189_p0 = scmp.ne.s32.totalorder %s3314_s26, %s3310_s25 }
   0x6   : > { %p177_p1 = scmp.eq.s32.totalorder %s176_s9, 0  ;;  %p190_p2 = scmp.eq.s32.totalorder %s3389_s28, 1 }
   0x7   : > { %p195_p3 = scmp.ne.s32.totalorder %s3310_s25, %s3306_s24  ;;  %p196_p4 = scmp.eq.s32.totalorder %s2876_s29, 1 }
   0x8   : > { %s3404_s10 = scalar_select %p177_p1, %s3314_s26, %s179_s8  }
   0x9   : > { %p3406_p5 = por %p190_p2, %p189_p0  ;;  %p3410_p6 = por %p196_p4, %p195_p3 }
   0xa   : > { %p2879_p7 = scmp.ge.s32.totalorder %s3318_s27, 1  ;;  %p240_p8 = scmp.lt.s32.totalorder %s3318_s27, 3 }
   0xc   : > { %p241_p9 = pnand %p2879_p7, %p240_p8 }
   0xe   : > { %244 = sbr.rel (%p241_p9) target bundleno = 2033 (0x7f1), region = 48 }
  0x13   : > { %v297_v0 = vld [vmem:[%s5533_s1 + $0x90] sm:$0xff]  ;;  %v295_v1 = vld [vmem:[%s5533_s1 + $0x80] sm:$0xff]  ;;  %v5546_v2 = vmov 1   ;;  %v3427_v3 = vld [vmem:[%s5533_s1 + $0x88] sm:$0xff]  ;;  %v5542_v4 = vmov 3   ;;  %v5544_v5 = vmov 2   ;;  %v568_v53 = vlaneseq }
  0x14   : > { %2998 = vset.pattern.permute.xlu0 %v5546_v2  ;;  %2994 = vset.pattern.permute.xlu1 %v5546_v2  ;;  %v3436_v6 = vld [vmem:[%s5533_s1 + $0xa0] sm:$0xff]  ;;  %v3443_v7 = vld [vmem:[%s5533_s1 + $0xb0] sm:$0xff]  ;;  %v5540_v8 = vmov 0   ;;  %v3452_v9 = vld [vmem:[%s5533_s1 + $0x98] sm:$0xff]  ;;  %p272_p10 = scmp.lt.s32.totalorder %s3389_s28, 1  ;;  %vm3325_vm0 = vmmov 0  }
  0x15   : > { %755 = vperm.xlu0 %2998, %v297_v0   ;;  %747 = vperm.xlu1 %2994, %v295_v1   ;;  %v3460_v10 = vld [vmem:[%s5533_s1 + $0x178] sm:$0xff]  ;;  %v3467_v11 = vld [vmem:[%s5533_s1 + $0x160] sm:$0xff]  ;;  %v3480_v13 = vld [vmem:[%s5533_s1 + $0xa8] sm:$0xff]  ;;  %v569_v56 = vshrl.u32 %v568_v53, 7  ;;  %vm2736_vm1 = vcmask 1043456   ;;  %s3326_s16 = smov 0.0  }
  0x16   : > { %v3475_v12 = vld [vmem:[%s5533_s1 + $0xd8] sm:$0xff]  ;;  %v3487_v14 = vld [vmem:[%s5533_s1 + $0x140] sm:$0xff]  ;;  %v3511_v17 = vld [vmem:[%s5533_s1 + $0x170] sm:$0xff]  ;;  %s273_s13 = scalar_select %p272_p10, %s3389_s28, 1 }
  0x17   : > { %v3495_v15 = vld [vmem:[%s5533_s1 + $0xf8] sm:$0xff]  ;;  %v3522_v18 = vld [vmem:[%s5533_s1 + $0xc0] sm:$0xff]  ;;  %v3529_v19 = vld [vmem:[%s5533_s1 + $0xc8] sm:$0xff]  ;;  %v876_v58 = vsub.s32 1, %v569_v56  ;;  %v880_v59 = vsub.s32 5, %v569_v56  ;;  %v570_v60 = vsub.s32 0, %v569_v56 }
  0x18   : > { %v3500_v16 = vld [vmem:[%s5533_s1 + $0xb8] sm:$0xff]  ;;  %v3538_v20 = vld [vmem:[%s5533_s1 + $0x168] sm:$0xff]  ;;  %v3547_v21 = vld [vmem:[%s5533_s1 + $0xd0] sm:$0xff]  ;;  %s2888_s14 = sshll.u32 %s273_s13, 3  ;;  %v574_v61 = vsub.s32 4, %v569_v56  ;;  %s3327_s20 = smov [#allocation2]  }
  0x19   : > { %2999 = vset.pattern.permute.xlu0 %v5542_v4  ;;  %2995 = vset.pattern.permute.xlu1 %v5544_v5  ;;  %v3556_v22 = vld [vmem:[%s5533_s1 + $0x150] sm:$0xff]  ;;  %v3563_v23 = vld [vmem:[%s5533_s1 + $0x158] sm:$0xff]  ;;  %v3571_v24 = vld [vmem:[%s5533_s1 + $0xe0] sm:$0xff]  ;;  %s276_s17 = scalar_lea.vmem %s5532_s0, %s2888_s14 }
  0x1a   : > { %1555 = vperm.xlu0 %2999, %v3427_v3   ;;  %1153 = vperm.xlu1 %2995, %v3427_v3   ;;  %v3580_v26 = vld [vmem:[%s5533_s1 + $0xe8] sm:$0xff]  ;;  %v3614_v36 = vld [vmem:[%s5533_s1 + $0xf0] sm:$0xff]  ;;  %v3640_v43 = vld [vmem:[%s5533_s1 + $0x138] sm:$0xff] }
  0x1b   : > { %v3599_v32 = vld [vmem:[%s5533_s1 + $0x148] sm:$0xff]  ;;  %v3631_v41 = vld [vmem:[%s5533_s1 + $0x130] sm:$0xff]  ;;  %v3654_v47 = vld [vmem:[%s5533_s1 + $0x120] sm:$0xff] }
  0x1c   : > { %v3665_v50 = vld [vmem:[%s5533_s1 + $0x128] sm:$0xff]  ;;  %v278_v62 = vld [vmem:[%s276_s17] sm:$0xff] }
  0x1d   : > { %v571_v53 = vrot.slane %v278_v62, %v570_v60 }
  0x1e   : > { %1567 = vperm.xlu0 %2999, %v3436_v6   ;;  %2996 = vset.pattern.permute.xlu1 %v5542_v4 }
  0x1f   : > { %1551 = vperm.xlu1 %2996, %v295_v1  }
  0x22   : > { %1575 = vperm.xlu0 %2999, %v3443_v7  }
  0x23   : > { %2997 = vset.pattern.permute.xlu1 %v5540_v8 }
  0x24   : > { %419 = vperm.xlu1 %2997, %v297_v0  }
  0x26   : > { %3005 = vset.pattern.permute.xlu0 %v5544_v5 }
  0x27   : > { %1149 = vperm.xlu0 %3005, %v295_v1  }
  0x28   : > { %3000 = vset.pattern.permute.xlu1 %v5544_v5 }
  0x29   : > { %1157 = vperm.xlu1 %3000, %v297_v0  }
  0x2b   : > { %1161 = vperm.xlu0 %3005, %v3452_v9  }
  0x2d   : > { %3001 = vset.pattern.permute.xlu1 %v5542_v4 }
  0x2e   : > { %1559 = vperm.xlu1 %3001, %v297_v0   ;;  %v1278_v0 = vsub.s32 2, %v569_v56 }
  0x2f   : > { %1173 = vperm.xlu0 %3005, %v3443_v7  }
  0x32   : > { %1563 = vperm.xlu1 %3001, %v3452_v9  }
  0x33   : > { %1273 = vperm.xlu0 %3005, %v3460_v10  }
  0x36   : > { %3002 = vset.pattern.permute.xlu1 %v5544_v5 }
  0x37   : > { %1261 = vperm.xlu0 %3005, %v3467_v11   ;;  %1165 = vperm.xlu1 %3002, %v3436_v6  }
  0x3b   : > { %1193 = vperm.xlu0 %3005, %v3475_v12   ;;  %1169 = vperm.xlu1 %3002, %v3480_v13  }
  0x3f   : > { %1245 = vperm.xlu0 %3005, %v3487_v14   ;;  %3003 = vset.pattern.permute.xlu1 %v5542_v4 }
  0x40   : > { %1571 = vperm.xlu1 %3003, %v3480_v13  }
  0x43   : > { %1209 = vperm.xlu0 %3005, %v3495_v15  }
  0x44   : > { %3004 = vset.pattern.permute.xlu1 %v5544_v5 }
  0x45   : > { %1177 = vperm.xlu1 %3004, %v3500_v16  }
  0x47   : > { %3022 = vset.pattern.permute.xlu0 %v5540_v8  ;;  %v877_v8 = vrot.slane %v278_v62, %v876_v58 }
  0x48   : > { %409 = vperm.xlu0 %3022, %v295_v1   ;;  %v1282_v1 = vsub.s32 6, %v569_v56 }
  0x49   : > { %3006 = vset.pattern.permute.xlu1 %v5542_v4 }
  0x4a   : > { %1579 = vperm.xlu1 %3006, %v3500_v16  }
  0x4c   : > { %414 = vperm.xlu0 %3022, %v3427_v3  }
  0x4e   : > { %3007 = vset.pattern.permute.xlu1 %v5544_v5 }
  0x4f   : > { %1269 = vperm.xlu1 %3007, %v3511_v17  }
  0x53   : > { %3008 = vset.pattern.permute.xlu1 %v5542_v4 }
  0x54   : > { %1671 = vperm.xlu1 %3008, %v3511_v17  }
  0x58   : > { %1675 = vperm.xlu1 %3008, %v3460_v10  }
  0x5c   : > { %3009 = vset.pattern.permute.xlu1 %v5544_v5 }
  0x5d   : > { %1181 = vperm.xlu1 %3009, %v3522_v18  }
  0x61   : > { %1185 = vperm.xlu1 %3009, %v3529_v19  }
  0x65   : > { %3010 = vset.pattern.permute.xlu1 %v5542_v4 }
  0x66   : > { %1583 = vperm.xlu1 %3010, %v3522_v18  }
  0x6a   : > { %1587 = vperm.xlu1 %3010, %v3529_v19  }
  0x6e   : > { %3011 = vset.pattern.permute.xlu1 %v5544_v5 }
  0x6f   : > { %1265 = vperm.xlu1 %3011, %v3538_v20  }
  0x73   : > { %3012 = vset.pattern.permute.xlu1 %v5542_v4 }
  0x74   : > { %1663 = vperm.xlu1 %3012, %v3467_v11  }
  0x78   : > { %3013 = vset.pattern.permute.xlu1 %v5544_v5 }
  0x79   : > { %1189 = vperm.xlu1 %3013, %v3547_v21  }
  0x7d   : > { %3014 = vset.pattern.permute.xlu1 %v5542_v4 }
  0x7e   : > { %1591 = vperm.xlu1 %3014, %v3547_v21  }
  0x82   : > { %3015 = vset.pattern.permute.xlu1 %v5544_v5 }
  0x83   : > { %1253 = vperm.xlu1 %3015, %v3556_v22  }
  0x87   : > { %1257 = vperm.xlu1 %3015, %v3563_v23  }
  0x8b   : > { %3016 = vset.pattern.permute.xlu1 %v5542_v4 }
  0x8c   : > { %1659 = vperm.xlu1 %3016, %v3563_v23  }
  0x90   : > { %3017 = vset.pattern.permute.xlu1 %v5544_v5  ;;  %v3574_v25 = vpop.permute.xlu1 %747  ;;  %v3582_v27 = vpop.permute.xlu0 %755 }
  0x91   : > { %1197 = vperm.xlu1 %3017, %v3571_v24  }
  0x95   : > { %1201 = vperm.xlu1 %3017, %v3580_v26   ;;  %v3585_v28 = vpop.permute.xlu1 %1153  ;;  %v3591_v30 = vpop.permute.xlu0 %1555 }
  0x99   : > { %3018 = vset.pattern.permute.xlu1 %v5542_v4  ;;  %v3601_v33 = vpop.permute.xlu0 %1567 }
  0x9a   : > { %1599 = vperm.xlu1 %3018, %v3571_v24   ;;  %v3589_v29 = vpop.permute.xlu1 %1551 }
  0x9d   : > { %v3607_v35 = vpop.permute.xlu0 %1575 }
  0x9e   : > { %1603 = vperm.xlu1 %3018, %v3580_v26   ;;  %5651 = vst [vmem:[#allocation5_spill] sm:$0xff] %v3607_v35 }
  0x9f   : > { %v3594_v31 = vpop.permute.xlu1 %419 }
  0xa2   : > { %3019 = vset.pattern.permute.xlu1 %v5544_v5  ;;  %v3619_v38 = vpop.permute.xlu0 %1149 }
  0xa3   : > { %1249 = vperm.xlu1 %3019, %v3599_v32  }
  0xa4   : > { %v3605_v34 = vpop.permute.xlu1 %1157 }
  0xa6   : > { %v3626_v40 = vpop.permute.xlu0 %1161 }
  0xa7   : > { %3020 = vset.pattern.permute.xlu1 %v5542_v4 }
  0xa8   : > { %1647 = vperm.xlu1 %3020, %v3487_v14  }
  0xa9   : > { %v3616_v37 = vpop.permute.xlu1 %1559 }
  0xaa   : > { %v3642_v44 = vpop.permute.xlu0 %1173 }
  0xab   : > { %5652 = vst [vmem:[#allocation6_spill] sm:$0xff] %v3642_v44  ;;  %v3690_v44 = vrot.slane %v877_v8, %v876_v58 }
  0xac   : > { %3021 = vset.pattern.permute.xlu1 %v5544_v5 }
  0xad   : > { %1205 = vperm.xlu1 %3021, %v3614_v36   ;;  %v3622_v39 = vpop.permute.xlu1 %1563 }
  0xae   : > { %v3647_v46 = vpop.permute.xlu0 %1273 }
  0xaf   : > { %5654 = vst [vmem:[#allocation8_spill] sm:$0xff] %v3647_v46  ;;  %v3694_v46 = vrot.slane %v571_v53, %v570_v60 }
  0xb1   : > { %3023 = vset.pattern.permute.xlu1 %v5542_v4 }
  0xb2   : > { %1607 = vperm.xlu1 %3023, %v3614_v36   ;;  %v3634_v42 = vpop.permute.xlu1 %1165  ;;  %v3659_v49 = vpop.permute.xlu0 %1261 }
  0xb3   : > { %5656 = vst [vmem:[#allocation10_spill] sm:$0xff] %v3659_v49  ;;  %v1680_v49 = vsub.s32 3, %v569_v56 }
  0xb6   : > { %3024 = vset.pattern.permute.xlu1 %v5544_v5  ;;  %v3645_v45 = vpop.permute.xlu1 %1169  ;;  %v3671_v52 = vpop.permute.xlu0 %1193 }
  0xb7   : > { %1237 = vperm.xlu1 %3024, %v3631_v41   ;;  %5653 = vst [vmem:[#allocation7_spill] sm:$0xff] %v3645_v45  ;;  %5658 = vst [vmem:[#allocation12_spill] sm:$0xff] %v3671_v52  ;;  %v1283_v52 = vrot.slane %v278_v62, %v1282_v1 }
  0xba   : > { %v3678_v55 = vpop.permute.xlu0 %1245 }
  0xbb   : > { %1241 = vperm.xlu1 %3024, %v3640_v43   ;;  %v3656_v48 = vpop.permute.xlu1 %1571  ;;  %5660 = vst [vmem:[#allocation14_spill] sm:$0xff] %v3678_v55  ;;  %v1279_v55 = vrot.slane %v278_v62, %v1278_v0 }
  0xbc   : > { %5655 = vst [vmem:[#allocation9_spill] sm:$0xff] %v3656_v48  ;;  %v1684_v48 = vsub.s32 7, %v569_v56  ;;  %v924_v56 = vmul.f32 %v3690_v44, %v3574_v25 }
  0xbe   : > { %v3686_v63 = vpop.permute.xlu0 %1209 }
  0xbf   : > { %3025 = vset.pattern.permute.xlu1 %v5542_v4  ;;  %5662 = vst [vmem:[#allocation16_spill] sm:$0xff] %v3686_v63 }
  0xc0   : > { %1643 = vperm.xlu1 %3025, %v3640_v43   ;;  %v3668_v51 = vpop.permute.xlu1 %1177 }
  0xc1   : > { %5657 = vst [vmem:[#allocation11_spill] sm:$0xff] %v3668_v51 }
  0xc3   : > { %v410_v45 = vpop.permute.xlu0 %409 }
  0xc4   : > { %3026 = vset.pattern.permute.xlu1 %v5544_v5  ;;  %v575_v5 = vrot.slane %v278_v62, %v574_v61  ;;  %v1681_v61 = vrot.slane %v278_v62, %v1680_v49 }
  0xc5   : > { %1229 = vperm.xlu1 %3026, %v3654_v47   ;;  %v3676_v54 = vpop.permute.xlu1 %1579 }
  0xc6   : > { %5659 = vst [vmem:[#allocation13_spill] sm:$0xff] %v3676_v54  ;;  %v3696_v63 = vrot.slane %v575_v5, %v570_v60  ;;  %v1685_v54 = vrot.slane %v278_v62, %v1684_v48 }
  0xc8   : > { %v3716_v1 = vrot.slane %v1685_v54, %v1680_v49 }
  0xc9   : > { %1233 = vperm.xlu1 %3026, %v3665_v50  }
  0xca   : > { %v3684_v57 = vpop.permute.xlu1 %1269 }
  0xcb   : > { %5661 = vst [vmem:[#allocation15_spill] sm:$0xff] %v3684_v57  ;;  %v618_v57 = vmul.f32 %v3694_v46, %v410_v45 }
  0xcd   : > { %3027 = vset.pattern.permute.xlu1 %v5542_v4  ;;  %v881_v4 = vrot.slane %v278_v62, %v880_v59  ;;  %v619_v59 = vmul.f32 %v3696_v63, %v410_v45  ;;  %v1020_v60 = vadd.f32 %v924_v56, %v618_v57  ;;  %v3714_v62 = vrot.slane %v1681_v61, %v1680_v49 }
  0xce   : > { %1635 = vperm.xlu1 %3027, %v3665_v50  }
  0xcf   : > { %v3692_v35 = vrot.slane %v881_v4, %v876_v58  ;;  %v3706_v4 = vrot.slane %v1279_v55, %v1278_v0  ;;  %v3708_v58 = vrot.slane %v1283_v52, %v1278_v0  ;;  %v1728_v52 = vmul.f32 %v3714_v62, %v3589_v29 }
  0xd0   : > { %v1729_v55 = vmul.f32 %v3716_v1, %v3589_v29 }
  0xd1   : > { %v925_v8 = vmul.f32 %v3692_v35, %v3574_v25  ;;  %5665 = vst [vmem:[#allocation19_spill] sm:$0xff] %v3706_v4  ;;  %5666 = vst [vmem:[#allocation20_spill] sm:$0xff] %v3708_v58  ;;  %v1326_v5 = vmul.f32 %v3706_v4, %v3619_v38  ;;  %v1327_v45 = vmul.f32 %v3708_v58, %v3619_v38 }
  0xd2   : > { %3028 = vset.pattern.permute.xlu1 %v5546_v2  ;;  %v3688_v2 = vpop.permute.xlu1 %1671 }
  0xd3   : > { %5663 = vst [vmem:[#allocation17_spill] sm:$0xff] %v3688_v2  ;;  %v1021_v48 = vadd.f32 %v925_v8, %v619_v59 }
  0xd5   : > { %v1423_v25 = vadd.f32 %v1327_v45, %v1021_v48 }
  0xd6   : > { %v3700_v2 = vpop.permute.xlu1 %1675 }
  0xd7   : > { %5664 = vst [vmem:[#allocation18_spill] sm:$0xff] %v3700_v2  ;;  %v1422_v2 = vadd.f32 %v1326_v5, %v1020_v60  ;;  %v3726_v51 = vadd.f32 %v1729_v55, %v1423_v25  ;;  %v3777_v25 = vld [vmem:[%s5533_s1 + $0x110] sm:$0xff]  ;;  %v3785_v55 = vld [vmem:[%s5533_s1 + $0x118] sm:$0xff] }
  0xd9   : > { %v3724_v0 = vadd.f32 %v1728_v52, %v1422_v2 }
  0xda   : > { %v3718_v53 = vpop.permute.xlu1 %1181 }
  0xdb   : > { %5667 = vst [vmem:[#allocation21_spill] sm:$0xff] %v3718_v53  ;;  %5668 = vst [vmem:[#allocation22_spill] sm:$0xff] %v3724_v0  ;;  %v2184_v49 = vmax.f32 %v3724_v0, %v3726_v51  ;;  %v5685_v0 = vmov 2  }
  0xde   : > { %v3728_v38 = vpop.permute.xlu1 %1185 }
  0xdf   : > { %5669 = vst [vmem:[#allocation23_spill] sm:$0xff] %v3728_v38 }
  0xe2   : > { %v3732_v54 = vpop.permute.xlu1 %1583 }
  0xe3   : > { %5670 = vst [vmem:[#allocation24_spill] sm:$0xff] %v3732_v54 }
  0xe6   : > { %v3734_v57 = vpop.permute.xlu1 %1587 }
  0xe7   : > { %5671 = vst [vmem:[#allocation25_spill] sm:$0xff] %v3734_v57 }
  0xea   : > { %v3736_v59 = vpop.permute.xlu1 %1265 }
  0xeb   : > { %5672 = vst [vmem:[#allocation26_spill] sm:$0xff] %v3736_v59  ;;  %v622_v59 = vmul.f32 %v3694_v46, %v3594_v31 }
  0xef   : > { %v3739_v61 = vpop.permute.xlu1 %1663 }
  0xf0   : > { %5673 = vst [vmem:[#allocation27_spill] sm:$0xff] %v3739_v61 }
  0xf2   : > { %2185 = vmax.xlane.f32.xlu1 %v2184_v49 }
  0xf4   : > { %v3742_v2 = vpop.permute.xlu1 %1189 }
  0xf5   : > { %5674 = vst [vmem:[#allocation28_spill] sm:$0xff] %v3742_v2 }
  0xf9   : > { %v3746_v29 = vpop.permute.xlu1 %1591 }
  0xfa   : > { %5675 = vst [vmem:[#allocation29_spill] sm:$0xff] %v3746_v29 }
  0xfe   : > { %v3749_v56 = vpop.permute.xlu1 %1253 }
  0xff   : > { %5676 = vst [vmem:[#allocation30_spill] sm:$0xff] %v3749_v56 }
 0x103   : > { %751 = vperm.xlu1 %3028, %v3427_v3   ;;  %v3753_v3 = vpop.permute.xlu1 %1257 }
 0x104   : > { %5677 = vst [vmem:[#allocation31_spill] sm:$0xff] %v3753_v3 }
 0x107   : > { %759 = vperm.xlu1 %3028, %v3452_v9   ;;  %v3756_v8 = vpop.permute.xlu1 %1659 }
 0x108   : > { %5678 = vst [vmem:[#allocation32_spill] sm:$0xff] %v3756_v8 }
 0x10b   : > { %763 = vperm.xlu1 %3028, %v3436_v6  }
 0x10c   : > { %v3760_v5 = vpop.permute.xlu1 %1197 }
 0x10d   : > { %5679 = vst [vmem:[#allocation33_spill] sm:$0xff] %v3760_v5  ;;  %v1732_v5 = vmul.f32 %v3714_v62, %v3616_v37 }
 0x10f   : > { %771 = vperm.xlu1 %3028, %v3443_v7  }
 0x110   : > { %v3763_v45 = vpop.permute.xlu1 %1201 }
 0x111   : > { %5680 = vst [vmem:[#allocation34_spill] sm:$0xff] %v3763_v45  ;;  %v5688_v45 = vmov 3  }
 0x113   : > { %775 = vperm.xlu1 %3028, %v3500_v16  }
 0x115   : > { %v3767_v60 = vpop.permute.xlu1 %1599 }
 0x116   : > { %5681 = vst [vmem:[#allocation35_spill] sm:$0xff] %v3767_v60  ;;  %v1330_v60 = vmul.f32 %v3706_v4, %v3605_v34 }
 0x117   : > { %867 = vperm.xlu1 %3028, %v3511_v17  }
 0x119   : > { %v3770_v48 = vpop.permute.xlu1 %1603 }
 0x11a   : > { %5682 = vst [vmem:[#allocation36_spill] sm:$0xff] %v3770_v48 }
 0x11b   : > { %871 = vperm.xlu1 %3028, %v3460_v10  }
 0x11e   : > { %v3779_v52 = vpop.permute.xlu1 %1249 }
 0x11f   : > { %779 = vperm.xlu1 %3028, %v3522_v18   ;;  %5683 = vst [vmem:[#allocation37_spill] sm:$0xff] %v3779_v52 }
 0x123   : > { %859 = vperm.xlu1 %3028, %v3467_v11   ;;  %v3787_v49 = vpop.permute.xlu1 %1647 }
 0x124   : > { %5684 = vst [vmem:[#allocation38_spill] sm:$0xff] %v3787_v49  ;;  %v5690_v49 = vmov 0  }
 0x127   : > { %791 = vperm.xlu1 %3028, %v3475_v12  }
 0x128   : > { %v3792_v48 = vpop.permute.xlu1 %1205 }
 0x129   : > { %5686 = vst [vmem:[#allocation39_spill] sm:$0xff] %v3792_v48  ;;  %v928_v48 = vmul.f32 %v3690_v44, %v3582_v27 }
 0x12b   : > { %855 = vperm.xlu1 %3028, %v3563_v23  }
 0x12d   : > { %v3795_v52 = vpop.permute.xlu1 %1607 }
 0x12e   : > { %5687 = vst [vmem:[#allocation40_spill] sm:$0xff] %v3795_v52  ;;  %v929_v52 = vmul.f32 %v3692_v35, %v3582_v27  ;;  %v1733_v27 = vmul.f32 %v3716_v1, %v3616_v37 }
 0x12f   : > { %795 = vperm.xlu1 %3028, %v3571_v24  }
 0x132   : > { %v3799_v8 = vpop.permute.xlu1 %1237 }
 0x133   : > { %843 = vperm.xlu1 %3028, %v3487_v14   ;;  %5689 = vst [vmem:[#allocation41_spill] sm:$0xff] %v3799_v8  ;;  %v623_v8 = vmul.f32 %v3696_v63, %v3594_v31 }
 0x135   : > { %v1025_v29 = vadd.f32 %v929_v52, %v623_v8  ;;  %v1731_v52 = vmul.f32 %v3716_v1, %v3591_v30 }
 0x136   : > { %v3803_v3 = vpop.permute.xlu1 %1241 }
 0x137   : > { %807 = vperm.xlu1 %3028, %v3495_v15   ;;  %5691 = vst [vmem:[#allocation42_spill] sm:$0xff] %v3803_v3 }
 0x13b   : > { %839 = vperm.xlu1 %3028, %v3640_v43   ;;  %v3805_v56 = vpop.permute.xlu1 %1643 }
 0x13c   : > { %5692 = vst [vmem:[#allocation43_spill] sm:$0xff] %v3805_v56  ;;  %v1331_v56 = vmul.f32 %v3708_v58, %v3605_v34 }
 0x13e   : > { %v1427_v54 = vadd.f32 %v1331_v56, %v1025_v29  ;;  %v1329_v29 = vmul.f32 %v3708_v58, %v3585_v28 }
 0x13f   : > { %827 = vperm.xlu1 %3028, %v3654_v47  }
 0x140   : > { %v3807_v61 = vpop.permute.xlu1 %1229  ;;  %v3829_v31 = vadd.f32 %v1733_v27, %v1427_v54  ;;  %v1328_v54 = vmul.f32 %v3706_v4, %v3585_v28 }
 0x141   : > { %5693 = vst [vmem:[#allocation44_spill] sm:$0xff] %v3807_v61  ;;  %v1024_v61 = vadd.f32 %v928_v48, %v622_v59  ;;  %v415_v59 = vpop.permute.xlu0 %414 }
 0x142   : > { %5696 = vst [vmem:[#allocation47_spill] sm:$0xff] %v3829_v31  ;;  %v620_v48 = vmul.f32 %v3694_v46, %v415_v59  ;;  %v621_v37 = vmul.f32 %v3696_v63, %v415_v59 }
 0x143   : > { %819 = vperm.xlu1 %3028, %v3777_v25   ;;  %v1426_v2 = vadd.f32 %v1330_v60, %v1024_v61  ;;  %v1730_v60 = vmul.f32 %v3714_v62, %v3591_v30 }
 0x144   : > { %v3821_v3 = vpop.permute.xlu1 %1233 }
 0x145   : > { %5694 = vst [vmem:[#allocation45_spill] sm:$0xff] %v3821_v3  ;;  %v3827_v57 = vadd.f32 %v1732_v5, %v1426_v2 }
 0x147   : > { %823 = vperm.xlu1 %3028, %v3785_v55   ;;  %5695 = vst [vmem:[#allocation46_spill] sm:$0xff] %v3827_v57  ;;  %v2190_v34 = vmax.f32 %v3827_v57, %v3829_v31 }
 0x149   : > { %v3831_v38 = vpop.permute.xlu1 %1635 }
 0x14a   : > { %5697 = vst [vmem:[#allocation48_spill] sm:$0xff] %v3831_v38 }
 0x14b   : > { %3029 = vset.pattern.permute.xlu1 %v5685_v0 }
 0x14c   : > { %1221 = vperm.xlu1 %3029, %v3777_v25  }
 0x150   : > { %1225 = vperm.xlu1 %3029, %v3785_v55  }
 0x154   : > { %3030 = vset.pattern.permute.xlu1 %v5688_v45 }
 0x155   : > { %1623 = vperm.xlu1 %3030, %v3777_v25  }
 0x159   : > { %1627 = vperm.xlu1 %3030, %v3785_v55  }
 0x15d   : > { %3031 = vset.pattern.permute.xlu1 %v5690_v49 }
 0x17b   : > { %v3833_v53 = vpop.xlane.xlu1 %2185 }
 0x17c   : > { %5698 = vst [vmem:[#allocation49_spill] sm:$0xff] %v3833_v53 }
 0x17d   : > { %2191 = vmax.xlane.f32.xlu1 %v2190_v34 }
 0x17f   : > { %v752_v8 = vpop.permute.xlu1 %751 }
 0x180   : > { %v926_v61 = vmul.f32 %v3690_v44, %v752_v8  ;;  %v927_v2 = vmul.f32 %v3692_v35, %v752_v8 }
 0x182   : > { %v1022_v56 = vadd.f32 %v926_v61, %v620_v48  ;;  %v1023_v5 = vadd.f32 %v927_v2, %v621_v37 }
 0x183   : > { %v760_v31 = vpop.permute.xlu1 %759 }
 0x184   : > { %v1424_v27 = vadd.f32 %v1328_v54, %v1022_v56  ;;  %v1425_v34 = vadd.f32 %v1329_v29, %v1023_v5  ;;  %v3900_v56 = vld [vmem:[%s5533_s1 + $0x108] sm:$0xff]  ;;  %v930_v3 = vmul.f32 %v3690_v44, %v760_v31 }
 0x186   : > { %v3849_v59 = vadd.f32 %v1730_v60, %v1424_v27  ;;  %v3851_v57 = vadd.f32 %v1731_v52, %v1425_v34  ;;  %v5705_v60 = vmov 1  }
 0x187   : > { %v3856_v28 = vpop.permute.xlu1 %763 }
 0x188   : > { %5699 = vst [vmem:[#allocation50_spill] sm:$0xff] %v3849_v59  ;;  %v2187_v8 = vmax.f32 %v3849_v59, %v3851_v57 }
 0x18a   : > { %2188 = vmax.xlane.f32.xlu0 %v2187_v8 }
 0x18b   : > { %v3859_v48 = vpop.permute.xlu1 %771 }
 0x18e   : > { %424 = vperm.xlu1 %3031, %v3452_v9  }
 0x18f   : > { %v3863_v30 = vpop.permute.xlu1 %775 }
 0x192   : > { %434 = vperm.xlu1 %3031, %v3480_v13  }
 0x193   : > { %v3866_v37 = vpop.permute.xlu1 %867 }
 0x196   : > { %439 = vperm.xlu1 %3031, %v3443_v7  }
 0x197   : > { %v3870_v9 = vpop.permute.xlu1 %871 }
 0x19a   : > { %559 = vperm.xlu1 %3031, %v3511_v17  }
 0x19b   : > { %v3873_v61 = vpop.permute.xlu1 %779 }
 0x19e   : > { %454 = vperm.xlu1 %3031, %v3529_v19  }
 0x19f   : > { %v3877_v7 = vpop.permute.xlu1 %859 }
 0x1a2   : > { %554 = vperm.xlu1 %3031, %v3538_v20  }
 0x1a3   : > { %v3880_v17 = vpop.permute.xlu1 %791 }
 0x1a4   : > { %5700 = vst [vmem:[#allocation51_spill] sm:$0xff] %v3880_v17 }
 0x1a6   : > { %459 = vperm.xlu1 %3031, %v3547_v21  }
 0x1a7   : > { %v3884_v2 = vpop.permute.xlu1 %855 }
 0x1a8   : > { %5701 = vst [vmem:[#allocation52_spill] sm:$0xff] %v3884_v2 }
 0x1aa   : > { %464 = vperm.xlu1 %3031, %v3475_v12  }
 0x1ab   : > { %v3887_v54 = vpop.permute.xlu1 %795 }
 0x1ae   : > { %539 = vperm.xlu1 %3031, %v3556_v22  }
 0x1b2   : > { %544 = vperm.xlu1 %3031, %v3563_v23   ;;  %v3891_v23 = vpop.permute.xlu1 %843 }
 0x1b3   : > { %5702 = vst [vmem:[#allocation53_spill] sm:$0xff] %v3891_v23  ;;  %v2233_v23 = vsub.f32 %v3726_v51, %v3833_v53 }
 0x1b6   : > { %474 = vperm.xlu1 %3031, %v3580_v26   ;;  %v3894_v29 = vpop.permute.xlu1 %807 }
 0x1b7   : > { %5703 = vst [vmem:[#allocation54_spill] sm:$0xff] %v3894_v29 }
 0x1ba   : > { %534 = vperm.xlu1 %3031, %v3599_v32   ;;  %v3903_v5 = vpop.permute.xlu1 %839 }
 0x1bb   : > { %5704 = vst [vmem:[#allocation55_spill] sm:$0xff] %v3903_v5 }
 0x1be   : > { %479 = vperm.xlu1 %3031, %v3614_v36   ;;  %v3912_v52 = vpop.permute.xlu1 %827 }
 0x1bf   : > { %5706 = vst [vmem:[#allocation56_spill] sm:$0xff] %v3912_v52  ;;  %v931_v52 = vmul.f32 %v3692_v35, %v760_v31 }
 0x1c2   : > { %484 = vperm.xlu1 %3031, %v3495_v15  }
 0x1c6   : > { %519 = vperm.xlu1 %3031, %v3631_v41  }
 0x1ca   : > { %524 = vperm.xlu1 %3031, %v3640_v43   ;;  %v3908_v43 = vld [vmem:[%s5533_s1 + $0x100] sm:$0xff] }
 0x1ce   : > { %514 = vperm.xlu1 %3031, %v3665_v50  }
 0x1d2   : > { %504 = vperm.xlu1 %3031, %v3785_v55   ;;  %v3916_v55 = vpop.permute.xlu1 %819 }
 0x1d3   : > { %5707 = vst [vmem:[#allocation57_spill] sm:$0xff] %v3916_v55 }
 0x1d6   : > { %494 = vperm.xlu1 %3031, %v3900_v56   ;;  %v3921_v27 = vpop.permute.xlu1 %823 }
 0x1d7   : > { %5708 = vst [vmem:[#allocation58_spill] sm:$0xff] %v3921_v27 }
 0x1da   : > { %3033 = vset.pattern.permute.xlu1 %v5705_v60  ;;  %v3924_v34 = vpop.permute.xlu1 %1221 }
 0x1db   : > { %811 = vperm.xlu1 %3033, %v3908_v43   ;;  %5709 = vst [vmem:[#allocation59_spill] sm:$0xff] %v3924_v34 }
 0x1de   : > { %v3926_v8 = vpop.permute.xlu1 %1225 }
 0x1df   : > { %3035 = vset.pattern.permute.xlu1 %v5685_v0  ;;  %5710 = vst [vmem:[#allocation60_spill] sm:$0xff] %v3926_v8  ;;  %v1333_v8 = vmul.f32 %v3708_v58, %v3626_v40 }
 0x1e0   : > { %1213 = vperm.xlu1 %3035, %v3908_v43  }
 0x1e2   : > { %v3928_v59 = vpop.permute.xlu1 %1623 }
 0x1e3   : > { %5711 = vst [vmem:[#allocation61_spill] sm:$0xff] %v3928_v59 }
 0x1e4   : > { %1217 = vperm.xlu1 %3035, %v3900_v56  }
 0x1e6   : > { %v3930_v0 = vpop.permute.xlu1 %1627 }
 0x1e7   : > { %5712 = vst [vmem:[#allocation62_spill] sm:$0xff] %v3930_v0  ;;  %v1735_v0 = vmul.f32 %v3716_v1, %v3622_v39 }
 0x1e8   : > { %3036 = vset.pattern.permute.xlu1 %v5688_v45 }
 0x1e9   : > { %1619 = vperm.xlu1 %3036, %v3900_v56  }
 0x1ed   : > { %3037 = vset.pattern.permute.xlu1 %v5690_v49  ;;  %v1332_v49 = vmul.f32 %v3706_v4, %v3626_v40 }
 0x206   : > { %v3932_v38 = vpop.xlane.xlu1 %2191 }
 0x207   : > { %5713 = vst [vmem:[#allocation63_spill] sm:$0xff] %v3932_v38  ;;  %v1734_v38 = vmul.f32 %v3714_v62, %v3622_v39 }
 0x20a   : > { %v425_v55 = vpop.permute.xlu1 %424 }
 0x20b   : > { %v624_v5 = vmul.f32 %v3694_v46, %v425_v55  ;;  %v625_v27 = vmul.f32 %v3696_v63, %v425_v55 }
 0x20d   : > { %v1026_v59 = vadd.f32 %v930_v3, %v624_v5  ;;  %v1027_v34 = vadd.f32 %v931_v52, %v625_v27  ;;  %v2266_v3 = vmul.f32 1.442695, %v2233_v23 }
 0x20f   : > { %v1428_v29 = vadd.f32 %v1332_v49, %v1026_v59  ;;  %v1429_v31 = vadd.f32 %v1333_v8, %v1027_v34  ;;  %3080 = vpow2.f32 %v2266_v3 }
 0x211   : > { %v3948_v55 = vadd.f32 %v1734_v38, %v1428_v29  ;;  %v3950_v2 = vadd.f32 %v1735_v0, %v1429_v31  ;;  %v985_v0 = vmul.f32 %v3692_v35, %v3866_v37  ;;  %v5720_v29 = vld [vmem:[#allocation13_spill] sm:$0xff] }
 0x213   : > { %5714 = vst [vmem:[#allocation64_spill] sm:$0xff] %v3948_v55  ;;  %5715 = vst [vmem:[#allocation65_spill] sm:$0xff] %v3950_v2  ;;  %v3952_v17 = vpop.xlane.xlu0 %2188  ;;  %v2193_v40 = vmax.f32 %v3948_v55, %v3950_v2 }
 0x214   : > { %5716 = vst [vmem:[#allocation66_spill] sm:$0xff] %v3952_v17  ;;  %v2235_v5 = vsub.f32 %v3851_v57, %v3952_v17  ;;  %v5777_v17 = vld [vmem:[#allocation41_spill] sm:$0xff] }
 0x215   : > { %2194 = vmax.xlane.f32.xlu0 %v2193_v40  ;;  %v5723_v40 = vld [vmem:[#allocation15_spill] sm:$0xff]  ;;  %v4340_v53 = vmul.f32 %v3706_v4, %v5777_v17 }
 0x216   : > { %v2270_v39 = vmul.f32 1.442695, %v2235_v5  ;;  %v1387_v3 = vmul.f32 %v3708_v58, %v5723_v40  ;;  %v986_v5 = vmul.f32 %v3690_v44, %v3870_v9 }
 0x218   : > { %3082 = vpow2.f32 %v2270_v39  ;;  %v987_v39 = vmul.f32 %v3692_v35, %v3870_v9 }
 0x21c   : > { %v3081_v49 = vpop.eup %3080 }
 0x225   : > { %v3083_v59 = vpop.eup %3082 }
 0x226   : > { %v3958_v51 = vpack.c.bf16 %v3083_v59, %v3081_v49 }
 0x228   : > { %5717 = vst [vmem:[#allocation67_spill] sm:$0xff] %v3958_v51  ;;  %2472 = vmatprep.mubr.bf16.mxu0 %v3958_v51 }
 0x22b   : > { %429 = vperm.xlu0 %3022, %v3436_v6   ;;  %v3990_v6 = vpop.permute.xlu1 %434 }
 0x22f   : > { %444 = vperm.xlu0 %3022, %v3500_v16   ;;  %v933_v16 = vmul.f32 %v3692_v35, %v3856_v28 }
 0x233   : > { %564 = vperm.xlu0 %3022, %v3460_v10   ;;  %v3994_v10 = vpop.permute.xlu1 %439 }
 0x237   : > { %449 = vperm.xlu0 %3022, %v3522_v18  }
 0x23b   : > { %549 = vperm.xlu0 %3022, %v3467_v11  }
 0x23f   : > { %469 = vperm.xlu0 %3022, %v3571_v24  }
 0x243   : > { %529 = vperm.xlu0 %3022, %v3487_v14  }
 0x247   : > { %509 = vperm.xlu0 %3022, %v3654_v47  }
 0x24b   : > { %499 = vperm.xlu0 %3022, %v3777_v25  }
 0x24f   : > { %489 = vperm.xlu0 %3022, %v3908_v43  }
 0x253   : > { %3032 = vset.pattern.permute.xlu0 %v5705_v60 }
 0x254   : > { %767 = vperm.xlu0 %3032, %v3480_v13   ;;  %v560_v13 = vpop.permute.xlu1 %559 }
 0x255   : > { %v679_v24 = vmul.f32 %v3696_v63, %v560_v13 }
 0x257   : > { %v1081_v52 = vadd.f32 %v985_v0, %v679_v24 }
 0x258   : > { %783 = vperm.xlu0 %3032, %v3529_v19  }
 0x25c   : > { %863 = vperm.xlu0 %3032, %v3538_v20  }
 0x260   : > { %787 = vperm.xlu0 %3032, %v3547_v21   ;;  %v1334_v21 = vmul.f32 %v3706_v4, %v3634_v42 }
 0x264   : > { %851 = vperm.xlu0 %3032, %v3556_v22  }
 0x268   : > { %799 = vperm.xlu0 %3032, %v3580_v26   ;;  %v5719_v26 = vld [vmem:[#allocation11_spill] sm:$0xff] }
 0x26c   : > { %847 = vperm.xlu0 %3032, %v3599_v32  }
 0x270   : > { %803 = vperm.xlu0 %3032, %v3614_v36   ;;  %v1341_v36 = vmul.f32 %v3708_v58, %v5719_v26 }
 0x274   : > { %835 = vperm.xlu0 %3032, %v3631_v41  }
 0x278   : > { %831 = vperm.xlu0 %3032, %v3665_v50   ;;  %v938_v50 = vmul.f32 %v3690_v44, %v3863_v30 }
 0x27c   : > { %815 = vperm.xlu0 %3032, %v3900_v56   ;;  %v1742_v56 = vmul.f32 %v3714_v62, %v5720_v29 }
 0x280   : > { %3034 = vset.pattern.permute.xlu0 %v5688_v45 }
 0x281   : > { %1667 = vperm.xlu0 %3034, %v3538_v20   ;;  %v1737_v20 = vmul.f32 %v3716_v1, %v3601_v33 }
 0x285   : > { %1595 = vperm.xlu0 %3034, %v3475_v12   ;;  %v1736_v12 = vmul.f32 %v3714_v62, %v3601_v33  ;;  %v939_v33 = vmul.f32 %v3692_v35, %v3863_v30  ;;  %v984_v30 = vmul.f32 %v3690_v44, %v3866_v37 }
 0x289   : > { %1655 = vperm.xlu0 %3034, %v3556_v22   ;;  %v1335_v22 = vmul.f32 %v3708_v58, %v3634_v42  ;;  %v678_v42 = vmul.f32 %v3694_v46, %v560_v13 }
 0x28b   : > { %v1080_v49 = vadd.f32 %v984_v30, %v678_v42 }
 0x28d   : > { %1651 = vperm.xlu0 %3034, %v3599_v32   ;;  %v1340_v32 = vmul.f32 %v3706_v4, %v5719_v26 }
 0x291   : > { %1611 = vperm.xlu0 %3034, %v3495_v15   ;;  %v932_v15 = vmul.f32 %v3690_v44, %v3856_v28 }
 0x295   : > { %1639 = vperm.xlu0 %3034, %v3631_v41  }
 0x299   : > { %1631 = vperm.xlu0 %3034, %v3654_v47  }
 0x29d   : > { %1615 = vperm.xlu0 %3034, %v3908_v43   ;;  %v1743_v43 = vmul.f32 %v3716_v1, %v5720_v29 }
 0x29e   : > { %v3996_v11 = vpop.xlane.xlu0 %2194 }
 0x29f   : > { %5718 = vst [vmem:[#allocation68_spill] sm:$0xff] %v3996_v11  ;;  %v5776_v11 = vld [vmem:[#allocation40_spill] sm:$0xff] }
 0x2a6   : > { %v430_v14 = vpop.permute.xlu0 %429 }
 0x2a7   : > { %v626_v18 = vmul.f32 %v3694_v46, %v430_v14  ;;  %v627_v19 = vmul.f32 %v3696_v63, %v430_v14 }
 0x2a9   : > { %v1028_v41 = vadd.f32 %v932_v15, %v626_v18  ;;  %v1029_v47 = vadd.f32 %v933_v16, %v627_v19  ;;  %v5724_v15 = vld [vmem:[#allocation8_spill] sm:$0xff]  ;;  %v1386_v18 = vmul.f32 %v3706_v4, %v5723_v40 }
 0x2aa   : > { %v445_v38 = vpop.permute.xlu0 %444  ;;  %v1389_v16 = vmul.f32 %v3708_v58, %v5724_v15  ;;  %v1388_v26 = vmul.f32 %v3706_v4, %v5724_v15  ;;  %v5732_v15 = vld [vmem:[#allocation5_spill] sm:$0xff] }
 0x2ab   : > { %v1430_v57 = vadd.f32 %v1334_v21, %v1028_v41  ;;  %v1431_v25 = vadd.f32 %v1335_v22, %v1029_v47  ;;  %v632_v28 = vmul.f32 %v3694_v46, %v445_v38  ;;  %v633_v23 = vmul.f32 %v3696_v63, %v445_v38  ;;  %v5727_v41 = vld [vmem:[#allocation17_spill] sm:$0xff] }
 0x2ac   : > { %v1789_v47 = vmul.f32 %v3716_v1, %v5727_v41  ;;  %v1788_v38 = vmul.f32 %v3714_v62, %v5727_v41 }
 0x2ad   : > { %v1034_v27 = vadd.f32 %v938_v50, %v632_v28  ;;  %v1035_v34 = vadd.f32 %v939_v33, %v633_v23  ;;  %v4032_v8 = vadd.f32 %v1736_v12, %v1430_v57  ;;  %v4034_v31 = vadd.f32 %v1737_v20, %v1431_v25  ;;  %v5728_v50 = vld [vmem:[#allocation18_spill] sm:$0xff] }
 0x2ae   : > { %v565_v59 = vpop.permute.xlu0 %564  ;;  %v1483_v20 = vadd.f32 %v1387_v3, %v1081_v52  ;;  %v1791_v33 = vmul.f32 %v3716_v1, %v5728_v50  ;;  %v1790_v57 = vmul.f32 %v3714_v62, %v5728_v50 }
 0x2af   : > { %5721 = vst [vmem:[#allocation11_spill] sm:$0xff] %v4032_v8  ;;  %5722 = vst [vmem:[#allocation13_spill] sm:$0xff] %v4034_v31  ;;  %v1436_v13 = vadd.f32 %v1340_v32, %v1034_v27  ;;  %v1437_v37 = vadd.f32 %v1341_v36, %v1035_v34  ;;  %v680_v14 = vmul.f32 %v3694_v46, %v565_v59  ;;  %v455_v27 = vpop.permute.xlu1 %454 }
 0x2b0   : > { %v681_v12 = vmul.f32 %v3696_v63, %v565_v59  ;;  %v2196_v19 = vmax.f32 %v4032_v8, %v4034_v31  ;;  %v1482_v36 = vadd.f32 %v1386_v18, %v1080_v49  ;;  %v1885_v28 = vadd.f32 %v1789_v47, %v1483_v20  ;;  %v5733_v20 = vld [vmem:[#allocation6_spill] sm:$0xff] }
 0x2b1   : > { %v1082_v21 = vadd.f32 %v986_v5, %v680_v14  ;;  %v4050_v22 = vadd.f32 %v1742_v56, %v1436_v13  ;;  %v4052_v24 = vadd.f32 %v1743_v43, %v1437_v37  ;;  %v630_v59 = vmul.f32 %v3694_v46, %v3994_v10 }
 0x2b2   : > { %v1083_v9 = vadd.f32 %v987_v39, %v681_v12  ;;  %2197 = vmax.xlane.f32.xlu1 %v2196_v19  ;;  %v450_v32 = vpop.permute.xlu0 %449  ;;  %v1884_v56 = vadd.f32 %v1788_v38, %v1482_v36  ;;  %v631_v37 = vmul.f32 %v3696_v63, %v3994_v10  ;;  %v936_v12 = vmul.f32 %v3690_v44, %v3859_v48 }
 0x2b3   : > { %5725 = vst [vmem:[#allocation15_spill] sm:$0xff] %v4050_v22  ;;  %5726 = vst [vmem:[#allocation8_spill] sm:$0xff] %v4052_v24  ;;  %v2205_v0 = vmax.f32 %v4050_v22, %v4052_v24  ;;  %v1484_v25 = vadd.f32 %v1388_v26, %v1082_v21  ;;  %v4072_v3 = vpop.permute.xlu1 %554  ;;  %v937_v18 = vmul.f32 %v3692_v35, %v3859_v48  ;;  %v5734_v26 = vld [vmem:[#allocation7_spill] sm:$0xff] }
 0x2b4   : > { %v1485_v42 = vadd.f32 %v1389_v16, %v1083_v9  ;;  %v1740_v16 = vmul.f32 %v3714_v62, %v5732_v15  ;;  %v1741_v19 = vmul.f32 %v3716_v1, %v5732_v15  ;;  %v1338_v21 = vmul.f32 %v3706_v4, %v5733_v20 }
 0x2b5   : > { %v1886_v43 = vadd.f32 %v1790_v57, %v1484_v25  ;;  %v1339_v10 = vmul.f32 %v3708_v58, %v5733_v20  ;;  %v1032_v9 = vadd.f32 %v936_v12, %v630_v59  ;;  %v1336_v36 = vmul.f32 %v3706_v4, %v5734_v26  ;;  %v5735_v57 = vld [vmem:[#allocation9_spill] sm:$0xff] }
 0x2b6   : > { %v1887_v23 = vadd.f32 %v1791_v33, %v1485_v42  ;;  %2206 = vmax.xlane.f32.xlu1 %v2205_v0  ;;  %v4066_v29 = vpop.permute.xlu0 %549  ;;  %v1337_v41 = vmul.f32 %v3708_v58, %v5734_v26  ;;  %v1033_v47 = vadd.f32 %v937_v18, %v631_v37  ;;  %v634_v50 = vmul.f32 %v3694_v46, %v450_v32 }
 0x2b7   : > { %v2438_v52 = vpack.c.bf16 %v1886_v43, %v1884_v56  ;;  %v4076_v39 = vpop.permute.xlu1 %459  ;;  %v628_v33 = vmul.f32 %v3694_v46, %v3990_v6  ;;  %v629_v0 = vmul.f32 %v3696_v63, %v3990_v6  ;;  %v1738_v25 = vmul.f32 %v3714_v62, %v5735_v57 }
 0x2b8   : > { %v2439_v30 = vpack.c.bf16 %v1887_v23, %v1885_v28  ;;  %v1739_v28 = vmul.f32 %v3716_v1, %v5735_v57  ;;  %v940_v23 = vmul.f32 %v3690_v44, %v3873_v61  ;;  %v635_v43 = vmul.f32 %v3696_v63, %v450_v32  ;;  %v5736_v32 = vld [vmem:[#allocation21_spill] sm:$0xff] }
 0x2b9   : > { %v941_v6 = vmul.f32 %v3692_v35, %v3873_v61  ;;  %v1434_v59 = vadd.f32 %v1338_v21, %v1032_v9  ;;  %v636_v37 = vmul.f32 %v3694_v46, %v455_v27  ;;  %v637_v12 = vmul.f32 %v3696_v63, %v455_v27  ;;  %v5737_v61 = vld [vmem:[#allocation23_spill] sm:$0xff] }
 0x2ba   : > { %2440 = vmatprep.subr.bf16.mxu0 %v2439_v30  ;;  %v4068_v34 = vpop.permute.xlu0 %469  ;;  %v1036_v15 = vadd.f32 %v940_v23, %v634_v50  ;;  %v1435_v20 = vadd.f32 %v1339_v10, %v1033_v47  ;;  %v1342_v60 = vmul.f32 %v3706_v4, %v5736_v32  ;;  %v1345_v21 = vmul.f32 %v3708_v58, %v5737_v61 }
 0x2bb   : > { %2441 = vmatpush1.bf16.xpose.msra.mxu0 %v2438_v52  ;;  %v4086_v14 = vpop.permute.xlu1 %464  ;;  %v1037_v9 = vadd.f32 %v941_v6, %v635_v43  ;;  %v4144_v23 = vadd.f32 %v1740_v16, %v1434_v59  ;;  %v642_v6 = vmul.f32 %v3694_v46, %v4068_v34  ;;  %v5743_v16 = vld [vmem:[#allocation24_spill] sm:$0xff] }
 0x2bc   : > { %v1745_v59 = vmul.f32 %v3716_v1, %v5743_v16 }
 0x2bd   : > { %5741 = vst [vmem:[#allocation7_spill] sm:$0xff] %v4144_v23 }
 0x2be   : > { %v4070_v40 = vpop.permute.xlu0 %529 }
 0x2bf   : > { %v4117_v56 = vpop.permute.xlu1 %539 }
 0x2c2   : > { %v4074_v5 = vpop.permute.xlu0 %509 }
 0x2c3   : > { %5729 = vst [vmem:[#allocation17_spill] sm:$0xff] %v4074_v5 }
 0x2c6   : > { %v4078_v49 = vpop.permute.xlu0 %499 }
 0x2c7   : > { %5730 = vst [vmem:[#allocation18_spill] sm:$0xff] %v4078_v49  ;;  %v5780_v49 = vld [vmem:[#allocation42_spill] sm:$0xff] }
 0x2ca   : > { %v4082_v13 = vpop.permute.xlu0 %489 }
 0x2cb   : > { %5731 = vst [vmem:[#allocation69_spill] sm:$0xff] %v4082_v13 }
 0x2cf   : > { %v768_v48 = vpop.permute.xlu0 %767 }
 0x2d0   : > { %v934_v42 = vmul.f32 %v3690_v44, %v768_v48  ;;  %v935_v38 = vmul.f32 %v3692_v35, %v768_v48 }
 0x2d2   : > { %v1030_v30 = vadd.f32 %v934_v42, %v628_v33  ;;  %v1031_v52 = vadd.f32 %v935_v38, %v629_v0  ;;  %v1344_v33 = vmul.f32 %v3706_v4, %v5737_v61  ;;  %v4140_v42 = vpop.permute.xlu1 %544 }
 0x2d3   : > { %v784_v18 = vpop.permute.xlu0 %783 }
 0x2d4   : > { %v942_v26 = vmul.f32 %v3690_v44, %v784_v18  ;;  %v943_v48 = vmul.f32 %v3692_v35, %v784_v18  ;;  %v1432_v57 = vadd.f32 %v1336_v36, %v1030_v30  ;;  %v1433_v45 = vadd.f32 %v1337_v41, %v1031_v52  ;;  %v5740_v41 = vld [vmem:[#allocation25_spill] sm:$0xff] }
 0x2d5   : > { %v1343_v36 = vmul.f32 %v3708_v58, %v5736_v32  ;;  %v1746_v47 = vmul.f32 %v3714_v62, %v5740_v41  ;;  %v4146_v30 = vadd.f32 %v1741_v19, %v1435_v20  ;;  %v643_v52 = vmul.f32 %v3696_v63, %v4068_v34 }
 0x2d6   : > { %v1038_v27 = vadd.f32 %v942_v26, %v636_v37  ;;  %v1039_v50 = vadd.f32 %v943_v48, %v637_v12  ;;  %v4132_v0 = vadd.f32 %v1738_v25, %v1432_v57  ;;  %v4134_v10 = vadd.f32 %v1739_v28, %v1433_v45 }
 0x2d7   : > { %v4142_v38 = vpop.permute.xlu0 %863  ;;  %5742 = vst [vmem:[#allocation9_spill] sm:$0xff] %v4146_v30  ;;  %v1747_v25 = vmul.f32 %v3716_v1, %v5740_v41  ;;  %v1438_v28 = vadd.f32 %v1342_v60, %v1036_v15  ;;  %v1439_v12 = vadd.f32 %v1343_v36, %v1037_v9  ;;  %v1744_v19 = vmul.f32 %v3714_v62, %v5743_v16  ;;  %v5748_v36 = vld [vmem:[#allocation28_spill] sm:$0xff] }
 0x2d8   : > { %5738 = vst [vmem:[#allocation5_spill] sm:$0xff] %v4132_v0  ;;  %5739 = vst [vmem:[#allocation6_spill] sm:$0xff] %v4134_v10  ;;  %v1440_v43 = vadd.f32 %v1344_v33, %v1038_v27  ;;  %v1441_v45 = vadd.f32 %v1345_v21, %v1039_v50  ;;  %v2199_v37 = vmax.f32 %v4132_v0, %v4134_v10  ;;  %v4178_v21 = vpop.permute.xlu1 %474 }
 0x2d9   : > { %v948_v60 = vmul.f32 %v3690_v44, %v3887_v54  ;;  %v949_v34 = vmul.f32 %v3692_v35, %v3887_v54  ;;  %v638_v15 = vmul.f32 %v3694_v46, %v4076_v39  ;;  %v2202_v48 = vmax.f32 %v4144_v23, %v4146_v30  ;;  %v5770_v23 = vld [vmem:[#allocation37_spill] sm:$0xff] }
 0x2da   : > { %v4160_v18 = vadd.f32 %v1746_v47, %v1440_v43  ;;  %v4162_v20 = vadd.f32 %v1747_v25, %v1441_v45  ;;  %2200 = vmax.xlane.f32.xlu0 %v2199_v37  ;;  %v639_v57 = vmul.f32 %v3696_v63, %v4076_v39  ;;  %v4180_v27 = vadd.f32 %v1744_v19, %v1438_v28  ;;  %v5749_v43 = vld [vmem:[#allocation33_spill] sm:$0xff] }
 0x2db   : > { %v788_v26 = vpop.permute.xlu0 %787  ;;  %v1044_v54 = vadd.f32 %v948_v60, %v642_v6  ;;  %v1045_v9 = vadd.f32 %v949_v34, %v643_v52  ;;  %v4182_v50 = vadd.f32 %v1745_v59, %v1439_v12  ;;  %v1346_v41 = vmul.f32 %v3706_v4, %v5748_v36  ;;  %v5750_v52 = vld [vmem:[#allocation29_spill] sm:$0xff] }
 0x2dc   : > { %5744 = vst [vmem:[#allocation21_spill] sm:$0xff] %v4160_v18  ;;  %5745 = vst [vmem:[#allocation23_spill] sm:$0xff] %v4162_v20  ;;  %v944_v32 = vmul.f32 %v3690_v44, %v788_v26  ;;  %v945_v61 = vmul.f32 %v3692_v35, %v788_v26  ;;  %v2211_v33 = vmax.f32 %v4160_v18, %v4162_v20  ;;  %v5769_v20 = vld [vmem:[#allocation36_spill] sm:$0xff] }
 0x2dd   : > { %5746 = vst [vmem:[#allocation25_spill] sm:$0xff] %v4180_v27  ;;  %5747 = vst [vmem:[#allocation24_spill] sm:$0xff] %v4182_v50  ;;  %v1347_v39 = vmul.f32 %v3708_v58, %v5748_v36  ;;  %v1350_v45 = vmul.f32 %v3706_v4, %v5749_v43  ;;  %v1351_v6 = vmul.f32 %v3708_v58, %v5749_v43 }
 0x2de   : > { %v1040_v47 = vadd.f32 %v944_v32, %v638_v15  ;;  %v1041_v25 = vadd.f32 %v945_v61, %v639_v57  ;;  %2212 = vmax.xlane.f32.xlu1 %v2211_v33  ;;  %2203 = vmax.xlane.f32.xlu0 %v2202_v48  ;;  %v1748_v37 = vmul.f32 %v3714_v62, %v5750_v52  ;;  %v5753_v48 = vld [vmem:[#allocation35_spill] sm:$0xff]  ;;  %v4208_v61 = vpop.permute.xlu1 %534 }
 0x2df   : > { %v4192_v28 = vpop.permute.xlu0 %851  ;;  %v1749_v12 = vmul.f32 %v3716_v1, %v5750_v52  ;;  %v1446_v59 = vadd.f32 %v1350_v45, %v1044_v54  ;;  %v1447_v60 = vadd.f32 %v1351_v6, %v1045_v9  ;;  %v2208_v34 = vmax.f32 %v4180_v27, %v4182_v50  ;;  %v5754_v54 = vld [vmem:[#allocation10_spill] sm:$0xff] }
 0x2e0   : > { %v1442_v16 = vadd.f32 %v1346_v41, %v1040_v47  ;;  %v1443_v19 = vadd.f32 %v1347_v39, %v1041_v25  ;;  %v1752_v57 = vmul.f32 %v3714_v62, %v5753_v48  ;;  %v1753_v32 = vmul.f32 %v3716_v1, %v5753_v48  ;;  %v5755_v39 = vld [vmem:[#allocation12_spill] sm:$0xff]  ;;  %v5758_v6 = vld [vmem:[#allocation14_spill] sm:$0xff]  ;;  %v5764_v48 = vld [vmem:[#allocation27_spill] sm:$0xff] }
 0x2e1   : > { %v4214_v9 = vmul.f32 %v3706_v4, %v5754_v54  ;;  %v4220_v41 = vmul.f32 %v3708_v58, %v5754_v54  ;;  %v4224_v47 = vmul.f32 %v3706_v4, %v5755_v39  ;;  %v4232_v45 = vmul.f32 %v3708_v58, %v5755_v39  ;;  %v5765_v39 = vld [vmem:[#allocation30_spill] sm:$0xff] }
 0x2e2   : > { %v4200_v15 = vadd.f32 %v1748_v37, %v1442_v16  ;;  %v4202_v26 = vadd.f32 %v1749_v12, %v1443_v19  ;;  %2209 = vmax.xlane.f32.xlu0 %v2208_v34  ;;  %v4226_v25 = vadd.f32 %v1752_v57, %v1446_v59  ;;  %v4228_v43 = vadd.f32 %v1753_v32, %v1447_v60  ;;  %v5760_v12 = vld [vmem:[#allocation16_spill] sm:$0xff]  ;;  %v5763_v59 = vld [vmem:[#allocation26_spill] sm:$0xff]  ;;  %v480_v18 = vpop.permute.xlu1 %479 }
 0x2e3   : > { %v4210_v33 = vpop.permute.xlu0 %799  ;;  %v4236_v52 = vmul.f32 %v3706_v4, %v5758_v6  ;;  %v4240_v37 = vmul.f32 %v3708_v58, %v5758_v6  ;;  %v4244_v16 = vmul.f32 %v3706_v4, %v5760_v12  ;;  %v4248_v19 = vmul.f32 %v3708_v58, %v5760_v12  ;;  %v5768_v27 = vld [vmem:[#allocation34_spill] sm:$0xff]  ;;  %5778 = vst [vmem:[#allocation30_spill] sm:$0xff] %v4340_v53 }
 0x2e4   : > { %5751 = vst [vmem:[#allocation28_spill] sm:$0xff] %v4200_v15  ;;  %5752 = vst [vmem:[#allocation33_spill] sm:$0xff] %v4202_v26  ;;  %v2214_v36 = vmax.f32 %v4200_v15, %v4202_v26  ;;  %v4252_v60 = vmul.f32 %v3706_v4, %v5763_v59  ;;  %v4256_v34 = vmul.f32 %v3708_v58, %v5763_v59  ;;  %v5766_v59 = vld [vmem:[#allocation31_spill] sm:$0xff]  ;;  %v5767_v26 = vld [vmem:[#allocation32_spill] sm:$0xff] }
 0x2e5   : > { %5756 = vst [vmem:[#allocation29_spill] sm:$0xff] %v4226_v25  ;;  %5757 = vst [vmem:[#allocation35_spill] sm:$0xff] %v4228_v43  ;;  %v4260_v57 = vmul.f32 %v3714_v62, %v5764_v48  ;;  %v4266_v54 = vmul.f32 %v3716_v1, %v5764_v48  ;;  %v4270_v6 = vmul.f32 %v3706_v4, %v5765_v39 }
 0x2e6   : > { %5759 = vst [vmem:[#allocation10_spill] sm:$0xff] %v4236_v52  ;;  %5761 = vst [vmem:[#allocation12_spill] sm:$0xff] %v4244_v16  ;;  %2215 = vmax.xlane.f32.xlu0 %v2214_v36  ;;  %v4274_v12 = vmul.f32 %v3708_v58, %v5765_v39  ;;  %v4278_v51 = vmul.f32 %v3706_v4, %v5766_v59  ;;  %v4282_v36 = vmul.f32 %v3708_v58, %v5766_v59 }
 0x2e7   : > { %5762 = vst [vmem:[#allocation14_spill] sm:$0xff] %v4248_v19  ;;  %v4262_v32 = vpop.permute.xlu0 %847  ;;  %v4286_v48 = vmul.f32 %v3714_v62, %v5767_v26  ;;  %v4290_v15 = vmul.f32 %v3716_v1, %v5767_v26  ;;  %v2220_v39 = vmax.f32 %v4226_v25, %v4228_v43  ;;  %v4296_v50 = vmul.f32 %v3706_v4, %v5768_v27  ;;  %v5772_v43 = vld [vmem:[#allocation38_spill] sm:$0xff] }
 0x2e8   : > { %v4300_v59 = vmul.f32 %v3708_v58, %v5768_v27  ;;  %v4304_v30 = vmul.f32 %v3714_v62, %v5769_v20  ;;  %v4308_v26 = vmul.f32 %v3716_v1, %v5769_v20  ;;  %v4312_v10 = vmul.f32 %v3706_v4, %v5770_v23 }
 0x2e9   : > { %v4316_v25 = vmul.f32 %v3708_v58, %v5770_v23  ;;  %v4320_v27 = vmul.f32 %v3714_v62, %v5772_v43  ;;  %v4324_v0 = vmul.f32 %v3716_v1, %v5772_v43  ;;  %v646_v20 = vmul.f32 %v3694_v46, %v480_v18  ;;  %v5775_v23 = vld [vmem:[#allocation39_spill] sm:$0xff] }
 0x2ea   : > { %5771 = vst [vmem:[#allocation16_spill] sm:$0xff] %v4312_v10  ;;  %2221 = vmax.xlane.f32.xlu0 %v2220_v39  ;;  %v647_v22 = vmul.f32 %v3696_v63, %v480_v18  ;;  %v1354_v55 = vmul.f32 %v3706_v4, %v5775_v23  ;;  %v1355_v2 = vmul.f32 %v3708_v58, %v5775_v23  ;;  %v5783_v10 = vld [vmem:[#allocation43_spill] sm:$0xff] }
 0x2eb   : > { %5773 = vst [vmem:[#allocation26_spill] sm:$0xff] %v4320_v27  ;;  %5774 = vst [vmem:[#allocation27_spill] sm:$0xff] %v4324_v0  ;;  %v804_v24 = vpop.permute.xlu0 %803  ;;  %v1756_v43 = vmul.f32 %v3714_v62, %v5776_v11  ;;  %v1757_v39 = vmul.f32 %v3716_v1, %v5776_v11  ;;  %v4344_v18 = vmul.f32 %v3708_v58, %v5777_v17  ;;  %v5791_v0 = vld [vmem:[#allocation53_spill] sm:$0xff] }
 0x2ec   : > { %v952_v31 = vmul.f32 %v3690_v44, %v804_v24  ;;  %v953_v8 = vmul.f32 %v3692_v35, %v804_v24  ;;  %v4348_v27 = vmul.f32 %v3706_v4, %v5780_v49  ;;  %v4352_v23 = vmul.f32 %v3708_v58, %v5780_v49 }
 0x2ed   : > { %5779 = vst [vmem:[#allocation31_spill] sm:$0xff] %v4344_v18  ;;  %v4356_v11 = vmul.f32 %v3714_v62, %v5783_v10  ;;  %v4360_v53 = vmul.f32 %v3716_v1, %v5783_v10  ;;  %v981_v4 = vmul.f32 %v3692_v35, %v3877_v7  ;;  %v5787_v10 = vld [vmem:[#allocation52_spill] sm:$0xff]  ;;  %v672_v18 = vmul.f32 %v3694_v46, %v4140_v42 }
 0x2ee   : > { %v1048_v24 = vadd.f32 %v952_v31, %v646_v20  ;;  %v1049_v13 = vadd.f32 %v953_v8, %v647_v22  ;;  %5781 = vst [vmem:[#allocation32_spill] sm:$0xff] %v4348_v27  ;;  %5782 = vst [vmem:[#allocation34_spill] sm:$0xff] %v4352_v23  ;;  %v980_v8 = vmul.f32 %v3690_v44, %v3877_v7  ;;  %v4368_v22 = vpop.permute.xlu1 %484 }
 0x2ef   : > { %5784 = vst [vmem:[#allocation36_spill] sm:$0xff] %v4356_v11  ;;  %5785 = vst [vmem:[#allocation37_spill] sm:$0xff] %v4360_v53  ;;  %v4362_v17 = vpop.permute.xlu0 %835  ;;  %v673_v31 = vmul.f32 %v3696_v63, %v4140_v42  ;;  %v5786_v11 = vld [vmem:[#allocation51_spill] sm:$0xff]  ;;  %v979_v53 = vmul.f32 %v3692_v35, %v5787_v10  ;;  %v674_v58 = vmul.f32 %v3694_v46, %v4066_v29 }
 0x2f0   : > { %v1450_v49 = vadd.f32 %v1354_v55, %v1048_v24  ;;  %v1451_v20 = vadd.f32 %v1355_v2, %v1049_v13  ;;  %v946_v27 = vmul.f32 %v3690_v44, %v5786_v11  ;;  %v675_v23 = vmul.f32 %v3696_v63, %v4066_v29 }
 0x2f1   : > { %v947_v7 = vmul.f32 %v3692_v35, %v5786_v11  ;;  %v978_v13 = vmul.f32 %v3690_v44, %v5787_v10  ;;  %v640_v24 = vmul.f32 %v3694_v46, %v4086_v14  ;;  %v641_v42 = vmul.f32 %v3696_v63, %v4086_v14 }
 0x2f2   : > { %v4382_v55 = vadd.f32 %v1756_v43, %v1450_v49  ;;  %v4384_v2 = vadd.f32 %v1757_v39, %v1451_v20  ;;  %v4398_v29 = vmul.f32 %v3690_v44, %v5791_v0  ;;  %v4402_v43 = vmul.f32 %v3692_v35, %v5791_v0  ;;  %v5792_v49 = vld [vmem:[#allocation54_spill] sm:$0xff]  ;;  %v5793_v0 = vld [vmem:[#allocation55_spill] sm:$0xff] }
 0x2f3   : > { %v4394_v5 = vpop.permute.xlu0 %831  ;;  %v1075_v39 = vadd.f32 %v979_v53, %v673_v31  ;;  %v954_v20 = vmul.f32 %v3690_v44, %v5792_v49  ;;  %v1074_v10 = vadd.f32 %v978_v13, %v672_v18  ;;  %v982_v14 = vmul.f32 %v3690_v44, %v4142_v38  ;;  %v4420_v31 = vpop.permute.xlu1 %519 }
 0x2f4   : > { %5788 = vst [vmem:[#allocation38_spill] sm:$0xff] %v4382_v55  ;;  %5789 = vst [vmem:[#allocation39_spill] sm:$0xff] %v4384_v2  ;;  %v2226_v11 = vmax.f32 %v4382_v55, %v4384_v2  ;;  %v4414_v52 = vmul.f32 %v3692_v35, %v5792_v49  ;;  %v4418_v53 = vmul.f32 %v3690_v44, %v5793_v0 }
 0x2f5   : > { %5790 = vst [vmem:[#allocation40_spill] sm:$0xff] %v4394_v5  ;;  %v983_v5 = vmul.f32 %v3692_v35, %v4142_v38  ;;  %v1076_v2 = vadd.f32 %v980_v8, %v674_v58  ;;  %v1077_v55 = vadd.f32 %v981_v4, %v675_v23  ;;  %v676_v18 = vmul.f32 %v3694_v46, %v4072_v3 }
 0x2f6   : > { %5794 = vst [vmem:[#allocation41_spill] sm:$0xff] %v4418_v53  ;;  %2227 = vmax.xlane.f32.xlu0 %v2226_v11  ;;  %v677_v13 = vmul.f32 %v3696_v63, %v4072_v3  ;;  %v1042_v38 = vadd.f32 %v946_v27, %v640_v24  ;;  %v1043_v19 = vadd.f32 %v947_v7, %v641_v42 }
 0x2f7   : > { %v4426_v16 = vpop.permute.xlu0 %815  ;;  %v4430_v49 = vmul.f32 %v3692_v35, %v5793_v0  ;;  %v1477_v53 = vadd.f32 %v4282_v36, %v1075_v39  ;;  %v950_v4 = vmul.f32 %v3690_v44, %v4210_v33  ;;  %v951_v58 = vmul.f32 %v3692_v35, %v4210_v33  ;;  %v4452_v11 = vpop.permute.xlu1 %524 }
 0x2f8   : > { %v670_v23 = vmul.f32 %v3694_v46, %v4117_v56  ;;  %v1476_v3 = vadd.f32 %v4278_v51, %v1074_v10  ;;  %v1078_v27 = vadd.f32 %v982_v14, %v676_v18  ;;  %v1079_v8 = vadd.f32 %v983_v5, %v677_v13 }
 0x2f9   : > { %v644_v7 = vmul.f32 %v3694_v46, %v4178_v21  ;;  %v645_v24 = vmul.f32 %v3696_v63, %v4178_v21  ;;  %v1478_v36 = vadd.f32 %v4214_v9, %v1076_v2  ;;  %v1479_v42 = vadd.f32 %v4220_v41, %v1077_v55 }
 0x2fa   : > { %v671_v33 = vmul.f32 %v3696_v63, %v4117_v56  ;;  %v976_v39 = vmul.f32 %v3690_v44, %v4192_v28  ;;  %v1444_v51 = vadd.f32 %v4224_v47, %v1042_v38  ;;  %v1445_v5 = vadd.f32 %v4232_v45, %v1043_v19 }
 0x2fb   : > { %v977_v10 = vmul.f32 %v3692_v35, %v4192_v28  ;;  %v1046_v21 = vadd.f32 %v950_v4, %v644_v7  ;;  %v1047_v14 = vadd.f32 %v951_v58, %v645_v24  ;;  %v4457_v41 = vadd.f32 %v4290_v15, %v1477_v53 }
 0x2fc   : > { %v1668_v9 = vpop.permute.xlu0 %1667  ;;  %v1480_v56 = vadd.f32 %v4252_v60, %v1078_v27  ;;  %v1481_v55 = vadd.f32 %v4256_v34, %v1079_v8  ;;  %v648_v45 = vmul.f32 %v3694_v46, %v4368_v22  ;;  %v1881_v19 = vadd.f32 %v4266_v54, %v1479_v42 }
 0x2fd   : > { %v1786_v2 = vmul.f32 %v3714_v62, %v1668_v9  ;;  %v1787_v47 = vmul.f32 %v3716_v1, %v1668_v9  ;;  %v1880_v28 = vadd.f32 %v4260_v57, %v1478_v36  ;;  %v4468_v0 = vadd.f32 %v4286_v48, %v1476_v3 }
 0x2fe   : > { %v667_v15 = vmul.f32 %v3696_v63, %v4070_v40  ;;  %v1072_v60 = vadd.f32 %v976_v39, %v670_v23  ;;  %v1073_v18 = vadd.f32 %v977_v10, %v671_v33  ;;  %v1448_v13 = vadd.f32 %v4296_v50, %v1046_v21  ;;  %v4482_v50 = vpop.permute.xlu1 %514 }
 0x2ff   : > { %v1882_v53 = vadd.f32 %v1786_v2, %v1480_v56  ;;  %v1883_v34 = vadd.f32 %v1787_v47, %v1481_v55  ;;  %v1449_v38 = vadd.f32 %v4300_v59, %v1047_v14  ;;  %v975_v4 = vmul.f32 %v3692_v35, %v4262_v32  ;;  %v5795_v47 = vld [vmem:[#allocation12_spill] sm:$0xff] }
 0x300   : > { %v1596_v54 = vpop.permute.xlu0 %1595  ;;  %v669_v23 = vmul.f32 %v3696_v63, %v4208_v61  ;;  %v649_v27 = vmul.f32 %v3696_v63, %v4368_v22  ;;  %v1050_v8 = vadd.f32 %v954_v20, %v648_v45  ;;  %v666_v59 = vmul.f32 %v3694_v46, %v4070_v40 }
 0x301   : > { %v1750_v57 = vmul.f32 %v3714_v62, %v1596_v54  ;;  %v1751_v48 = vmul.f32 %v3716_v1, %v1596_v54  ;;  %v2437_v58 = vpack.c.bf16 %v1883_v34, %v1881_v19  ;;  %v2436_v3 = vpack.c.bf16 %v1882_v53, %v1880_v28  ;;  %v5796_v34 = vld [vmem:[#allocation14_spill] sm:$0xff]  ;;  %v5799_v54 = vld [vmem:[#allocation17_spill] sm:$0xff] }
 0x302   : > { %v1069_v7 = vadd.f32 %v4402_v43, %v667_v15  ;;  %v1474_v42 = vadd.f32 %v4270_v6, %v1072_v60  ;;  %v974_v33 = vmul.f32 %v3690_v44, %v4262_v32  ;;  %v1071_v39 = vadd.f32 %v975_v4, %v669_v23 }
 0x303   : > { %v4487_v24 = vadd.f32 %v1750_v57, %v1444_v51  ;;  %v4489_v36 = vadd.f32 %v1751_v48, %v1445_v5  ;;  %2442 = vmatprep.subr.bf16.mxu0 %v2437_v58  ;;  %v1475_v20 = vadd.f32 %v4274_v12, %v1073_v18  ;;  %v4496_v10 = vadd.f32 %v4304_v30, %v1448_v13  ;;  %v5797_v18 = vld [vmem:[#allocation10_spill] sm:$0xff]  ;;  %v5800_v48 = vld [vmem:[#allocation16_spill] sm:$0xff] }
 0x304   : > { %v1656_v22 = vpop.permute.xlu0 %1655  ;;  %2443 = vmatpush1.bf16.xpose.msra.mxu0 %v2436_v3  ;;  %v4503_v6 = vadd.f32 %v4308_v26, %v1449_v38  ;;  %v668_v32 = vmul.f32 %v3694_v46, %v4208_v61  ;;  %v1051_v5 = vadd.f32 %v4414_v52, %v649_v27  ;;  %v663_v12 = vmul.f32 %v3696_v63, %v4420_v31  ;;  %v4514_v26 = vpop.permute.xlu1 %504  ;;  %v5801_v3 = vld [vmem:[#allocation40_spill] sm:$0xff] }
 0x305   : > { %v1780_v40 = vmul.f32 %v3714_v62, %v1656_v22  ;;  %v1781_v43 = vmul.f32 %v3716_v1, %v1656_v22  ;;  %v2217_v51 = vmax.f32 %v4487_v24, %v4489_v36  ;;  %v665_v30 = vmul.f32 %v3696_v63, %v4452_v11 }
 0x306   : > { %v1068_v21 = vadd.f32 %v4398_v29, %v666_v59  ;;  %v1471_v14 = vadd.f32 %v4240_v37, %v1069_v7  ;;  %v1070_v55 = vadd.f32 %v974_v33, %v668_v32  ;;  %v969_v61 = vmul.f32 %v3692_v35, %v4362_v17  ;;  %v5802_v7 = vld [vmem:[#allocation56_spill] sm:$0xff] }
 0x307   : > { %v1876_v9 = vadd.f32 %v1780_v40, %v1474_v42  ;;  %v1877_v56 = vadd.f32 %v1781_v43, %v1475_v20  ;;  %2218 = vmax.xlane.f32.xlu1 %v2217_v51  ;;  %v1473_v2 = vadd.f32 %v4316_v25, %v1071_v39  ;;  %v1452_v45 = vadd.f32 %v5795_v47, %v1050_v8  ;;  %v5804_v40 = vld [vmem:[#allocation34_spill] sm:$0xff] }
 0x308   : > { %v1652_v52 = vpop.permute.xlu0 %1651  ;;  %v2223_v37 = vmax.f32 %v4496_v10, %v4503_v6  ;;  %v664_v15 = vmul.f32 %v3694_v46, %v4452_v11  ;;  %v1067_v60 = vadd.f32 %v4430_v49, %v665_v30  ;;  %v1453_v25 = vadd.f32 %v5796_v34, %v1051_v5  ;;  %v4546_v22 = vpop.permute.xlu1 %494  ;;  %v5806_v30 = vld [vmem:[#allocation20_spill] sm:$0xff] }
 0x309   : > { %v1779_v19 = vmul.f32 %v3716_v1, %v1652_v52  ;;  %v2435_v29 = vpack.c.bf16 %v4457_v41, %v1877_v56  ;;  %v2434_v28 = vpack.c.bf16 %v4468_v0, %v1876_v9  ;;  %v1778_v53 = vmul.f32 %v3714_v62, %v1652_v52  ;;  %v5798_v41 = vld [vmem:[#allocation27_spill] sm:$0xff]  ;;  %v5807_v56 = vld [vmem:[#allocation26_spill] sm:$0xff]  ;;  %v5811_v34 = vld [vmem:[#allocation32_spill] sm:$0xff] }
 0x30a   : > { %v1470_v13 = vadd.f32 %v5797_v18, %v1068_v21  ;;  %v1873_v4 = vadd.f32 %v5798_v41, %v1471_v14  ;;  %v659_v57 = vmul.f32 %v3696_v63, %v5799_v54  ;;  %v968_v0 = vmul.f32 %v3690_v44, %v4362_v17  ;;  %v5803_v17 = vld [vmem:[#allocation41_spill] sm:$0xff]  ;;  %v5808_v52 = vld [vmem:[#allocation31_spill] sm:$0xff]  ;;  %v5812_v18 = vld [vmem:[#allocation18_spill] sm:$0xff] }
 0x30b   : > { %v1875_v38 = vadd.f32 %v1779_v19, %v1473_v2  ;;  %2444 = vmatprep.subr.bf16.mxu0 %v2435_v29  ;;  %2224 = vmax.xlane.f32.xlu1 %v2223_v37  ;;  %v1065_v11 = vadd.f32 %v969_v61, %v663_v12  ;;  %v1472_v49 = vadd.f32 %v5800_v48, %v1070_v55  ;;  %v5805_v12 = vld [vmem:[#allocation44_spill] sm:$0xff]  ;;  %v5809_v19 = vld [vmem:[#allocation45_spill] sm:$0xff]  ;;  %v5814_v48 = vld [vmem:[#allocation30_spill] sm:$0xff] }
 0x30c   : > { %v1612_v58 = vpop.permute.xlu0 %1611  ;;  %2445 = vmatpush1.bf16.xpose.msra.mxu0 %v2434_v28  ;;  %v967_v23 = vmul.f32 %v3692_v35, %v5801_v3  ;;  %v965_v42 = vmul.f32 %v3692_v35, %v5802_v7  ;;  %v662_v33 = vmul.f32 %v3694_v46, %v4420_v31  ;;  %v1066_v39 = vadd.f32 %v5803_v17, %v664_v15  ;;  %v5810_v37 = vld [vmem:[#allocation57_spill] sm:$0xff]  ;;  %v4566_v15 = vpop.permute.xlu1 %811 }
 0x30d   : > { %v1758_v27 = vmul.f32 %v3714_v62, %v1612_v58  ;;  %v1759_v8 = vmul.f32 %v3716_v1, %v1612_v58  ;;  %v2433_v59 = vpack.c.bf16 %v1875_v38, %v1873_v4  ;;  %v1874_v20 = vadd.f32 %v1778_v53, %v1472_v49  ;;  %v5813_v41 = vld [vmem:[#allocation37_spill] sm:$0xff] }
 0x30e   : > { %v1469_v43 = vadd.f32 %v5804_v40, %v1067_v60  ;;  %v661_v51 = vmul.f32 %v3696_v63, %v4482_v50  ;;  %v1367_v21 = vmul.f32 %v5806_v30, %v5805_v12  ;;  %v1061_v14 = vadd.f32 %v965_v42, %v659_v57  ;;  %v5817_v40 = vld [vmem:[#allocation48_spill] sm:$0xff] }
 0x30f   : > { %v4551_v32 = vadd.f32 %v1758_v27, %v1452_v45  ;;  %v4553_v5 = vadd.f32 %v1759_v8, %v1453_v25  ;;  %2446 = vmatprep.subr.bf16.mxu0 %v2433_v59  ;;  %v1064_v31 = vadd.f32 %v968_v0, %v662_v33  ;;  %v1872_v55 = vadd.f32 %v5807_v56, %v1470_v13  ;;  %v5815_v33 = vld [vmem:[#allocation58_spill] sm:$0xff]  ;;  %v5818_v56 = vld [vmem:[#allocation36_spill] sm:$0xff] }
 0x310   : > { %v1640_v9 = vpop.permute.xlu0 %1639  ;;  %v1063_v61 = vadd.f32 %v967_v23, %v661_v51  ;;  %v1467_v2 = vadd.f32 %v5808_v52, %v1065_v11  ;;  %v1369_v29 = vmul.f32 %v5806_v30, %v5809_v19  ;;  %v961_v28 = vmul.f32 %v3692_v35, %v5810_v37 }
 0x311   : > { %v1773_v47 = vmul.f32 %v3716_v1, %v1640_v9  ;;  %v2229_v45 = vmax.f32 %v4551_v32, %v4553_v5  ;;  %v1772_v60 = vmul.f32 %v3714_v62, %v1640_v9  ;;  %v2432_v53 = vpack.c.bf16 %v1874_v20, %v1872_v55  ;;  %v4591_v9 = vpop.permute.xlu1 %1213 }
 0x312   : > { %v1468_v25 = vadd.f32 %v5811_v34, %v1066_v39  ;;  %v655_v13 = vmul.f32 %v3696_v63, %v5812_v18  ;;  %v1871_v4 = vadd.f32 %v5813_v41, %v1469_v43  ;;  %v657_v57 = vmul.f32 %v3696_v63, %v4514_v26 }
 0x313   : > { %v1869_v38 = vadd.f32 %v1773_v47, %v1467_v2  ;;  %2230 = vmax.xlane.f32.xlu1 %v2229_v45  ;;  %v658_v0 = vmul.f32 %v3694_v46, %v5799_v54  ;;  %v966_v11 = vmul.f32 %v3690_v44, %v5801_v3  ;;  %v1466_v49 = vadd.f32 %v5814_v48, %v1064_v31  ;;  %v5816_v3 = vld [vmem:[#allocation19_spill] sm:$0xff]  ;;  %v5820_v47 = vld [vmem:[#allocation60_spill] sm:$0xff] }
 0x314   : > { %v1632_v58 = vpop.permute.xlu0 %1631  ;;  %2447 = vmatpush1.bf16.xpose.msra.mxu0 %v2432_v53  ;;  %v1465_v23 = vadd.f32 %v1369_v29, %v1063_v61  ;;  %v1463_v27 = vadd.f32 %v1367_v21, %v1061_v14  ;;  %v964_v42 = vmul.f32 %v3690_v44, %v5802_v7  ;;  %v963_v17 = vmul.f32 %v3692_v35, %v5815_v33 }
 0x315   : > { %v1769_v8 = vmul.f32 %v3716_v1, %v1632_v58  ;;  %v2431_v59 = vpack.c.bf16 %v1871_v4, %v1869_v38  ;;  %v660_v54 = vmul.f32 %v3694_v46, %v4482_v50  ;;  %v1868_v39 = vadd.f32 %v1772_v60, %v1466_v49  ;;  %v1218_v4 = vpop.permute.xlu1 %1217  ;;  %v5823_v49 = vld [vmem:[#allocation49_spill] sm:$0xff] }
 0x316   : > { %v1366_v20 = vmul.f32 %v5816_v3, %v5805_v12  ;;  %v1771_v43 = vmul.f32 %v3716_v1, %v5817_v40  ;;  %v1057_v51 = vadd.f32 %v961_v28, %v655_v13  ;;  %v1059_v14 = vadd.f32 %v963_v17, %v657_v57  ;;  %v5819_v12 = vld [vmem:[#allocation59_spill] sm:$0xff] }
 0x317   : > { %v1865_v21 = vadd.f32 %v1769_v8, %v1463_v27  ;;  %2448 = vmatprep.subr.bf16.mxu0 %v2431_v59  ;;  %v1060_v31 = vadd.f32 %v964_v42, %v658_v0  ;;  %v1062_v7 = vadd.f32 %v966_v11, %v660_v54  ;;  %v1870_v55 = vadd.f32 %v5818_v56, %v1468_v25  ;;  %v5825_v27 = vld [vmem:[#allocation62_spill] sm:$0xff] }
 0x318   : > { %v1368_v50 = vmul.f32 %v5816_v3, %v5809_v19  ;;  %v1770_v61 = vmul.f32 %v3714_v62, %v5817_v40  ;;  %v1363_v52 = vmul.f32 %v5806_v30, %v5819_v12  ;;  %v1867_v2 = vadd.f32 %v1771_v43, %v1465_v23  ;;  %v5826_v40 = vld [vmem:[#allocation66_spill] sm:$0xff] }
 0x319   : > { %v1365_v45 = vmul.f32 %v5806_v30, %v5820_v47  ;;  %v654_v29 = vmul.f32 %v3694_v46, %v5812_v18  ;;  %v1768_v28 = vmul.f32 %v3714_v62, %v1632_v58  ;;  %v2430_v60 = vpack.c.bf16 %v1870_v55, %v1868_v39  ;;  %v5821_v18 = vld [vmem:[#allocation61_spill] sm:$0xff]  ;;  %v5824_v58 = vld [vmem:[#allocation22_spill] sm:$0xff] }
 0x31a   : > { %v960_v53 = vmul.f32 %v3690_v44, %v5810_v37  ;;  %v656_v19 = vmul.f32 %v3694_v46, %v4514_v26  ;;  %v1459_v34 = vadd.f32 %v1363_v52, %v1057_v51  ;;  %v2429_v25 = vpack.c.bf16 %v1867_v2, %v1865_v21  ;;  %v5822_v37 = vld [vmem:[#allocation69_spill] sm:$0xff]  ;;  %v5827_v43 = vld [vmem:[#allocation50_spill] sm:$0xff]  ;;  %v1616_v21 = vpop.permute.xlu0 %1615  ;;  %v5828_v52 = vld [vmem:[#allocation68_spill] sm:$0xff] }
 0x31b   : > { %v962_v13 = vmul.f32 %v3690_v44, %v5815_v33  ;;  %v1461_v38 = vadd.f32 %v1365_v45, %v1059_v14  ;;  %v1464_v41 = vadd.f32 %v1368_v50, %v1062_v7  ;;  %v1462_v57 = vadd.f32 %v1366_v20, %v1060_v31  ;;  %v5829_v2 = vld [vmem:[#allocation65_spill] sm:$0xff] }
 0x31c   : > { %2449 = vmatpush1.bf16.xpose.msra.mxu0 %v2430_v60  ;;  %v1765_v0 = vmul.f32 %v3716_v1, %v5821_v18  ;;  %v957_v11 = vmul.f32 %v3692_v35, %v4566_v15  ;;  %v651_v48 = vmul.f32 %v3696_v63, %v5822_v37  ;;  %v959_v26 = vmul.f32 %v3692_v35, %v4426_v16  ;;  %v5830_v60 = vld [vmem:[#allocation63_spill] sm:$0xff] }
 0x31d   : > { %2450 = vmatprep.subr.bf16.mxu0 %v2429_v25  ;;  %v2232_v23 = vsub.f32 %v5824_v58, %v5823_v49  ;;  %v1767_v8 = vmul.f32 %v3716_v1, %v5825_v27  ;;  %v1056_v59 = vadd.f32 %v960_v53, %v654_v29  ;;  %v1864_v42 = vadd.f32 %v1768_v28, %v1462_v57  ;;  %v1620_v29 = vpop.permute.xlu1 %1619  ;;  %v5831_v53 = vld [vmem:[#allocation47_spill] sm:$0xff] }
 0x31e   : > { %v1362_v33 = vmul.f32 %v5816_v3, %v5819_v12  ;;  %v1058_v17 = vadd.f32 %v962_v13, %v656_v19  ;;  %v653_v54 = vmul.f32 %v3696_v63, %v4546_v22  ;;  %v1861_v39 = vadd.f32 %v1765_v0, %v1459_v34 }
 0x31f   : > { %v1364_v20 = vmul.f32 %v5816_v3, %v5820_v47  ;;  %v2234_v51 = vsub.f32 %v5827_v43, %v5826_v40  ;;  %v1866_v14 = vadd.f32 %v1770_v61, %v1464_v41  ;;  %v1863_v31 = vadd.f32 %v1767_v8, %v1461_v38 }
 0x320   : > { %v1053_v7 = vadd.f32 %v957_v11, %v651_v48  ;;  %v1359_v56 = vmul.f32 %v5806_v30, %v4591_v9  ;;  %v1055_v55 = vadd.f32 %v959_v26, %v653_v54  ;;  %v1361_v50 = vmul.f32 %v5806_v30, %v1218_v4 }
 0x321   : > { %v1764_v12 = vmul.f32 %v3714_v62, %v5821_v18  ;;  %v2239_v45 = vsub.f32 %v5829_v2, %v5828_v52  ;;  %v1458_v47 = vadd.f32 %v1362_v33, %v1056_v59  ;;  %v2428_v28 = vpack.c.bf16 %v1866_v14, %v1864_v42 }
 0x322   : > { %v2237_v61 = vsub.f32 %v5831_v53, %v5830_v60  ;;  %v1460_v19 = vadd.f32 %v1364_v20, %v1058_v17  ;;  %v1761_v34 = vmul.f32 %v3716_v1, %v1616_v21  ;;  %v2427_v25 = vpack.c.bf16 %v1863_v31, %v1861_v39  ;;  %v5832_v17 = vld [vmem:[#allocation64_spill] sm:$0xff]  ;;  %v5834_v53 = vld [vmem:[#allocation11_spill] sm:$0xff] }
 0x323   : > { %v1766_v13 = vmul.f32 %v3714_v62, %v5825_v27  ;;  %v956_v38 = vmul.f32 %v3690_v44, %v4566_v15  ;;  %v650_v41 = vmul.f32 %v3694_v46, %v5822_v37  ;;  %v958_v57 = vmul.f32 %v3690_v44, %v4426_v16 }
 0x324   : > { %2451 = vmatpush1.bf16.xpose.msra.mxu0 %v2428_v28  ;;  %v2268_v18 = vmul.f32 1.442695, %v2234_v51  ;;  %v1455_v0 = vadd.f32 %v1359_v56, %v1053_v7  ;;  %v1457_v11 = vadd.f32 %v1361_v50, %v1055_v55  ;;  %v1763_v48 = vmul.f32 %v3716_v1, %v1620_v29 }
 0x325   : > { %2452 = vmatprep.subr.bf16.mxu0 %v2427_v25  ;;  %v652_v26 = vmul.f32 %v3694_v46, %v4546_v22  ;;  %v2278_v49 = vmul.f32 1.442695, %v2239_v45  ;;  %v1860_v58 = vadd.f32 %v1764_v12, %v1458_v47  ;;  %v2264_v27 = vmul.f32 1.442695, %v2232_v23  ;;  %v5833_v23 = vld [vmem:[#allocation46_spill] sm:$0xff] }
 0x326   : > { %v2274_v15 = vmul.f32 1.442695, %v2237_v61  ;;  %v1857_v8 = vadd.f32 %v1761_v34, %v1455_v0  ;;  %v1862_v59 = vadd.f32 %v1766_v13, %v1460_v19  ;;  %v1052_v37 = vadd.f32 %v956_v38, %v650_v41  ;;  %v5835_v19 = vld [vmem:[#allocation13_spill] sm:$0xff]  ;;  %v5836_v38 = vld [vmem:[#allocation15_spill] sm:$0xff] }
 0x327   : > { %v1358_v16 = vmul.f32 %v5816_v3, %v4591_v9  ;;  %v1054_v42 = vadd.f32 %v958_v57, %v652_v26  ;;  %v1360_v33 = vmul.f32 %v5816_v3, %v1218_v4  ;;  %3084 = vpow2.f32 %v2268_v18  ;;  %v5837_v18 = vld [vmem:[#allocation8_spill] sm:$0xff] }
 0x328   : > { %v2238_v54 = vsub.f32 %v5832_v17, %v5828_v52  ;;  %v1859_v39 = vadd.f32 %v1763_v48, %v1457_v11  ;;  %3086 = vpow2.f32 %v2278_v49  ;;  %v1760_v22 = vmul.f32 %v3714_v62, %v1616_v21  ;;  %v5838_v48 = vld [vmem:[#allocation5_spill] sm:$0xff]  ;;  %v5839_v49 = vld [vmem:[#allocation6_spill] sm:$0xff] }
 0x329   : > { %v2426_v20 = vpack.c.bf16 %v1862_v59, %v1860_v58  ;;  %3088 = vpow2.f32 %v2264_v27  ;;  %v2236_v40 = vsub.f32 %v5833_v23, %v5830_v60  ;;  %v1454_v51 = vadd.f32 %v1358_v16, %v1052_v37  ;;  %v5840_v16 = vld [vmem:[#allocation7_spill] sm:$0xff] }
 0x32a   : > { %v2425_v43 = vpack.c.bf16 %v1859_v39, %v1857_v8  ;;  %3090 = vpow2.f32 %v2274_v15  ;;  %v1456_v9 = vadd.f32 %v1360_v33, %v1054_v42  ;;  %v1762_v14 = vmul.f32 %v3714_v62, %v1620_v29  ;;  %v5841_v33 = vld [vmem:[#allocation9_spill] sm:$0xff] }
 0x32b   : > { %v2276_v4 = vmul.f32 1.442695, %v2238_v54  ;;  %v1856_v31 = vadd.f32 %v1760_v22, %v1454_v51  ;;  %v2272_v7 = vmul.f32 1.442695, %v2236_v40 }
 0x32c   : > { %2453 = vmatpush1.bf16.xpose.msra.mxu0 %v2426_v20  ;;  %v1858_v56 = vadd.f32 %v1762_v14, %v1456_v9  ;;  %v5842_v20 = vld [vmem:[#allocation23_spill] sm:$0xff] }
 0x32d   : > { %2454 = vmatprep.subr.bf16.mxu0 %v2425_v43  ;;  %3092 = vpow2.f32 %v2276_v4  ;;  %v5843_v43 = vld [vmem:[#allocation24_spill] sm:$0xff]  ;;  %v5844_v4 = vld [vmem:[#allocation25_spill] sm:$0xff] }
 0x32e   : > { %v2424_v55 = vpack.c.bf16 %v1858_v56, %v1856_v31  ;;  %3094 = vpow2.f32 %v2272_v7  ;;  %v5845_v7 = vld [vmem:[#allocation21_spill] sm:$0xff] }
 0x334   : > { %2455 = vmatpush1.bf16.xpose.msra.mxu0 %v2424_v55  ;;  %v3085_v21 = vpop.eup %3084 }
 0x335   : > { %v3087_v50 = vpop.eup %3086 }
 0x336   : > { %v3089_v12 = vpop.eup %3088 }
 0x337   : > { %v3091_v52 = vpop.eup %3090  ;;  %v4661_v2 = vpack.c.bf16 %v3085_v21, %v3089_v12 }
 0x338   : > { %v4663_v45 = vpack.c.bf16 %v3087_v50, %v3091_v52 }
 0x33a   : > { %v3093_v47 = vpop.eup %3092 }
 0x33b   : > { %2473 = vmatmul.mubr.bf16.vlgmr.msra.gmra.mxu0 %v4661_v2  ;;  %v3095_v29 = vpop.eup %3094  ;;  %v2198_v60 = vpop.xlane.xlu1 %2197 }
 0x33c   : > { %2480 = vmatprep.mubr.bf16.mxu0 %v4663_v45  ;;  %v4667_v28 = vpack.c.bf16 %v3093_v47, %v3095_v29  ;;  %v2240_v61 = vsub.f32 %v5834_v53, %v2198_v60  ;;  %v2241_v34 = vsub.f32 %v5835_v19, %v2198_v60 }
 0x33e   : > { %v2280_v13 = vmul.f32 1.442695, %v2240_v61  ;;  %v2282_v57 = vmul.f32 1.442695, %v2241_v34 }
 0x33f   : > { %v2207_v25 = vpop.xlane.xlu1 %2206 }
 0x340   : > { %v2246_v41 = vsub.f32 %v5836_v38, %v2207_v25  ;;  %v2247_v0 = vsub.f32 %v5837_v18, %v2207_v25  ;;  %3096 = vpow2.f32 %v2280_v13 }
 0x341   : > { %3098 = vpow2.f32 %v2282_v57 }
 0x342   : > { %v2292_v27 = vmul.f32 1.442695, %v2246_v41  ;;  %v2294_v59 = vmul.f32 1.442695, %v2247_v0 }
 0x343   : > { %2481 = vmatmul.mubr.bf16.gmra.mxu0 %v4667_v28 }
 0x34d   : > { %v3097_v55 = vpop.eup %3096 }
 0x34e   : > { %v3099_v21 = vpop.eup %3098 }
 0x363   : > { %v2201_v11 = vpop.xlane.xlu0 %2200 }
 0x364   : > { %v2242_v26 = vsub.f32 %v5838_v48, %v2201_v11  ;;  %v2243_v58 = vsub.f32 %v5839_v49, %v2201_v11 }
 0x366   : > { %v2284_v15 = vmul.f32 1.442695, %v2242_v26  ;;  %v2286_v8 = vmul.f32 1.442695, %v2243_v58 }
 0x367   : > { %v2204_v37 = vpop.xlane.xlu0 %2203  ;;  %v2213_v54 = vpop.xlane.xlu1 %2212 }
 0x368   : > { %3100 = vpow2.f32 %v2284_v15  ;;  %v2244_v42 = vsub.f32 %v5840_v16, %v2204_v37  ;;  %v2245_v17 = vsub.f32 %v5841_v33, %v2204_v37  ;;  %v2251_v23 = vsub.f32 %v5842_v20, %v2213_v54 }
 0x369   : > { %3102 = vpow2.f32 %v2286_v8  ;;  %v2250_v56 = vsub.f32 %v5845_v7, %v2213_v54  ;;  %v5846_v54 = vld [vmem:[#allocation28_spill] sm:$0xff] }
 0x36a   : > { %3104 = vpow2.f32 %v2292_v27  ;;  %v2288_v39 = vmul.f32 1.442695, %v2244_v42  ;;  %v2290_v22 = vmul.f32 1.442695, %v2245_v17  ;;  %v2302_v14 = vmul.f32 1.442695, %v2251_v23 }
 0x36b   : > { %3106 = vpow2.f32 %v2294_v59  ;;  %v2210_v40 = vpop.xlane.xlu0 %2209  ;;  %v2300_v47 = vmul.f32 1.442695, %v2250_v56 }
 0x36c   : > { %3108 = vpow2.f32 %v2288_v39  ;;  %v2249_v51 = vsub.f32 %v5843_v43, %v2210_v40  ;;  %v2248_v31 = vsub.f32 %v5844_v4, %v2210_v40 }
 0x36d   : > { %3110 = vpow2.f32 %v2290_v22  ;;  %v5847_v22 = vld [vmem:[#allocation33_spill] sm:$0xff] }
 0x36e   : > { %v2298_v9 = vmul.f32 1.442695, %v2249_v51  ;;  %v2296_v50 = vmul.f32 1.442695, %v2248_v31 }
 0x36f   : > { %v2216_v33 = vpop.xlane.xlu0 %2215 }
 0x370   : > { %3112 = vpow2.f32 %v2298_v9  ;;  %v2252_v39 = vsub.f32 %v5846_v54, %v2216_v33  ;;  %v2253_v20 = vsub.f32 %v5847_v22, %v2216_v33  ;;  %v5848_v9 = vld [vmem:[#allocation35_spill] sm:$0xff] }
 0x371   : > { %3114 = vpow2.f32 %v2302_v14 }
 0x372   : > { %3116 = vpow2.f32 %v2296_v50  ;;  %v2304_v40 = vmul.f32 1.442695, %v2252_v39  ;;  %v2306_v43 = vmul.f32 1.442695, %v2253_v20 }
 0x373   : > { %3118 = vpow2.f32 %v2300_v47  ;;  %v2222_v23 = vpop.xlane.xlu0 %2221  ;;  %v5849_v47 = vld [vmem:[#allocation29_spill] sm:$0xff] }
 0x374   : > { %v2257_v14 = vsub.f32 %v5848_v9, %v2222_v23  ;;  %3120 = vpow2.f32 %v2304_v40 }
 0x375   : > { %v3101_v12 = vpop.eup %3100  ;;  %3122 = vpow2.f32 %v2306_v43 }
 0x376   : > { %v3103_v52 = vpop.eup %3102  ;;  %v2332_v29 = vpack.c.bf16 %v3101_v12, %v3097_v55  ;;  %v2314_v50 = vmul.f32 1.442695, %v2257_v14 }
 0x377   : > { %v3105_v60 = vpop.eup %3104  ;;  %v2333_v53 = vpack.c.bf16 %v3103_v52, %v3099_v21 }
 0x378   : > { %v3107_v61 = vpop.eup %3106  ;;  %v2354_v19 = vunpack.c.h.bf16 %v2332_v29  ;;  %v2352_v34 = vunpack.c.l.bf16 %v2332_v29 }
 0x379   : > { %v3109_v25 = vpop.eup %3108  ;;  %2488 = vmatprep.mubr.bf16.mxu0 %v2333_v53  ;;  %v2355_v13 = vunpack.c.h.bf16 %v2333_v53  ;;  %v2353_v38 = vunpack.c.l.bf16 %v2333_v53 }
 0x37a   : > { %v3111_v41 = vpop.eup %3110  ;;  %2489 = vmatmul.mubr.bf16.gmra.mxu0 %v2332_v29  ;;  %v2334_v57 = vpack.c.bf16 %v3105_v60, %v3109_v25  ;;  %v2256_v29 = vsub.f32 %v5849_v47, %v2222_v23  ;;  %v5850_v60 = vld [vmem:[#allocation38_spill] sm:$0xff] }
 0x37b   : > { %v2335_v18 = vpack.c.bf16 %v3107_v61, %v3111_v41  ;;  %v4682_v0 = vadd.f32 %v2355_v13, %v2354_v19  ;;  %v4684_v11 = vadd.f32 %v2353_v38, %v2352_v34  ;;  %v5851_v61 = vld [vmem:[#allocation39_spill] sm:$0xff] }
 0x37c   : > { %v2358_v48 = vunpack.c.h.bf16 %v2334_v57  ;;  %v2356_v26 = vunpack.c.l.bf16 %v2334_v57  ;;  %v2312_v34 = vmul.f32 1.442695, %v2256_v29 }
 0x37d   : > { %2496 = vmatprep.mubr.bf16.mxu0 %v2335_v18  ;;  %v2359_v49 = vunpack.c.h.bf16 %v2335_v18  ;;  %v2357_v58 = vunpack.c.l.bf16 %v2335_v18  ;;  %v3113_v27 = vpop.eup %3112 }
 0x37e   : > { %v3115_v8 = vpop.eup %3114 }
 0x37f   : > { %v4686_v15 = vadd.f32 %v2359_v49, %v2358_v48  ;;  %v4688_v59 = vadd.f32 %v2357_v58, %v2356_v26  ;;  %v4690_v37 = vpack.c.bf16 %v3115_v8, %v3113_v27  ;;  %v3117_v16 = vpop.eup %3116  ;;  %v2228_v55 = vpop.xlane.xlu0 %2227 }
 0x380   : > { %v3119_v42 = vpop.eup %3118  ;;  %v2260_v53 = vsub.f32 %v5850_v60, %v2228_v55 }
 0x381   : > { %v4693_v17 = vpack.c.bf16 %v3119_v42, %v3117_v16  ;;  %v3121_v18 = vpop.eup %3120 }
 0x382   : > { %2497 = vmatmul.mubr.bf16.gmra.mxu0 %v2334_v57  ;;  %v2320_v25 = vmul.f32 1.442695, %v2260_v53  ;;  %v3123_v48 = vpop.eup %3122 }
 0x383   : > { %2504 = vmatprep.mubr.bf16.mxu0 %v4690_v37  ;;  %v2362_v53 = vunpack.c.h.bf16 %v4693_v17 }
 0x38a   : > { %2505 = vmatmul.mubr.bf16.gmra.mxu0 %v4693_v17 }
 0x390   : > { %v2219_v51 = vpop.xlane.xlu1 %2218 }
 0x391   : > { %v2254_v4 = vsub.f32 %v4487_v24, %v2219_v51  ;;  %v2255_v31 = vsub.f32 %v4489_v36, %v2219_v51  ;;  %v2261_v36 = vsub.f32 %v5851_v61, %v2228_v55 }
 0x393   : > { %v2308_v7 = vmul.f32 1.442695, %v2254_v4  ;;  %v2310_v56 = vmul.f32 1.442695, %v2255_v31  ;;  %v2322_v13 = vmul.f32 1.442695, %v2261_v36 }
 0x394   : > { %v2225_v21 = vpop.xlane.xlu1 %2224 }
 0x395   : > { %3124 = vpow2.f32 %v2308_v7  ;;  %v2258_v12 = vsub.f32 %v4496_v10, %v2225_v21  ;;  %v2259_v52 = vsub.f32 %v4503_v6, %v2225_v21 }
 0x396   : > { %3126 = vpow2.f32 %v2310_v56 }
 0x397   : > { %v2318_v24 = vmul.f32 1.442695, %v2259_v52  ;;  %3128 = vpow2.f32 %v2314_v50  ;;  %v2316_v19 = vmul.f32 1.442695, %v2258_v12 }
 0x399   : > { %3130 = vpow2.f32 %v2318_v24  ;;  %v2360_v24 = vunpack.c.l.bf16 %v4693_v17  ;;  %v2351_v17 = vunpack.c.h.bf16 %v4663_v45 }
 0x39a   : > { %3132 = vpow2.f32 %v2316_v19  ;;  %v2363_v19 = vunpack.c.h.bf16 %v4690_v37 }
 0x39b   : > { %3134 = vpow2.f32 %v2312_v34  ;;  %v2361_v34 = vunpack.c.l.bf16 %v4690_v37  ;;  %v2346_v37 = vunpack.c.h.bf16 %v4661_v2 }
 0x39c   : > { %v2231_v38 = vpop.xlane.xlu1 %2230  ;;  %3136 = vpow2.f32 %v2320_v25  ;;  %v2403_v25 = vadd.f32 %v2363_v19, %v2362_v53  ;;  %v4836_v53 = vld [vmem:[%s5533_s1 + $0x18] sm:$0xff] }
 0x39d   : > { %v2262_v10 = vsub.f32 %v4551_v32, %v2231_v38  ;;  %v2263_v6 = vsub.f32 %v4553_v5, %v2231_v38  ;;  %3138 = vpow2.f32 %v2322_v13  ;;  %v2400_v13 = vadd.f32 %v2361_v34, %v2360_v24 }
 0x39e   : > { %v2350_v38 = vunpack.c.h.bf16 %v4667_v28 }
 0x39f   : > { %v2324_v41 = vmul.f32 1.442695, %v2262_v10  ;;  %v2326_v57 = vmul.f32 1.442695, %v2263_v6  ;;  %v2348_v10 = vunpack.c.l.bf16 %v4667_v28  ;;  %v2349_v6 = vunpack.c.l.bf16 %v4663_v45  ;;  %v292_v45 = vld [vmem:[%s5533_s1 + $0x68] sm:$0xff] }
 0x3a1   : > { %3140 = vpow2.f32 %v2324_v41  ;;  %v2344_v41 = vunpack.c.l.bf16 %v4661_v2  ;;  %v4730_v2 = vld [vmem:[%s5533_s1 + $0x48] sm:$0xff] }
 0x3a2   : > { %v3125_v26 = vpop.eup %3124  ;;  %3142 = vpow2.f32 %v2326_v57  ;;  %v2385_v57 = vadd.f32 %v2351_v17, %v2350_v38 }
 0x3a3   : > { %v3127_v49 = vpop.eup %3126  ;;  %v2338_v58 = vpack.c.bf16 %v3125_v26, %v3121_v18  ;;  %v5852_v18 = vld [vmem:[#allocation67_spill] sm:$0xff] }
 0x3a4   : > { %v2339_v27 = vpack.c.bf16 %v3127_v49, %v3123_v48  ;;  %v3129_v8 = vpop.eup %3128  ;;  %v2345_v48 = vunpack.c.l.bf16 %v5852_v18  ;;  %v4740_v49 = vld [vmem:[%s5533_s1 + $0x28] sm:$0xff] }
 0x3a5   : > { %v2366_v50 = vunpack.c.h.bf16 %v2338_v58  ;;  %v2364_v12 = vunpack.c.l.bf16 %v2338_v58 }
 0x3a6   : > { %2512 = vmatprep.mubr.bf16.mxu0 %v2339_v27  ;;  %v3131_v16 = vpop.eup %3130  ;;  %v2367_v29 = vunpack.c.h.bf16 %v2339_v27  ;;  %v2365_v60 = vunpack.c.l.bf16 %v2339_v27  ;;  %v2376_v28 = vadd.f32 %v2345_v48, %v2344_v41  ;;  %v5854_v27 = vmov 0  }
 0x3a7   : > { %2513 = vmatmul.mubr.bf16.gmra.mxu0 %v2338_v58  ;;  %v2341_v32 = vpack.c.bf16 %v3131_v16, %v3129_v8  ;;  %v3133_v42 = vpop.eup %3132  ;;  %v293_v58 = vld [vmem:[%s5533_s1 + $0x70] sm:$0xff]  ;;  %v294_v8 = vld [vmem:[%s5533_s1 + $0x78] sm:$0xff]  ;;  %v287_v16 = vld [vmem:[%s5533_s1 + $0x40] sm:$0xff] }
 0x3a8   : > { %v3135_v5 = vpop.eup %3134  ;;  %v2409_v61 = vadd.f32 %v2367_v29, %v2366_v50  ;;  %v2406_v36 = vadd.f32 %v2365_v60, %v2364_v12 }
 0x3a9   : > { %2520 = vmatprep.mubr.bf16.mxu0 %v2341_v32  ;;  %v3137_v33 = vpop.eup %3136  ;;  %v2340_v39 = vpack.c.bf16 %v3133_v42, %v3135_v5  ;;  %v2371_v55 = vunpack.c.h.bf16 %v2341_v32  ;;  %v2369_v21 = vunpack.c.l.bf16 %v2341_v32  ;;  %v5855_v32 = vmov 2   ;;  %v4759_v42 = vld [vmem:[%s5533_s1 + $0x20] sm:$0xff] }
 0x3aa   : > { %v3139_v54 = vpop.eup %3138 }
 0x3ab   : > { %v2370_v4 = vunpack.c.h.bf16 %v2340_v39  ;;  %v2368_v31 = vunpack.c.l.bf16 %v2340_v39 }
 0x3ad   : > { %v2415_v52 = vadd.f32 %v2371_v55, %v2370_v4  ;;  %v2412_v47 = vadd.f32 %v2369_v21, %v2368_v31  ;;  %v4788_v4 = vld [vmem:[%s5533_s1 + $0x30] sm:$0xff]  ;;  %v4794_v31 = vld [vmem:[%s5533_s1 + $0x8] sm:$0xff] }
 0x3ae   : > { %v3141_v22 = vpop.eup %3140 }
 0x3af   : > { %v3143_v20 = vpop.eup %3142  ;;  %2521 = vmatmul.mubr.bf16.gmra.mxu0 %v2340_v39  ;;  %v2342_v23 = vpack.c.bf16 %v3141_v22, %v3137_v33  ;;  %v5641_v22 = vmov 0.0  }
 0x3b0   : > { %v2343_v40 = vpack.c.bf16 %v3143_v20, %v3139_v54  ;;  %v4767_v54 = vld [vmem:[%s5533_s1] sm:$0xff]  ;;  %2907 = vmatprep.subr.mxu1 %v5641_v22  ;;  %2939 = vmatprep.mubr.msk.f32.mxu1 %vm3325_vm0, %v5641_v22 }
 0x3b1   : > { %v2374_v43 = vunpack.c.h.bf16 %v2342_v23  ;;  %v2372_v51 = vunpack.c.l.bf16 %v2342_v23 }
 0x3b2   : > { %2528 = vmatprep.mubr.bf16.mxu0 %v2343_v40  ;;  %v2375_v9 = vunpack.c.h.bf16 %v2343_v40  ;;  %v2373_v14 = vunpack.c.l.bf16 %v2343_v40 }
 0x3b4   : > { %v2421_v7 = vadd.f32 %v2375_v9, %v2374_v43  ;;  %v2418_v56 = vadd.f32 %v2373_v14, %v2372_v51  ;;  %v289_v51 = vld [vmem:[%s5533_s1 + $0x50] sm:$0xff]  ;;  %v5859_v9 = vmov 3  }
 0x3b6   : > { %2422 = vadd.xlane.f32.xlu0 %v2421_v7  ;;  %2419 = vadd.xlane.f32.xlu1 %v2418_v56  ;;  %v4802_v7 = vld [vmem:[%s5533_s1 + $0x10] sm:$0xff]  ;;  %v290_v56 = vld [vmem:[%s5533_s1 + $0x58] sm:$0xff] }
 0x3b7   : > { %2529 = vmatmul.mubr.bf16.gmra.mxu0 %v2342_v23 }
 0x3ba   : > { %2416 = vadd.xlane.f32.xlu0 %v2415_v52  ;;  %2413 = vadd.xlane.f32.xlu1 %v2412_v47 }
 0x3be   : > { %2410 = vadd.xlane.f32.xlu0 %v2409_v61  ;;  %2407 = vadd.xlane.f32.xlu1 %v2406_v36 }
 0x3c2   : > { %2404 = vadd.xlane.f32.xlu0 %v2403_v25  ;;  %2401 = vadd.xlane.f32.xlu1 %v2400_v13 }
 0x3c6   : > { %2398 = vadd.xlane.f32.xlu0 %v4686_v15  ;;  %2395 = vadd.xlane.f32.xlu1 %v4688_v59  ;;  %v2382_v15 = vadd.f32 %v2349_v6, %v2348_v10  ;;  %v2347_v59 = vunpack.c.h.bf16 %v5852_v18 }
 0x3c8   : > { %v2379_v26 = vadd.f32 %v2347_v59, %v2346_v37 }
 0x3ca   : > { %2392 = vadd.xlane.f32.xlu0 %v4682_v0  ;;  %2389 = vadd.xlane.f32.xlu1 %v4684_v11  ;;  %v291_v0 = vld [vmem:[%s5533_s1 + $0x60] sm:$0xff]  ;;  %v5853_v11 = vmov 1  }
 0x3ce   : > { %2386 = vadd.xlane.f32.xlu0 %v2385_v57  ;;  %2383 = vadd.xlane.f32.xlu1 %v2382_v15 }
 0x3d2   : > { %2380 = vadd.xlane.f32.xlu0 %v2379_v26  ;;  %2377 = vadd.xlane.f32.xlu1 %v2376_v28  ;;  %v4881_v28 = vld [vmem:[%s5533_s1 + $0x38] sm:$0xff] }
 0x3e3   : > { %394 = vperm.xlu1 %3037, %v292_v45  }
 0x3e7   : > { %3038 = vset.pattern.permute.xlu1 %v5853_v11 }
 0x3e8   : > { %1523 = vperm.xlu0 %3034, %v4730_v2   ;;  %731 = vperm.xlu1 %3038, %v291_v0  }
 0x3ec   : > { %1507 = vperm.xlu0 %3034, %v4740_v49   ;;  %735 = vperm.xlu1 %3038, %v292_v45  }
 0x3f0   : > { %3062 = vset.pattern.permute.xlu0 %v5854_v27  ;;  %3039 = vset.pattern.permute.xlu1 %v5854_v27 }
 0x3f1   : > { %389 = vperm.xlu0 %3062, %v291_v0   ;;  %399 = vperm.xlu1 %3039, %v293_v58  }
 0x3f5   : > { %404 = vperm.xlu0 %3062, %v294_v8   ;;  %3040 = vset.pattern.permute.xlu1 %v5853_v11 }
 0x3f6   : > { %739 = vperm.xlu1 %3040, %v293_v58  }
 0x3f9   : > { %369 = vperm.xlu0 %3062, %v287_v16  }
 0x3fa   : > { %3041 = vset.pattern.permute.xlu1 %v5855_v32 }
 0x3fb   : > { %1133 = vperm.xlu1 %3041, %v291_v0   ;;  %v4761_v5 = vpop.f32.mrf.mxu0 }
 0x3fc   : > { %5856 = vst [vmem:[#allocation42_spill] sm:$0xff] %v4761_v5 }
 0x3fd   : > { %349 = vperm.xlu0 %3062, %v4759_v42   ;;  %v2476_v33 = vpop.f32.mrf.mxu0 }
 0x3ff   : > { %1137 = vperm.xlu1 %3041, %v292_v45   ;;  %v4769_v39 = vpop.f32.mrf.mxu0 }
 0x400   : > { %5857 = vst [vmem:[#allocation43_spill] sm:$0xff] %v4769_v39 }
 0x401   : > { %329 = vperm.xlu0 %3062, %v4767_v54   ;;  %v2479_v20 = vpop.f32.mrf.mxu0 }
 0x403   : > { %3042 = vset.pattern.permute.xlu1 %v5853_v11  ;;  %v4774_v23 = vpop.f32.mrf.mxu0 }
 0x404   : > { %5858 = vst [vmem:[#allocation51_spill] sm:$0xff] %v4774_v23  ;;  %743 = vperm.xlu1 %3042, %v294_v8  }
 0x405   : > { %3065 = vset.pattern.permute.xlu0 %v5853_v11  ;;  %v2484_v40 = vpop.f32.mrf.mxu0 }
 0x406   : > { %719 = vperm.xlu0 %3065, %v4730_v2  }
 0x407   : > { %v4778_v43 = vpop.f32.mrf.mxu0 }
 0x408   : > { %3043 = vset.pattern.permute.xlu1 %v5859_v9 }
 0x409   : > { %1535 = vperm.xlu1 %3043, %v291_v0   ;;  %v2487_v14 = vpop.f32.mrf.mxu0 }
 0x40a   : > { %723 = vperm.xlu0 %3065, %v289_v51  }
 0x40d   : > { %1539 = vperm.xlu1 %3043, %v292_v45  }
 0x40e   : > { %703 = vperm.xlu0 %3065, %v4740_v49  }
 0x411   : > { %1543 = vperm.xlu1 %3043, %v293_v58  }
 0x412   : > { %707 = vperm.xlu0 %3065, %v4788_v4  }
 0x415   : > { %3044 = vset.pattern.permute.xlu1 %v5854_v27 }
 0x416   : > { %687 = vperm.xlu0 %3065, %v4794_v31   ;;  %374 = vperm.xlu1 %3044, %v4730_v2  }
 0x41a   : > { %691 = vperm.xlu0 %3065, %v4802_v7   ;;  %3045 = vset.pattern.permute.xlu1 %v5853_v11 }
 0x41b   : > { %715 = vperm.xlu1 %3045, %v287_v16  }
 0x41e   : > { %3070 = vset.pattern.permute.xlu0 %v5855_v32 }
 0x41f   : > { %1141 = vperm.xlu0 %3070, %v293_v58   ;;  %3046 = vset.pattern.permute.xlu1 %v5859_v9 }
 0x420   : > { %1547 = vperm.xlu1 %3046, %v294_v8  }
 0x423   : > { %1145 = vperm.xlu0 %3070, %v294_v8  }
 0x424   : > { %3047 = vset.pattern.permute.xlu1 %v5854_v27 }
 0x425   : > { %379 = vperm.xlu1 %3047, %v289_v51  }
 0x427   : > { %1121 = vperm.xlu0 %3070, %v4730_v2  }
 0x429   : > { %3048 = vset.pattern.permute.xlu1 %v5855_v32 }
 0x42a   : > { %1117 = vperm.xlu1 %3048, %v287_v16  }
 0x42b   : > { %1125 = vperm.xlu0 %3070, %v289_v51  }
 0x42e   : > { %3049 = vset.pattern.permute.xlu1 %v5854_v27 }
 0x42f   : > { %384 = vperm.xlu1 %3049, %v290_v56   ;;  %1105 = vperm.xlu0 %3070, %v4740_v49  }
 0x433   : > { %3050 = vset.pattern.permute.xlu1 %v5853_v11  ;;  %1109 = vperm.xlu0 %3070, %v4788_v4  }
 0x434   : > { %727 = vperm.xlu1 %3050, %v290_v56  }
 0x437   : > { %1089 = vperm.xlu0 %3070, %v4794_v31  }
 0x438   : > { %3051 = vset.pattern.permute.xlu1 %v5859_v9 }
 0x439   : > { %1519 = vperm.xlu1 %3051, %v287_v16  }
 0x43a   : > { %v4820_v55 = vpop.f32.mrf.mxu0 }
 0x43b   : > { %1093 = vperm.xlu0 %3070, %v4802_v7  }
 0x43c   : > { %v2492_v21 = vpop.f32.mrf.mxu0 }
 0x43d   : > { %3052 = vset.pattern.permute.xlu1 %v5855_v32 }
 0x43e   : > { %1129 = vperm.xlu1 %3052, %v290_v56   ;;  %v4824_v50 = vpop.f32.mrf.mxu0 }
 0x43f   : > { %v2423_v12 = vpop.xlane.xlu0 %2422  ;;  %3075 = vset.pattern.permute.xlu0 %v5859_v9  ;;  %v2420_v52 = vpop.xlane.xlu1 %2419 }
 0x440   : > { %1491 = vperm.xlu0 %3075, %v4794_v31   ;;  %v2495_v47 = vpop.f32.mrf.mxu0  ;;  %3144 = vrcp.f32 %v2423_v12 }
 0x441   : > { %3146 = vrcp.f32 %v2420_v52 }
 0x442   : > { %3053 = vset.pattern.permute.xlu1 %v5859_v9  ;;  %v4829_v29 = vpop.f32.mrf.mxu0 }
 0x443   : > { %v4831_v60 = vpop.xlane.xlu0 %2416  ;;  %1527 = vperm.xlu1 %3053, %v289_v51   ;;  %v4838_v24 = vpop.xlane.xlu1 %2413 }
 0x444   : > { %1499 = vperm.xlu0 %3075, %v4836_v53   ;;  %v2500_v61 = vpop.f32.mrf.mxu0  ;;  %3148 = vrcp.f32 %v4831_v60  ;;  %v2584_v60 = vld [vmem:[%s5538_s6 + $0x78] sm:$0xff] }
 0x445   : > { %3150 = vrcp.f32 %v4838_v24 }
 0x446   : > { %v4842_v36 = vpop.f32.mrf.mxu0 }
 0x447   : > { %v4844_v19 = vpop.xlane.xlu0 %2410  ;;  %3054 = vset.pattern.permute.xlu1 %v5854_v27  ;;  %v4847_v34 = vpop.xlane.xlu1 %2407 }
 0x448   : > { %354 = vperm.xlu1 %3054, %v4740_v49   ;;  %3079 = vset.pattern.permute.xlu0 %v5854_v27  ;;  %v2503_v25 = vpop.f32.mrf.mxu0  ;;  %3152 = vrcp.f32 %v4844_v19 }
 0x44a   : > { %v4851_v13 = vpop.f32.mrf.mxu0 }
 0x44b   : > { %v2405_v38 = vpop.xlane.xlu0 %2404  ;;  %v4853_v17 = vpop.xlane.xlu1 %2401 }
 0x44c   : > { %3055 = vset.pattern.permute.xlu1 %v5853_v11  ;;  %v2508_v10 = vpop.f32.mrf.mxu0  ;;  %3154 = vrcp.f32 %v2405_v38  ;;  %v2582_v38 = vld [vmem:[%s5538_s6 + $0x68] sm:$0xff] }
 0x44d   : > { %699 = vperm.xlu1 %3055, %v4759_v42   ;;  %3156 = vrcp.f32 %v4853_v17 }
 0x44e   : > { %v4857_v6 = vpop.f32.mrf.mxu0 }
 0x44f   : > { %v4859_v37 = vpop.xlane.xlu0 %2398  ;;  %v4861_v41 = vpop.xlane.xlu1 %2395 }
 0x450   : > { %v2511_v57 = vpop.f32.mrf.mxu0  ;;  %3158 = vrcp.f32 %v4859_v37  ;;  %v5864_v37 = vmov 0.0  }
 0x451   : > { %3056 = vset.pattern.permute.xlu1 %v5859_v9  ;;  %3160 = vrcp.f32 %v4847_v34 }
 0x452   : > { %1531 = vperm.xlu1 %3056, %v290_v56   ;;  %3162 = vrcp.f32 %v4861_v41 }
 0x453   : > { %v4864_v15 = vpop.xlane.xlu0 %2392  ;;  %v4866_v18 = vpop.xlane.xlu1 %2389 }
 0x454   : > { %3164 = vrcp.f32 %v4864_v15 }
 0x455   : > { %3166 = vrcp.f32 %v4866_v18 }
 0x456   : > { %3057 = vset.pattern.permute.xlu1 %v5854_v27 }
 0x457   : > { %359 = vperm.xlu1 %3057, %v4788_v4   ;;  %v4870_v59 = vpop.xlane.xlu1 %2383  ;;  %v4872_v48 = vpop.xlane.xlu0 %2386 }
 0x458   : > { %3168 = vrcp.f32 %v4872_v48 }
 0x459   : > { %3170 = vrcp.f32 %v4870_v59 }
 0x45b   : > { %3058 = vset.pattern.permute.xlu1 %v5855_v32  ;;  %v4875_v26 = vpop.xlane.xlu1 %2377  ;;  %v4883_v45 = vpop.xlane.xlu0 %2380 }
 0x45c   : > { %1101 = vperm.xlu1 %3058, %v4759_v42   ;;  %3172 = vrcp.f32 %v4883_v45 }
 0x45d   : > { %3174 = vrcp.f32 %v4875_v26 }
 0x45f   : > { %v4886_v2 = vpop.permute.xlu1 %394 }
 0x460   : > { %3059 = vset.pattern.permute.xlu1 %v5854_v27  ;;  %v612_v41 = vmul.f32 %v3694_v46, %v4886_v2 }
 0x461   : > { %364 = vperm.xlu1 %3059, %v4881_v28  }
 0x463   : > { %v4889_v0 = vpop.permute.xlu0 %1523  ;;  %v4891_v49 = vpop.permute.xlu1 %731 }
 0x464   : > { %v917_v48 = vmul.f32 %v3692_v35, %v4891_v49 }
 0x465   : > { %3060 = vset.pattern.permute.xlu1 %v5853_v11 }
 0x466   : > { %711 = vperm.xlu1 %3060, %v4881_v28  }
 0x467   : > { %v4895_v58 = vpop.f32.mrf.mxu0  ;;  %v4897_v8 = vpop.permute.xlu0 %1507 }
 0x468   : > { %5860 = vst [vmem:[#allocation52_spill] sm:$0xff] %v4897_v8  ;;  %v4899_v16 = vpop.permute.xlu1 %735 }
 0x469   : > { %v2516_v33 = vpop.f32.mrf.mxu0 }
 0x46a   : > { %3061 = vset.pattern.permute.xlu1 %v5859_v9  ;;  %v3145_v33 = vpop.eup %3144 }
 0x46b   : > { %v4902_v20 = vpop.f32.mrf.mxu0  ;;  %1503 = vperm.xlu1 %3061, %v4759_v42   ;;  %v2568_v22 = vmul.f32 0.17677669, %v3145_v33 }
 0x46c   : > { %v4905_v40 = vpop.permute.xlu0 %389  ;;  %v4907_v51 = vpop.permute.xlu1 %399 }
 0x46d   : > { %v2519_v14 = vpop.f32.mrf.mxu0 }
 0x46f   : > { %v2522_v56 = vpop.f32.mrf.mxu0  ;;  %3063 = vset.pattern.permute.xlu1 %v5855_v32 }
 0x470   : > { %1113 = vperm.xlu1 %3063, %v4881_v28   ;;  %v4911_v21 = vpop.permute.xlu0 %404 }
 0x471   : > { %v2524_v47 = vpop.f32.mrf.mxu0  ;;  %v4913_v61 = vpop.permute.xlu1 %739 }
 0x473   : > { %v2525_v25 = vpop.f32.mrf.mxu0 }
 0x474   : > { %3064 = vset.pattern.permute.xlu1 %v5859_v9  ;;  %v4917_v42 = vpop.permute.xlu0 %369 }
 0x475   : > { %5861 = vst [vmem:[#allocation53_spill] sm:$0xff] %v4917_v42  ;;  %v2527_v12 = vpop.f32.mrf.mxu0  ;;  %1511 = vperm.xlu1 %3064, %v4788_v4   ;;  %v2583_v4 = vld [vmem:[%s5538_s6 + $0x70] sm:$0xff] }
 0x476   : > { %v4920_v10 = vpop.permute.xlu1 %1133 }
 0x477   : > { %v2530_v52 = vpop.f32.mrf.mxu0 }
 0x478   : > { %v4923_v57 = vpop.permute.xlu0 %349  ;;  %v2599_v8 = vmul.f32 %v2583_v4, %v2530_v52  ;;  %v2598_v52 = vmul.f32 %v2582_v38, %v2525_v25 }
 0x479   : > { %5862 = vst [vmem:[#allocation54_spill] sm:$0xff] %v4923_v57  ;;  %v2532_v14 = vpop.f32.mrf.mxu0  ;;  %3066 = vset.pattern.permute.xlu1 %v5854_v27  ;;  %v3147_v57 = vpop.eup %3146 }
 0x47a   : > { %334 = vperm.xlu1 %3066, %v4794_v31   ;;  %v4934_v24 = vpop.permute.xlu1 %1137  ;;  %v2567_v17 = vmul.f32 0.17677669, %v3147_v57  ;;  %v3149_v33 = vpop.eup %3148 }
 0x47b   : > { %v2533_v47 = vpop.f32.mrf.mxu0  ;;  %v3151_v57 = vpop.eup %3150 }
 0x47c   : > { %v2600_v12 = vmul.f32 %v2584_v60, %v2533_v47  ;;  %v4937_v14 = vpop.permute.xlu0 %329  ;;  %v2615_v4 = vmul.f32 %v2599_v8, %v2567_v17  ;;  %v2566_v47 = vmul.f32 0.17677669, %v3149_v33  ;;  %v3153_v8 = vpop.eup %3152  ;;  %v2565_v17 = vmul.f32 0.17677669, %v3151_v57  ;;  %v2578_v57 = vld [vmem:[%s5538_s6 + $0x48] sm:$0xff] }
 0x47d   : > { %5863 = vst [vmem:[#allocation55_spill] sm:$0xff] %v4937_v14  ;;  %v2535_v19 = vpop.f32.mrf.mxu0  ;;  %v3155_v38 = vpop.eup %3154  ;;  %v2564_v14 = vmul.f32 0.17677669, %v3153_v8 }
 0x47e   : > { %3067 = vset.pattern.permute.xlu1 %v5853_v11  ;;  %v2616_v31 = vmul.f32 %v2600_v12, %v2568_v22  ;;  %v2581_v22 = vld [vmem:[%s5538_s6 + $0x60] sm:$0xff]  ;;  %v2614_v25 = vmul.f32 %v2598_v52, %v2566_v47  ;;  %v3157_v33 = vpop.eup %3156  ;;  %v2576_v52 = vld [vmem:[%s5538_s6 + $0x38] sm:$0xff] }
 0x47f   : > { %683 = vperm.xlu1 %3067, %v4767_v54   ;;  %v4945_v5 = vpop.permute.xlu1 %743  ;;  %v2597_v19 = vmul.f32 %v2581_v22, %v2522_v56  ;;  %v3159_v56 = vpop.eup %3158 }
 0x480   : > { %2908 = vmatpush3.xpose.msra.mxu1 %v2616_v31  ;;  %v2580_v31 = vld [vmem:[%s5538_s6 + $0x58] sm:$0xff]  ;;  %v3161_v23 = vpop.eup %3160 }
 0x481   : > { %v4948_v60 = vpop.permute.xlu0 %719  ;;  %2909 = vmatprep.subr.mxu1 %v5864_v37  ;;  %v2596_v22 = vmul.f32 %v2580_v31, %v4902_v20  ;;  %v2613_v47 = vmul.f32 %v2597_v19, %v2565_v17  ;;  %v2575_v20 = vld [vmem:[%s5538_s6 + $0x30] sm:$0xff]  ;;  %v2592_v19 = vmul.f32 %v2576_v52, %v4842_v36  ;;  %v2561_v31 = vmul.f32 0.17677669, %v3157_v33 }
 0x482   : > { %v2560_v17 = vmul.f32 0.17677669, %v3159_v56  ;;  %v918_v33 = vmul.f32 %v3690_v44, %v4899_v16  ;;  %v5006_v56 = vmul.f32 %v2575_v20, %v4829_v29  ;;  %v2563_v15 = vmul.f32 0.17677669, %v3161_v23 }
 0x483   : > { %3068 = vset.pattern.permute.xlu1 %v5859_v9  ;;  %v2612_v42 = vmul.f32 %v2596_v22, %v2564_v14  ;;  %v611_v52 = vmul.f32 %v3696_v63, %v4905_v40  ;;  %v614_v22 = vmul.f32 %v3694_v46, %v4907_v51  ;;  %v1319_v20 = vmul.f32 %v5806_v30, %v4920_v10 }
 0x484   : > { %1515 = vperm.xlu1 %3068, %v4881_v28   ;;  %2910 = vmatpush3.xpose.msra.mxu1 %v2615_v4  ;;  %v4956_v34 = vpop.permute.xlu1 %1535  ;;  %v5018_v29 = vmul.f32 %v2592_v19, %v2560_v17  ;;  %v1320_v19 = vmul.f32 %v5816_v3, %v4934_v24  ;;  %v911_v59 = vmul.f32 %v3692_v35, %v4948_v60 }
 0x485   : > { %v4958_v12 = vpop.permute.xlu0 %723  ;;  %2911 = vmatprep.subr.mxu1 %v5864_v37 }
 0x486   : > { %5865 = vst [vmem:[#allocation12_spill] sm:$0xff] %v4958_v12  ;;  %v2562_v12 = vmul.f32 0.17677669, %v3155_v38  ;;  %v2594_v38 = vmul.f32 %v2578_v57, %v4857_v6  ;;  %v920_v57 = vmul.f32 %v3690_v44, %v4913_v61 }
 0x488   : > { %3069 = vset.pattern.permute.xlu1 %v5854_v27  ;;  %2912 = vmatpush3.xpose.msra.mxu1 %v2614_v25  ;;  %v4965_v28 = vpop.permute.xlu1 %1539  ;;  %v2579_v25 = vld [vmem:[%s5538_s6 + $0x50] sm:$0xff]  ;;  %v2610_v6 = vmul.f32 %v2594_v38, %v2562_v12  ;;  %v1014_v12 = vadd.f32 %v918_v33, %v612_v41  ;;  %v1013_v41 = vadd.f32 %v917_v48, %v611_v52 }
 0x489   : > { %339 = vperm.xlu1 %3069, %v4802_v7   ;;  %v4968_v4 = vpop.permute.xlu0 %703  ;;  %2913 = vmatprep.subr.mxu1 %v5864_v37  ;;  %v1016_v33 = vadd.f32 %v920_v57, %v614_v22 }
 0x48a   : > { %5866 = vst [vmem:[#allocation14_spill] sm:$0xff] %v4968_v4  ;;  %v2577_v4 = vld [vmem:[%s5538_s6 + $0x40] sm:$0xff]  ;;  %v1416_v48 = vadd.f32 %v1320_v19, %v1014_v12 }
 0x48b   : > { %v2593_v36 = vmul.f32 %v2577_v4, %v4851_v13  ;;  %v916_v13 = vmul.f32 %v3690_v44, %v4891_v49  ;;  %v615_v49 = vmul.f32 %v3696_v63, %v4907_v51  ;;  %v922_v51 = vmul.f32 %v3690_v44, %v4945_v5 }
 0x48c   : > { %2914 = vmatpush3.xpose.msra.mxu1 %v2613_v47  ;;  %v4984_v39 = vpop.permute.xlu1 %1543  ;;  %v2595_v47 = vmul.f32 %v2579_v25, %v4895_v58  ;;  %v613_v58 = vmul.f32 %v3696_v63, %v4886_v2  ;;  %v610_v2 = vmul.f32 %v3694_v46, %v4905_v40  ;;  %v921_v25 = vmul.f32 %v3692_v35, %v4913_v61 }
 0x48d   : > { %3071 = vset.pattern.permute.xlu1 %v5855_v32  ;;  %v4992_v8 = vpop.permute.xlu0 %707  ;;  %2915 = vmatprep.subr.mxu1 %v5864_v37  ;;  %v2609_v4 = vmul.f32 %v2593_v36, %v2561_v31  ;;  %v1318_v40 = vmul.f32 %v5816_v3, %v4920_v10  ;;  %v1321_v31 = vmul.f32 %v5806_v30, %v4934_v24 }
 0x48e   : > { %1085 = vperm.xlu1 %3071, %v4767_v54   ;;  %v2611_v23 = vmul.f32 %v2595_v47, %v2563_v15  ;;  %v1012_v38 = vadd.f32 %v916_v13, %v610_v2  ;;  %v617_v47 = vmul.f32 %v3696_v63, %v4911_v21  ;;  %v923_v10 = vmul.f32 %v3692_v35, %v4945_v5  ;;  %v3163_v2 = vpop.eup %3162 }
 0x48f   : > { %v1720_v24 = vmul.f32 %v3714_v62, %v4956_v34  ;;  %v1722_v15 = vmul.f32 %v3714_v62, %v4965_v28  ;;  %v1415_v5 = vadd.f32 %v1319_v20, %v1013_v41  ;;  %v3165_v57 = vpop.eup %3164 }
 0x490   : > { %2916 = vmatpush3.xpose.msra.mxu1 %v2612_v42  ;;  %v919_v42 = vmul.f32 %v3692_v35, %v4899_v16  ;;  %v616_v16 = vmul.f32 %v3694_v46, %v4911_v21  ;;  %v1414_v13 = vadd.f32 %v1318_v40, %v1012_v38  ;;  %v1723_v21 = vmul.f32 %v3716_v1, %v4965_v28  ;;  %v3167_v40 = vpop.eup %3166 }
 0x491   : > { %v5013_v18 = vpop.permute.xlu0 %687  ;;  %2917 = vmatprep.subr.mxu1 %v5864_v37  ;;  %v5016_v14 = vpop.permute.xlu1 %374  ;;  %v1019_v52 = vadd.f32 %v923_v10, %v617_v47  ;;  %v1721_v28 = vmul.f32 %v3716_v1, %v4956_v34  ;;  %v5077_v12 = vadd.f32 %v1722_v15, %v1416_v48  ;;  %v1725_v34 = vmul.f32 %v3716_v1, %v4984_v39 }
 0x492   : > { %3072 = vset.pattern.permute.xlu1 %v5854_v27  ;;  %v1015_v61 = vadd.f32 %v919_v42, %v613_v58  ;;  %v1017_v58 = vadd.f32 %v921_v25, %v615_v49  ;;  %v1018_v42 = vadd.f32 %v922_v51, %v616_v16  ;;  %v5089_v19 = vpop.eup %3168  ;;  %v604_v51 = vmul.f32 %v3694_v46, %v5016_v14 }
 0x493   : > { %344 = vperm.xlu1 %3072, %v4836_v53   ;;  %v5095_v45 = vadd.f32 %v1721_v28, %v1415_v5 }
 0x494   : > { %2918 = vmatpush3.xpose.msra.mxu1 %v2611_v23  ;;  %v1417_v23 = vadd.f32 %v1321_v31, %v1015_v61  ;;  %v2559_v31 = vmul.f32 0.17677669, %v3163_v2 }
 0x495   : > { %v5050_v17 = vpop.permute.xlu0 %691  ;;  %2919 = vmatprep.subr.mxu1 %v5864_v37 }
 0x496   : > { %v5057_v36 = vpop.permute.xlu1 %715  ;;  %v5082_v20 = vadd.f32 %v1723_v21, %v1417_v23  ;;  %v2607_v26 = vmul.f32 %v5006_v56, %v2559_v31  ;;  %v2558_v23 = vmul.f32 0.17677669, %v3165_v57  ;;  %v2573_v57 = vld [vmem:[%s5538_s6 + $0x20] sm:$0xff] }
 0x497   : > { %3073 = vset.pattern.permute.xlu1 %v5853_v11  ;;  %v910_v11 = vmul.f32 %v3690_v44, %v4948_v60  ;;  %v1724_v60 = vmul.f32 %v3714_v62, %v4984_v39  ;;  %v605_v39 = vmul.f32 %v3696_v63, %v5016_v14 }
 0x498   : > { %695 = vperm.xlu1 %3073, %v4836_v53   ;;  %2920 = vmatpush3.xpose.msra.mxu1 %v2610_v6  ;;  %v5075_v6 = vadd.f32 %v1720_v24, %v1414_v13  ;;  %v1951_v14 = vmax.f32 %v5095_v45, %v5082_v20  ;;  %v2574_v13 = vld [vmem:[%s5538_s6 + $0x28] sm:$0xff] }
 0x499   : > { %2921 = vmatprep.subr.mxu1 %v5864_v37  ;;  %v1006_v21 = vadd.f32 %v910_v11, %v604_v51  ;;  %v1007_v2 = vadd.f32 %v911_v59, %v605_v39  ;;  %v2590_v56 = vmul.f32 %v2574_v13, %v4824_v50  ;;  %v1715_v59 = vmul.f32 %v3716_v1, %v4889_v0  ;;  %v2570_v13 = vld [vmem:[%s5538_s6 + $0x8] sm:$0xff] }
 0x49a   : > { %v1142_v22 = vpop.permute.xlu0 %1141  ;;  %v1942_v15 = vmax.f32 %v5075_v6, %v5077_v12  ;;  %v2557_v50 = vmul.f32 0.17677669, %v3167_v40  ;;  %v2572_v40 = vld [vmem:[%s5538_s6 + $0x18] sm:$0xff] }
 0x49b   : > { %v1322_v49 = vmul.f32 %v5816_v3, %v1142_v22  ;;  %v1323_v16 = vmul.f32 %v5806_v30, %v1142_v22  ;;  %v1548_v25 = vpop.permute.xlu1 %1547  ;;  %v2606_v51 = vmul.f32 %v2590_v56, %v2558_v23  ;;  %v909_v56 = vmul.f32 %v3692_v35, %v5057_v36 }
 0x49c   : > { %3074 = vset.pattern.permute.xlu1 %v5859_v9  ;;  %2922 = vmatpush3.xpose.msra.mxu1 %v2609_v4  ;;  %v1726_v47 = vmul.f32 %v3714_v62, %v1548_v25  ;;  %v1727_v4 = vmul.f32 %v3716_v1, %v1548_v25 }
 0x49d   : > { %v1418_v61 = vadd.f32 %v1322_v49, %v1016_v33  ;;  %v1419_v38 = vadd.f32 %v1323_v16, %v1017_v58  ;;  %1487 = vperm.xlu1 %3074, %v4767_v54   ;;  %2923 = vmatprep.subr.mxu1 %v5864_v37 }
 0x49e   : > { %v1146_v10 = vpop.permute.xlu0 %1145 }
 0x49f   : > { %v5101_v41 = vadd.f32 %v1724_v60, %v1418_v61  ;;  %v5103_v24 = vadd.f32 %v1725_v34, %v1419_v38  ;;  %v1324_v33 = vmul.f32 %v5816_v3, %v1146_v10  ;;  %v1325_v54 = vmul.f32 %v5806_v30, %v1146_v10 }
 0x4a0   : > { %2924 = vmatpush3.xpose.msra.mxu1 %v5018_v29  ;;  %v5113_v58 = vpop.permute.xlu1 %379 }
 0x4a1   : > { %v1420_v5 = vadd.f32 %v1324_v33, %v1018_v42  ;;  %v1421_v48 = vadd.f32 %v1325_v54, %v1019_v52  ;;  %3076 = vset.pattern.permute.xlu1 %v5855_v32  ;;  %v1943_v28 = vmax.f32 %v1942_v15, %v5101_v41  ;;  %v1952_v22 = vmax.f32 %v1951_v14, %v5103_v24 }
 0x4a2   : > { %v1122_v29 = vpop.permute.xlu0 %1121  ;;  %1097 = vperm.xlu1 %3076, %v4836_v53   ;;  %2925 = vmatprep.subr.mxu1 %v5864_v37  ;;  %v1714_v52 = vmul.f32 %v3714_v62, %v4889_v0  ;;  %v3171_v53 = vpop.eup %3170 }
 0x4a3   : > { %v5124_v49 = vadd.f32 %v1726_v47, %v1420_v5  ;;  %v5126_v11 = vadd.f32 %v1727_v4, %v1421_v48  ;;  %v1312_v42 = vmul.f32 %v5816_v3, %v1122_v29  ;;  %v1313_v32 = vmul.f32 %v5806_v30, %v1122_v29  ;;  %v3173_v4 = vpop.eup %3172  ;;  %v5867_v48 = vld [vmem:[#allocation53_spill] sm:$0xff] }
 0x4a4   : > { %2926 = vmatpush3.xpose.msra.mxu1 %v2607_v26  ;;  %v2589_v47 = vmul.f32 %v2573_v57, %v4820_v55  ;;  %v2555_v5 = vmul.f32 0.17677669, %v3171_v53  ;;  %v908_v26 = vmul.f32 %v3690_v44, %v5057_v36  ;;  %v3175_v23 = vpop.eup %3174 }
 0x4a5   : > { %v1944_v16 = vmax.f32 %v1943_v28, %v5124_v49  ;;  %v1953_v25 = vmax.f32 %v1952_v22, %v5126_v11  ;;  %v1408_v60 = vadd.f32 %v1312_v42, %v1006_v21  ;;  %v1409_v34 = vadd.f32 %v1313_v32, %v1007_v2  ;;  %2927 = vmatprep.subr.mxu1 %v5864_v37  ;;  %v1118_v31 = vpop.permute.xlu1 %1117  ;;  %v2569_v2 = vld [vmem:[%s5538_s6] sm:$0xff] }
 0x4a6   : > { %3077 = vset.pattern.permute.xlu1 %v5859_v9  ;;  %v2556_v9 = vmul.f32 0.17677669, %v5089_v19  ;;  %v2605_v54 = vmul.f32 %v2589_v47, %v2557_v50  ;;  %v2588_v21 = vmul.f32 %v2572_v40, %v4778_v43  ;;  %v602_v19 = vmul.f32 %v3694_v46, %v5867_v48  ;;  %v5868_v42 = vld [vmem:[#allocation51_spill] sm:$0xff]  ;;  %v5871_v40 = vld [vmem:[#allocation12_spill] sm:$0xff] }
 0x4a7   : > { %v1945_v0 = vrot.slane %v1944_v16, 4  ;;  %v1954_v61 = vrot.slane %v1953_v25, 4  ;;  %v5142_v38 = vadd.f32 %v1714_v52, %v1408_v60  ;;  %v5144_v39 = vadd.f32 %v1715_v59, %v1409_v34  ;;  %1495 = vperm.xlu1 %3077, %v4802_v7   ;;  %v2571_v7 = vld [vmem:[%s5538_s6 + $0x10] sm:$0xff]  ;;  %v5869_v59 = vld [vmem:[#allocation43_spill] sm:$0xff]  ;;  %v5870_v60 = vld [vmem:[#allocation42_spill] sm:$0xff] }
 0x4a8   : > { %2928 = vmatpush3.xpose.msra.mxu1 %v2606_v51  ;;  %v2554_v28 = vmul.f32 0.17677669, %v3173_v4  ;;  %v2587_v43 = vmul.f32 %v2571_v7, %v5868_v42  ;;  %v603_v32 = vmul.f32 %v3696_v63, %v5867_v48  ;;  %v2604_v52 = vmul.f32 %v2588_v21, %v2556_v9  ;;  %v1126_v42 = vpop.permute.xlu0 %1125 }
 0x4a9   : > { %v1946_v10 = vmax.f32 %v1944_v16, %v1945_v0  ;;  %v1955_v33 = vmax.f32 %v1953_v25, %v1954_v61  ;;  %2929 = vmatprep.subr.mxu1 %v5864_v37  ;;  %v2586_v53 = vmul.f32 %v2570_v13, %v5869_v59  ;;  %v2585_v34 = vmul.f32 %v2569_v2, %v5870_v60 }
 0x4aa   : > { %v5153_v15 = vpop.permute.xlu1 %384  ;;  %v1004_v50 = vadd.f32 %v908_v26, %v602_v19  ;;  %v1310_v51 = vmul.f32 %v5816_v3, %v1118_v31  ;;  %v2603_v0 = vmul.f32 %v2587_v43, %v2555_v5  ;;  %v2553_v61 = vmul.f32 0.17677669, %v3175_v23 }
 0x4ab   : > { %v1947_v55 = vrot.slane %v1946_v10, 2  ;;  %v1956_v14 = vrot.slane %v1955_v33, 2  ;;  %3078 = vset.pattern.permute.xlu1 %v5854_v27  ;;  %v2602_v36 = vmul.f32 %v2586_v53, %v2554_v28  ;;  %v1005_v9 = vadd.f32 %v909_v56, %v603_v32 }
 0x4ac   : > { %2930 = vmatpush3.xpose.msra.mxu1 %v2605_v54  ;;  %v1311_v54 = vmul.f32 %v5806_v30, %v1118_v31  ;;  %v606_v48 = vmul.f32 %v3694_v46, %v5113_v58  ;;  %v1406_v19 = vadd.f32 %v1310_v51, %v1004_v50  ;;  %v607_v28 = vmul.f32 %v3696_v63, %v5113_v58  ;;  %v2617_v50 = vld [vmem:[%s5534_s2] sm:$0xf] }
 0x4ad   : > { %v1948_v22 = vmax.f32 %v1946_v10, %v1947_v55  ;;  %v1957_v29 = vmax.f32 %v1955_v33, %v1956_v14  ;;  %2931 = vmatprep.subr.mxu1 %v5864_v37  ;;  %v912_v10 = vmul.f32 %v3690_v44, %v5871_v40  ;;  %v913_v33 = vmul.f32 %v3692_v35, %v5871_v40  ;;  %v5872_v40 = vld [vmem:[#allocation14_spill] sm:$0xff] }
 0x4af   : > { %v1949_v57 = vrot.slane %v1948_v22, 1  ;;  %v1958_v16 = vrot.slane %v1957_v29, 1  ;;  %v5177_v25 = vpop.permute.xlu1 %727  ;;  %v1008_v58 = vadd.f32 %v912_v10, %v606_v48  ;;  %v1009_v53 = vadd.f32 %v913_v33, %v607_v28 }
 0x4b0   : > { %2932 = vmatpush3.xpose.msra.mxu1 %v2604_v52  ;;  %v2601_v52 = vmul.f32 %v2585_v34, %v2553_v61  ;;  %v902_v10 = vmul.f32 %v3690_v44, %v5872_v40  ;;  %v903_v33 = vmul.f32 %v3692_v35, %v5872_v40  ;;  %v608_v48 = vmul.f32 %v3694_v46, %v5153_v15 }
 0x4b1   : > { %v1950_v47 = vmax.f32 %v1948_v22, %v1949_v57  ;;  %v1959_v4 = vmax.f32 %v1957_v29, %v1958_v16  ;;  %2933 = vmatprep.subr.mxu1 %v5864_v37  ;;  %v1314_v57 = vmul.f32 %v5816_v3, %v1126_v42  ;;  %v1315_v16 = vmul.f32 %v5806_v30, %v1126_v42 }
 0x4b3   : > { %v1984_v7 = vsub.f32 %v5075_v6, %v1950_v47  ;;  %v1985_v55 = vsub.f32 %v5095_v45, %v1959_v4  ;;  %v1986_v14 = vsub.f32 %v5077_v12, %v1950_v47  ;;  %v1987_v13 = vsub.f32 %v5082_v20, %v1959_v4 }
 0x4b4   : > { %v1988_v21 = vsub.f32 %v5101_v41, %v1950_v47  ;;  %v1990_v5 = vsub.f32 %v5124_v49, %v1950_v47  ;;  %2934 = vmatpush3.xpose.msra.mxu1 %v2603_v0  ;;  %v1520_v26 = vpop.permute.xlu1 %1519  ;;  %v1407_v45 = vadd.f32 %v1311_v54, %v1005_v9  ;;  %v1989_v41 = vsub.f32 %v5103_v24, %v1959_v4 }
 0x4b5   : > { %v2040_v23 = vmul.f32 1.442695, %v1984_v7  ;;  %v2042_v31 = vmul.f32 1.442695, %v1985_v55  ;;  %v2044_v2 = vmul.f32 1.442695, %v1986_v14  ;;  %v1712_v6 = vmul.f32 %v3714_v62, %v1520_v26  ;;  %2935 = vmatprep.subr.mxu1 %v5864_v37 }
 0x4b6   : > { %v2046_v12 = vmul.f32 1.442695, %v1987_v13  ;;  %v1713_v20 = vmul.f32 %v3716_v1, %v1520_v26  ;;  %v2048_v49 = vmul.f32 1.442695, %v1988_v21  ;;  %v1991_v29 = vsub.f32 %v5126_v11, %v1959_v4 }
 0x4b7   : > { %3176 = vpow2.f32 %v2040_v23  ;;  %v5201_v22 = vadd.f32 %v1712_v6, %v1406_v19  ;;  %v2052_v32 = vmul.f32 1.442695, %v1990_v5  ;;  %v2050_v11 = vmul.f32 1.442695, %v1989_v41 }
 0x4b8   : > { %3178 = vpow2.f32 %v2042_v31  ;;  %v5204_v43 = vadd.f32 %v1713_v20, %v1407_v45  ;;  %2936 = vmatpush3.xpose.msra.mxu1 %v2602_v36  ;;  %v2054_v60 = vmul.f32 1.442695, %v1991_v29  ;;  %v1410_v34 = vadd.f32 %v1314_v57, %v1008_v58  ;;  %v1106_v36 = vpop.permute.xlu0 %1105  ;;  %v5873_v45 = vld [vmem:[#allocation52_spill] sm:$0xff] }
 0x4b9   : > { %3180 = vpow2.f32 %v2044_v2  ;;  %v1924_v56 = vmax.f32 %v5201_v22, %v5142_v38  ;;  %v1130_v24 = vpop.permute.xlu1 %1129  ;;  %2937 = vmatprep.subr.mxu1 %v5864_v37  ;;  %v1411_v51 = vadd.f32 %v1315_v16, %v1009_v53  ;;  %v1304_v13 = vmul.f32 %v5816_v3, %v1106_v36 }
 0x4ba   : > { %3182 = vpow2.f32 %v2046_v12  ;;  %v1933_v59 = vmax.f32 %v5204_v43, %v5144_v39  ;;  %v1305_v21 = vmul.f32 %v5806_v30, %v1106_v36  ;;  %v914_v19 = vmul.f32 %v3690_v44, %v5177_v25 }
 0x4bb   : > { %3184 = vpow2.f32 %v2048_v49  ;;  %v609_v23 = vmul.f32 %v3696_v63, %v5153_v15  ;;  %v915_v31 = vmul.f32 %v3692_v35, %v5177_v25  ;;  %v1706_v20 = vmul.f32 %v3714_v62, %v5873_v45 }
 0x4bc   : > { %2938 = vmatpush3.xpose.msra.mxu1 %v2601_v52  ;;  %3186 = vpow2.f32 %v2052_v32  ;;  %v1707_v28 = vmul.f32 %v3716_v1, %v5873_v45  ;;  %v1316_v52 = vmul.f32 %v5816_v3, %v1130_v24 }
 0x4bd   : > { %3188 = vpow2.f32 %v2050_v11  ;;  %v1317_v11 = vmul.f32 %v5806_v30, %v1130_v24 }
 0x4be   : > { %v1528_v37 = vpop.permute.xlu1 %1527  ;;  %3190 = vpow2.f32 %v2054_v60 }
 0x4bf   : > { %v1716_v0 = vmul.f32 %v3714_v62, %v1528_v37  ;;  %v1717_v61 = vmul.f32 %v3716_v1, %v1528_v37  ;;  %2940 = vmatmul.mubr.f32.vlgmr.msra.gmra.mxu1 %v2617_v50 }
 0x4c0   : > { %2727 = vmatprep.mubr.bf16.mxu1 %v5854_v27 }
 0x4c1   : > { %v5219_v47 = vadd.f32 %v1716_v0, %v1410_v34  ;;  %v5221_v4 = vadd.f32 %v1717_v61, %v1411_v51 }
 0x4c3   : > { %v1925_v9 = vmax.f32 %v1924_v56, %v5219_v47  ;;  %v1934_v54 = vmax.f32 %v1933_v59, %v5221_v4  ;;  %v355_v7 = vpop.permute.xlu1 %354  ;;  %v1010_v56 = vadd.f32 %v914_v19, %v608_v48  ;;  %v1011_v59 = vadd.f32 %v915_v31, %v609_v23 }
 0x4c4   : > { %v5229_v55 = vpop.eup %3176  ;;  %v596_v27 = vmul.f32 %v3694_v46, %v355_v7  ;;  %v597_v14 = vmul.f32 %v3696_v63, %v355_v7 }
 0x4c5   : > { %v5235_v5 = vpop.eup %3178  ;;  %v1412_v51 = vadd.f32 %v1316_v52, %v1010_v56  ;;  %v1413_v61 = vadd.f32 %v1317_v11, %v1011_v59 }
 0x4c6   : > { %v5241_v26 = vpop.eup %3180  ;;  %v998_v2 = vadd.f32 %v902_v10, %v596_v27  ;;  %v999_v6 = vadd.f32 %v903_v33, %v597_v14 }
 0x4c7   : > { %v5247_v12 = vpop.eup %3182  ;;  %v2110_v41 = vadd.f32 %v5241_v26, %v5229_v55 }
 0x4c8   : > { %v5253_v49 = vpop.eup %3184  ;;  %v1400_v29 = vadd.f32 %v1304_v13, %v998_v2  ;;  %v1401_v15 = vadd.f32 %v1305_v21, %v999_v6  ;;  %v700_v42 = vpop.permute.xlu1 %699  ;;  %v2119_v25 = vadd.f32 %v5247_v12, %v5235_v5 }
 0x4c9   : > { %v2111_v32 = vadd.f32 %v5253_v49, %v2110_v41  ;;  %v5261_v58 = vpop.eup %3186 }
 0x4ca   : > { %v5264_v53 = vadd.f32 %v1706_v20, %v1400_v29  ;;  %v5266_v57 = vadd.f32 %v1707_v28, %v1401_v15  ;;  %v5268_v16 = vpop.eup %3188 }
 0x4cb   : > { %v2112_v60 = vadd.f32 %v5261_v58, %v2111_v32  ;;  %v2120_v50 = vadd.f32 %v5268_v16, %v2119_v25  ;;  %v5272_v37 = vpop.eup %3190 }
 0x4cd   : > { %v2113_v34 = vrot.slane %v2112_v60, 4  ;;  %v1532_v0 = vpop.permute.xlu1 %1531  ;;  %v2121_v40 = vadd.f32 %v5272_v37, %v2120_v50  ;;  %v5874_v50 = vld [vmem:[#allocation54_spill] sm:$0xff] }
 0x4ce   : > { %v1718_v36 = vmul.f32 %v3714_v62, %v1532_v0  ;;  %v1719_v24 = vmul.f32 %v3716_v1, %v1532_v0 }
 0x4cf   : > { %v2114_v10 = vadd.f32 %v2113_v34, %v2112_v60  ;;  %v2122_v27 = vrot.slane %v2121_v40, 4  ;;  %v594_v34 = vmul.f32 %v3694_v46, %v5874_v50 }
 0x4d0   : > { %v1814_v33 = vadd.f32 %v1718_v36, %v1412_v51  ;;  %v5277_v7 = vadd.f32 %v1719_v24, %v1413_v61  ;;  %v900_v51 = vmul.f32 %v3690_v44, %v700_v42  ;;  %v595_v36 = vmul.f32 %v3696_v63, %v5874_v50 }
 0x4d1   : > { %v2115_v14 = vrot.slane %v2114_v10, 2  ;;  %v2123_v19 = vadd.f32 %v2122_v27, %v2121_v40  ;;  %v901_v24 = vmul.f32 %v3692_v35, %v700_v42 }
 0x4d2   : > { %v1926_v13 = vmax.f32 %v1925_v9, %v1814_v33  ;;  %v1935_v21 = vmax.f32 %v1934_v54, %v5277_v7  ;;  %v5280_v48 = vpop.permute.xlu1 %359 }
 0x4d3   : > { %v2116_v23 = vadd.f32 %v2115_v14, %v2114_v10  ;;  %v2124_v6 = vrot.slane %v2123_v19, 2 }
 0x4d4   : > { %v1927_v31 = vrot.slane %v1926_v13, 4  ;;  %v1936_v2 = vrot.slane %v1935_v21, 4 }
 0x4d5   : > { %v2117_v45 = vrot.slane %v2116_v23, 1  ;;  %v2125_v28 = vadd.f32 %v2124_v6, %v2123_v19 }
 0x4d6   : > { %v1928_v20 = vmax.f32 %v1926_v13, %v1927_v31  ;;  %v1937_v41 = vmax.f32 %v1935_v21, %v1936_v2  ;;  %v996_v13 = vadd.f32 %v900_v51, %v594_v34 }
 0x4d7   : > { %v2118_v29 = vadd.f32 %v2117_v45, %v2116_v23  ;;  %v1102_v32 = vpop.permute.xlu1 %1101  ;;  %v2126_v56 = vrot.slane %v2125_v28, 1 }
 0x4d8   : > { %v1929_v15 = vrot.slane %v1928_v20, 2  ;;  %v1938_v25 = vrot.slane %v1937_v41, 2  ;;  %v1302_v23 = vmul.f32 %v5816_v3, %v1102_v32 }
 0x4d9   : > { %3192 = vrcp.f32 %v2118_v29  ;;  %v2127_v54 = vadd.f32 %v2126_v56, %v2125_v28 }
 0x4da   : > { %v1930_v9 = vmax.f32 %v1928_v20, %v1929_v15  ;;  %v1939_v52 = vmax.f32 %v1937_v41, %v1938_v25  ;;  %v1398_v28 = vadd.f32 %v1302_v23, %v996_v13  ;;  %v1110_v25 = vpop.permute.xlu0 %1109 }
 0x4db   : > { %3194 = vrcp.f32 %v2127_v54  ;;  %v599_v54 = vmul.f32 %v3696_v63, %v5280_v48  ;;  %v1306_v51 = vmul.f32 %v5816_v3, %v1110_v25 }
 0x4dc   : > { %v1931_v59 = vrot.slane %v1930_v9, 1  ;;  %v1940_v11 = vrot.slane %v1939_v52, 1  ;;  %v5282_v60 = vpop.permute.xlu1 %364 }
 0x4de   : > { %v1932_v0 = vmax.f32 %v1930_v9, %v1931_v59  ;;  %v1941_v61 = vmax.f32 %v1939_v52, %v1940_v11  ;;  %v598_v9 = vmul.f32 %v3694_v46, %v5280_v48 }
 0x4e0   : > { %v1976_v40 = vsub.f32 %v5201_v22, %v1932_v0  ;;  %v1977_v10 = vsub.f32 %v5204_v43, %v1941_v61  ;;  %v1978_v27 = vsub.f32 %v5142_v38, %v1932_v0  ;;  %v1979_v14 = vsub.f32 %v5144_v39, %v1941_v61 }
 0x4e1   : > { %v1980_v21 = vsub.f32 %v5219_v47, %v1932_v0  ;;  %v1981_v19 = vsub.f32 %v5221_v4, %v1941_v61  ;;  %v5297_v31 = vpop.permute.xlu1 %711  ;;  %v1982_v2 = vsub.f32 %v1814_v33, %v1932_v0  ;;  %v997_v22 = vadd.f32 %v901_v24, %v595_v36 }
 0x4e2   : > { %v2024_v6 = vmul.f32 1.442695, %v1976_v40  ;;  %v2026_v42 = vmul.f32 1.442695, %v1977_v10  ;;  %v2028_v45 = vmul.f32 1.442695, %v1978_v27  ;;  %v1303_v43 = vmul.f32 %v5806_v30, %v1102_v32 }
 0x4e3   : > { %v2030_v20 = vmul.f32 1.442695, %v1979_v14  ;;  %v2032_v38 = vmul.f32 1.442695, %v1980_v21  ;;  %v904_v39 = vmul.f32 %v3690_v44, %v4992_v8  ;;  %v905_v47 = vmul.f32 %v3692_v35, %v4992_v8 }
 0x4e4   : > { %3196 = vpow2.f32 %v2024_v6  ;;  %v1983_v41 = vsub.f32 %v5277_v7, %v1941_v61  ;;  %v2036_v33 = vmul.f32 1.442695, %v1982_v2  ;;  %v1399_v15 = vadd.f32 %v1303_v43, %v997_v22 }
 0x4e5   : > { %3198 = vpow2.f32 %v2026_v42  ;;  %v2034_v7 = vmul.f32 1.442695, %v1981_v19  ;;  %v1307_v36 = vmul.f32 %v5806_v30, %v1110_v25  ;;  %v1000_v27 = vadd.f32 %v904_v39, %v598_v9 }
 0x4e6   : > { %v3193_v4 = vpop.eup %3192  ;;  %3200 = vpow2.f32 %v2028_v45  ;;  %v1504_v29 = vpop.permute.xlu1 %1503  ;;  %v2038_v34 = vmul.f32 1.442695, %v1983_v41  ;;  %v1001_v14 = vadd.f32 %v905_v47, %v599_v54 }
 0x4e7   : > { %3202 = vpow2.f32 %v2030_v20  ;;  %v1704_v32 = vmul.f32 %v3714_v62, %v1504_v29  ;;  %v1705_v56 = vmul.f32 %v3716_v1, %v1504_v29  ;;  %v2164_v8 = vmul.f32 %v3193_v4, %v5253_v49 }
 0x4e8   : > { %3204 = vpow2.f32 %v2032_v38  ;;  %v2166_v52 = vmul.f32 %v3193_v4, %v5261_v58  ;;  %v3195_v50 = vpop.eup %3194  ;;  %v2160_v21 = vmul.f32 %v3193_v4, %v5229_v55  ;;  %v2162_v19 = vmul.f32 %v3193_v4, %v5241_v26 }
 0x4e9   : > { %v5313_v59 = vadd.f32 %v1704_v32, %v1398_v28  ;;  %v5315_v11 = vadd.f32 %v1705_v56, %v1399_v15  ;;  %3206 = vpow2.f32 %v2036_v33  ;;  %v2165_v58 = vmul.f32 %v3195_v50, %v5268_v16 }
 0x4ea   : > { %v2167_v61 = vmul.f32 %v3195_v50, %v5272_v37  ;;  %v2182_v24 = vpack.c.bf16 %v2166_v52, %v2164_v8  ;;  %v2161_v40 = vmul.f32 %v3195_v50, %v5235_v5  ;;  %v2163_v10 = vmul.f32 %v3195_v50, %v5247_v12 }
 0x4eb   : > { %v1906_v0 = vmax.f32 %v5313_v59, %v5264_v53  ;;  %v1915_v49 = vmax.f32 %v5315_v11, %v5266_v57  ;;  %v1114_v48 = vpop.permute.xlu1 %1113  ;;  %3208 = vpow2.f32 %v2034_v7  ;;  %v1402_v2 = vadd.f32 %v1306_v51, %v1000_v27 }
 0x4ec   : > { %v2183_v13 = vpack.c.bf16 %v2167_v61, %v2165_v58  ;;  %3210 = vpow2.f32 %v2038_v34  ;;  %v2181_v16 = vpack.c.bf16 %v2163_v10, %v2161_v40  ;;  %v1403_v6 = vadd.f32 %v1307_v36, %v1001_v14  ;;  %v1090_v10 = vpop.permute.xlu0 %1089 }
 0x4ed   : > { %v2180_v45 = vpack.c.bf16 %v2162_v19, %v2160_v21  ;;  %v600_v29 = vmul.f32 %v3694_v46, %v5282_v60  ;;  %v906_v15 = vmul.f32 %v3690_v44, %v5297_v31  ;;  %v601_v32 = vmul.f32 %v3696_v63, %v5282_v60 }
 0x4ee   : > { %2695 = vmatprep.subr.bf16.mxu1 %v2183_v13  ;;  %v907_v56 = vmul.f32 %v3692_v35, %v5297_v31  ;;  %v1308_v54 = vmul.f32 %v5816_v3, %v1114_v48 }
 0x4ef   : > { %2696 = vmatpush1.bf16.msra.mxu1 %v2182_v24  ;;  %v1002_v7 = vadd.f32 %v906_v15, %v600_v29 }
 0x4f0   : > { %v1512_v37 = vpop.permute.xlu1 %1511  ;;  %2697 = vmatprep.subr.bf16.mxu1 %v2181_v16 }
 0x4f1   : > { %v5329_v23 = vpop.eup %3196  ;;  %v1708_v5 = vmul.f32 %v3714_v62, %v1512_v37  ;;  %v1709_v12 = vmul.f32 %v3716_v1, %v1512_v37  ;;  %v1404_v61 = vadd.f32 %v1308_v54, %v1002_v7 }
 0x4f2   : > { %v5333_v42 = vpop.eup %3198 }
 0x4f3   : > { %v5335_v55 = vpop.eup %3200  ;;  %v5337_v26 = vadd.f32 %v1708_v5, %v1402_v2  ;;  %v5339_v22 = vadd.f32 %v1709_v12, %v1403_v6  ;;  %2698 = vmatpush1.bf16.msra.mxu1 %v2180_v45 }
 0x4f4   : > { %v5341_v20 = vpop.eup %3202  ;;  %v2092_v43 = vadd.f32 %v5335_v55, %v5329_v23 }
 0x4f5   : > { %v5345_v38 = vpop.eup %3204  ;;  %v2101_v39 = vadd.f32 %v5341_v20, %v5333_v42  ;;  %v1907_v47 = vmax.f32 %v1906_v0, %v5337_v26  ;;  %v1916_v4 = vmax.f32 %v1915_v49, %v5339_v22  ;;  %v335_v41 = vpop.permute.xlu1 %334  ;;  %v1003_v0 = vadd.f32 %v907_v56, %v601_v32 }
 0x4f6   : > { %v2093_v33 = vadd.f32 %v5345_v38, %v2092_v43  ;;  %v5352_v28 = vpop.eup %3206  ;;  %v1309_v49 = vmul.f32 %v5806_v30, %v1114_v48  ;;  %v2689_v48 = vld [vmem:[%s5535_s3] sm:$0xf]  ;;  %v1094_v43 = vpop.permute.xlu0 %1093  ;;  %v588_v15 = vmul.f32 %v3694_v46, %v335_v41 }
 0x4f7   : > { %2692 = vperm.xlu1 %3078, %v2689_v48  }
 0x4f8   : > { %v2094_v25 = vadd.f32 %v5352_v28, %v2093_v33  ;;  %v5363_v9 = vpop.eup %3208  ;;  %v1405_v40 = vadd.f32 %v1309_v49, %v1003_v0 }
 0x4f9   : > { %v2102_v50 = vadd.f32 %v5363_v9, %v2101_v39  ;;  %v5367_v34 = vpop.eup %3210 }
 0x4fa   : > { %v2095_v8 = vrot.slane %v2094_v25, 4  ;;  %v684_v52 = vpop.permute.xlu1 %683 }
 0x4fb   : > { %v2103_v60 = vadd.f32 %v5367_v34, %v2102_v50 }
 0x4fc   : > { %v2096_v51 = vadd.f32 %v2095_v8, %v2094_v25  ;;  %v589_v25 = vmul.f32 %v3696_v63, %v335_v41  ;;  %v5875_v8 = vld [vmem:[#allocation55_spill] sm:$0xff]  ;;  %v1296_v41 = vmul.f32 %v5816_v3, %v1090_v10 }
 0x4fd   : > { %v2104_v36 = vrot.slane %v2103_v60, 4  ;;  %v586_v7 = vmul.f32 %v3694_v46, %v5875_v8  ;;  %v587_v49 = vmul.f32 %v3696_v63, %v5875_v8 }
 0x4fe   : > { %v2097_v58 = vrot.slane %v2096_v51, 2 }
 0x4ff   : > { %v1516_v31 = vpop.permute.xlu1 %1515  ;;  %v2105_v13 = vadd.f32 %v2104_v36, %v2103_v60  ;;  %v1297_v60 = vmul.f32 %v5806_v30, %v1090_v10  ;;  %v5405_v10 = vmul.f32 %v5816_v3, %v1094_v43 }
 0x500   : > { %v2098_v24 = vadd.f32 %v2097_v58, %v2096_v51  ;;  %v1710_v27 = vmul.f32 %v3714_v62, %v1516_v31  ;;  %v1711_v14 = vmul.f32 %v3716_v1, %v1516_v31  ;;  %v1492_v31 = vpop.permute.xlu0 %1491 }
 0x501   : > { %v2106_v37 = vrot.slane %v2105_v13, 2 }
 0x502   : > { %v2099_v21 = vrot.slane %v2098_v24, 1  ;;  %v5373_v19 = vadd.f32 %v1710_v27, %v1404_v61  ;;  %v5375_v16 = vadd.f32 %v1711_v14, %v1405_v40  ;;  %v5396_v40 = vmul.f32 %v3690_v44, %v5050_v17 }
 0x503   : > { %v2107_v45 = vadd.f32 %v2106_v37, %v2105_v13  ;;  %v892_v27 = vmul.f32 %v3690_v44, %v684_v52  ;;  %v893_v14 = vmul.f32 %v3692_v35, %v684_v52  ;;  %v5408_v13 = vmul.f32 %v5806_v30, %v1094_v43 }
 0x504   : > { %v2100_v2 = vadd.f32 %v2099_v21, %v2098_v24  ;;  %v1908_v6 = vmax.f32 %v1907_v47, %v5373_v19  ;;  %v1917_v5 = vmax.f32 %v1916_v4, %v5375_v16  ;;  %v340_v12 = vpop.permute.xlu1 %339  ;;  %v894_v47 = vmul.f32 %v3690_v44, %v5013_v18 }
 0x505   : > { %v2108_v29 = vrot.slane %v2107_v45, 1  ;;  %v895_v4 = vmul.f32 %v3692_v35, %v5013_v18  ;;  %v5400_v18 = vmul.f32 %v3692_v35, %v5050_v17  ;;  %v590_v43 = vmul.f32 %v3694_v46, %v340_v12 }
 0x506   : > { %v1909_v39 = vrot.slane %v1908_v6, 4  ;;  %v1918_v33 = vrot.slane %v1917_v5, 4  ;;  %3212 = vrcp.f32 %v2100_v2  ;;  %v990_v58 = vadd.f32 %v894_v47, %v588_v15 }
 0x507   : > { %v2109_v54 = vadd.f32 %v2108_v29, %v2107_v45  ;;  %v991_v61 = vadd.f32 %v895_v4, %v589_v25  ;;  %v1698_v2 = vmul.f32 %v3714_v62, %v1492_v31  ;;  %v988_v29 = vadd.f32 %v892_v27, %v586_v7 }
 0x508   : > { %v1910_v32 = vmax.f32 %v1908_v6, %v1909_v39  ;;  %v1919_v56 = vmax.f32 %v1917_v5, %v1918_v33  ;;  %v1699_v6 = vmul.f32 %v3716_v1, %v1492_v31  ;;  %v1392_v45 = vadd.f32 %v1296_v41, %v990_v58 }
 0x509   : > { %v1086_v0 = vpop.permute.xlu1 %1085  ;;  %3214 = vrcp.f32 %v2109_v54  ;;  %v1393_v39 = vadd.f32 %v1297_v60, %v991_v61  ;;  %v989_v15 = vadd.f32 %v893_v14, %v587_v49  ;;  %v591_v25 = vmul.f32 %v3696_v63, %v340_v12 }
 0x50a   : > { %v1911_v50 = vrot.slane %v1910_v32, 2  ;;  %v1920_v51 = vrot.slane %v1919_v56, 2  ;;  %v1294_v17 = vmul.f32 %v5816_v3, %v1086_v0  ;;  %v1295_v5 = vmul.f32 %v5806_v30, %v1086_v0 }
 0x50c   : > { %v1912_v36 = vmax.f32 %v1910_v32, %v1911_v50  ;;  %v1921_v24 = vmax.f32 %v1919_v56, %v1920_v51  ;;  %v1390_v50 = vadd.f32 %v1294_v17, %v988_v29  ;;  %v1391_v51 = vadd.f32 %v1295_v5, %v989_v15 }
 0x50d   : > { %v5438_v17 = vadd.f32 %v1698_v2, %v1392_v45  ;;  %v992_v5 = vadd.f32 %v5396_v40, %v590_v43 }
 0x50e   : > { %v1913_v21 = vrot.slane %v1912_v36, 1  ;;  %v1922_v48 = vrot.slane %v1921_v24, 1  ;;  %v345_v37 = vpop.permute.xlu1 %344 }
 0x510   : > { %v1914_v52 = vmax.f32 %v1912_v36, %v1913_v21  ;;  %v1923_v33 = vmax.f32 %v1921_v24, %v1922_v48 }
 0x512   : > { %v1968_v32 = vsub.f32 %v5313_v59, %v1914_v52  ;;  %v1969_v56 = vsub.f32 %v5315_v11, %v1923_v33  ;;  %v1970_v8 = vsub.f32 %v5264_v53, %v1914_v52  ;;  %v1971_v54 = vsub.f32 %v5266_v57, %v1923_v33 }
 0x513   : > { %v1972_v47 = vsub.f32 %v5337_v26, %v1914_v52  ;;  %v1973_v4 = vsub.f32 %v5339_v22, %v1923_v33  ;;  %v696_v7 = vpop.permute.xlu1 %695  ;;  %v3213_v0 = vpop.eup %3212  ;;  %v1974_v49 = vsub.f32 %v5373_v19, %v1914_v52  ;;  %v1975_v59 = vsub.f32 %v5375_v16, %v1923_v33 }
 0x514   : > { %v2008_v41 = vmul.f32 1.442695, %v1968_v32  ;;  %v2010_v12 = vmul.f32 1.442695, %v1969_v56  ;;  %v2012_v60 = vmul.f32 1.442695, %v1970_v8  ;;  %v592_v53 = vmul.f32 %v3694_v46, %v345_v37 }
 0x515   : > { %v2014_v11 = vmul.f32 1.442695, %v1971_v54  ;;  %v593_v57 = vmul.f32 %v3696_v63, %v345_v37  ;;  %v2016_v26 = vmul.f32 1.442695, %v1972_v47  ;;  %v2018_v58 = vmul.f32 1.442695, %v1973_v4 }
 0x516   : > { %3216 = vpow2.f32 %v2008_v41  ;;  %v898_v22 = vmul.f32 %v3690_v44, %v696_v7  ;;  %v899_v61 = vmul.f32 %v3692_v35, %v696_v7  ;;  %v2156_v19 = vmul.f32 %v3213_v0, %v5345_v38  ;;  %v3215_v36 = vpop.eup %3214 }
 0x517   : > { %3218 = vpow2.f32 %v2010_v12  ;;  %v2158_v31 = vmul.f32 %v3213_v0, %v5352_v28  ;;  %v2020_v16 = vmul.f32 1.442695, %v1974_v49  ;;  %v2152_v46 = vmul.f32 %v3213_v0, %v5329_v23 }
 0x518   : > { %3220 = vpow2.f32 %v2012_v60  ;;  %v1488_v24 = vpop.permute.xlu1 %1487  ;;  %v2154_v63 = vmul.f32 %v3213_v0, %v5335_v55  ;;  %v2157_v27 = vmul.f32 %v3215_v36, %v5363_v9  ;;  %v2159_v44 = vmul.f32 %v3215_v36, %v5367_v34 }
 0x519   : > { %3222 = vpow2.f32 %v2014_v11  ;;  %v2178_v14 = vpack.c.bf16 %v2158_v31, %v2156_v19  ;;  %v2153_v35 = vmul.f32 %v3215_v36, %v5333_v42  ;;  %v2155_v38 = vmul.f32 %v3215_v36, %v5341_v20 }
 0x51a   : > { %3224 = vpow2.f32 %v2016_v26  ;;  %v1696_v28 = vmul.f32 %v3714_v62, %v1488_v24  ;;  %v2022_v21 = vmul.f32 1.442695, %v1975_v59  ;;  %v2179_v48 = vpack.c.bf16 %v2159_v44, %v2157_v27 }
 0x51b   : > { %v1697_v37 = vmul.f32 %v3716_v1, %v1488_v24  ;;  %v2176_v23 = vpack.c.bf16 %v2154_v63, %v2152_v46  ;;  %3226 = vpow2.f32 %v2020_v16  ;;  %v2177_v55 = vpack.c.bf16 %v2155_v38, %v2153_v35 }
 0x51c   : > { %v5440_v9 = vadd.f32 %v1696_v28, %v1390_v50  ;;  %v5442_v34 = vadd.f32 %v1699_v6, %v1393_v39  ;;  %2699 = vmatprep.subr.bf16.mxu1 %v2179_v48  ;;  %3228 = vpow2.f32 %v2018_v58  ;;  %v993_v52 = vadd.f32 %v5400_v18, %v591_v25  ;;  %v1500_v39 = vpop.permute.xlu0 %1499 }
 0x51d   : > { %v5445_v42 = vadd.f32 %v1697_v37, %v1391_v51  ;;  %v1098_v20 = vpop.permute.xlu1 %1097  ;;  %v994_v33 = vadd.f32 %v898_v22, %v592_v53  ;;  %2700 = vmatpush1.bf16.msra.mxu1 %v2178_v14  ;;  %3230 = vpow2.f32 %v2022_v21  ;;  %v995_v29 = vadd.f32 %v899_v61, %v593_v57 }
 0x51e   : > { %v1888_v2 = vmax.f32 %v5440_v9, %v5438_v17  ;;  %v1300_v45 = vmul.f32 %v5816_v3, %v1098_v20  ;;  %2701 = vmatprep.subr.bf16.mxu1 %v2177_v55  ;;  %v1301_v6 = vmul.f32 %v5806_v30, %v1098_v20  ;;  %v1702_v18 = vmul.f32 %v3714_v62, %v1500_v39 }
 0x51f   : > { %v1897_v40 = vmax.f32 %v5445_v42, %v5442_v34  ;;  %v1703_v43 = vmul.f32 %v3716_v1, %v1500_v39  ;;  %v1394_v25 = vadd.f32 %v5405_v10, %v992_v5  ;;  %v1395_v8 = vadd.f32 %v5408_v13, %v993_v52 }
 0x520   : > { %v1396_v15 = vadd.f32 %v1300_v45, %v994_v33  ;;  %v1397_v3 = vadd.f32 %v1301_v6, %v995_v29 }
 0x521   : > { %2702 = vmatpush1.bf16.msra.mxu1 %v2176_v23 }
 0x522   : > { %v1496_v32 = vpop.permute.xlu1 %1495  ;;  %v1798_v0 = vadd.f32 %v1702_v18, %v1396_v15 }
 0x523   : > { %v5457_v56 = vpop.eup %3216  ;;  %v1700_v54 = vmul.f32 %v3714_v62, %v1496_v32  ;;  %v1701_v47 = vmul.f32 %v3716_v1, %v1496_v32  ;;  %v1799_v62 = vadd.f32 %v1703_v43, %v1397_v3 }
 0x524   : > { %v5462_v30 = vpop.eup %3218 }
 0x525   : > { %v5464_v4 = vpop.eup %3220  ;;  %v1796_v50 = vadd.f32 %v1700_v54, %v1394_v25  ;;  %v1797_v51 = vadd.f32 %v1701_v47, %v1395_v8 }
 0x526   : > { %v5466_v7 = vpop.eup %3222  ;;  %v2074_v10 = vadd.f32 %v5464_v4, %v5457_v56 }
 0x527   : > { %v5470_v49 = vpop.eup %3224  ;;  %v2083_v13 = vadd.f32 %v5466_v7, %v5462_v30  ;;  %v1889_v41 = vmax.f32 %v1888_v2, %v1796_v50  ;;  %v1898_v1 = vmax.f32 %v1897_v40, %v1797_v51 }
 0x528   : > { %v2075_v12 = vadd.f32 %v5470_v49, %v2074_v10  ;;  %v3227_v60 = vpop.eup %3226 }
 0x529   : > { %v1890_v59 = vmax.f32 %v1889_v41, %v1798_v0  ;;  %v1899_v11 = vmax.f32 %v1898_v1, %v1799_v62  ;;  %v5475_v53 = vpop.eup %3228 }
 0x52a   : > { %v2076_v57 = vadd.f32 %v3227_v60, %v2075_v12  ;;  %v2084_v22 = vadd.f32 %v5475_v53, %v2083_v13  ;;  %v5478_v61 = vpop.eup %3230 }
 0x52b   : > { %v1891_v26 = vrot.slane %v1890_v59, 4  ;;  %v1900_v58 = vrot.slane %v1899_v11, 4 }
 0x52c   : > { %v2077_v19 = vrot.slane %v2076_v57, 4  ;;  %v2085_v16 = vadd.f32 %v5478_v61, %v2084_v22 }
 0x52d   : > { %v1892_v31 = vmax.f32 %v1890_v59, %v1891_v26  ;;  %v1901_v36 = vmax.f32 %v1899_v11, %v1900_v58 }
 0x52e   : > { %v2078_v24 = vadd.f32 %v2077_v19, %v2076_v57  ;;  %v2086_v27 = vrot.slane %v2085_v16, 4 }
 0x52f   : > { %v1893_v46 = vrot.slane %v1892_v31, 2  ;;  %v1902_v63 = vrot.slane %v1901_v36, 2 }
 0x530   : > { %v2079_v44 = vrot.slane %v2078_v24, 2  ;;  %v2087_v38 = vadd.f32 %v2086_v27, %v2085_v16 }
 0x531   : > { %v1894_v14 = vmax.f32 %v1892_v31, %v1893_v46  ;;  %v1903_v35 = vmax.f32 %v1901_v36, %v1902_v63 }
 0x532   : > { %v2080_v28 = vadd.f32 %v2079_v44, %v2078_v24  ;;  %v2088_v37 = vrot.slane %v2087_v38, 2 }
 0x533   : > { %v1895_v21 = vrot.slane %v1894_v14, 1  ;;  %v1904_v48 = vrot.slane %v1903_v35, 1 }
 0x534   : > { %v2081_v23 = vrot.slane %v2080_v28, 1  ;;  %v2089_v52 = vadd.f32 %v2088_v37, %v2087_v38 }
 0x535   : > { %v1896_v55 = vmax.f32 %v1894_v14, %v1895_v21  ;;  %v1905_v5 = vmax.f32 %v1903_v35, %v1904_v48 }
 0x536   : > { %v2082_v20 = vadd.f32 %v2081_v23, %v2080_v28  ;;  %v2090_v3 = vrot.slane %v2089_v52, 1 }
 0x537   : > { %v1960_v33 = vsub.f32 %v5440_v9, %v1896_v55  ;;  %v1961_v2 = vsub.f32 %v5445_v42, %v1905_v5  ;;  %v1962_v45 = vsub.f32 %v5438_v17, %v1896_v55  ;;  %v1963_v29 = vsub.f32 %v5442_v34, %v1905_v5 }
 0x538   : > { %3232 = vrcp.f32 %v2082_v20  ;;  %v1964_v40 = vsub.f32 %v1796_v50, %v1896_v55  ;;  %v1965_v6 = vsub.f32 %v1797_v51, %v1905_v5  ;;  %v1966_v39 = vsub.f32 %v1798_v0, %v1896_v55 }
 0x539   : > { %v1992_v15 = vmul.f32 1.442695, %v1960_v33  ;;  %v1994_v18 = vmul.f32 1.442695, %v1961_v2  ;;  %v1996_v43 = vmul.f32 1.442695, %v1962_v45  ;;  %v1967_v8 = vsub.f32 %v1799_v62, %v1905_v5 }
 0x53a   : > { %v1998_v25 = vmul.f32 1.442695, %v1963_v29  ;;  %v2000_v32 = vmul.f32 1.442695, %v1964_v40  ;;  %v2002_v9 = vmul.f32 1.442695, %v1965_v6  ;;  %v2091_v17 = vadd.f32 %v2090_v3, %v2089_v52 }
 0x53b   : > { %3234 = vpow2.f32 %v1992_v15  ;;  %v2004_v42 = vmul.f32 1.442695, %v1966_v39  ;;  %v2006_v34 = vmul.f32 1.442695, %v1967_v8 }
 0x53c   : > { %3236 = vpow2.f32 %v1994_v18 }
 0x53d   : > { %3238 = vpow2.f32 %v1996_v43 }
 0x53e   : > { %3240 = vpow2.f32 %v1998_v25 }
 0x53f   : > { %3242 = vpow2.f32 %v2000_v32 }
 0x540   : > { %3244 = vpow2.f32 %v2002_v9 }
 0x541   : > { %3246 = vpow2.f32 %v2004_v42 }
 0x542   : > { %3248 = vrcp.f32 %v2091_v17 }
 0x543   : > { %3250 = vpow2.f32 %v2006_v34 }
 0x545   : > { %v3233_v54 = vpop.eup %3232 }
 0x546   : > { %v2148_v47 = vmul.f32 %v3233_v54, %v5470_v49  ;;  %v2150_v50 = vmul.f32 %v3233_v54, %v3227_v60  ;;  %v2144_v51 = vmul.f32 %v3233_v54, %v5457_v56  ;;  %v2146_v10 = vmul.f32 %v3233_v54, %v5464_v4 }
 0x548   : > { %v3235_v0 = vpop.eup %3234  ;;  %v2174_v13 = vpack.c.bf16 %v2150_v50, %v2148_v47  ;;  %v2172_v62 = vpack.c.bf16 %v2146_v10, %v2144_v51 }
 0x549   : > { %v3237_v41 = vpop.eup %3236 }
 0x54a   : > { %v3239_v1 = vpop.eup %3238 }
 0x54b   : > { %v3241_v12 = vpop.eup %3240  ;;  %v2056_v59 = vadd.f32 %v3239_v1, %v3235_v0 }
 0x54c   : > { %v3243_v11 = vpop.eup %3242  ;;  %v2065_v57 = vadd.f32 %v3241_v12, %v3237_v41 }
 0x54d   : > { %v3245_v26 = vpop.eup %3244  ;;  %v2057_v58 = vadd.f32 %v3243_v11, %v2056_v59 }
 0x54e   : > { %v3247_v22 = vpop.eup %3246  ;;  %v2066_v19 = vadd.f32 %v3245_v26, %v2065_v57 }
 0x54f   : > { %v3249_v31 = vpop.eup %3248  ;;  %v2058_v49 = vadd.f32 %v3247_v22, %v2057_v58 }
 0x550   : > { %v3251_v60 = vpop.eup %3250  ;;  %v2149_v56 = vmul.f32 %v3249_v31, %v5475_v53  ;;  %v2151_v4 = vmul.f32 %v3249_v31, %v5478_v61  ;;  %v2145_v36 = vmul.f32 %v3249_v31, %v5462_v30  ;;  %v2147_v16 = vmul.f32 %v3249_v31, %v5466_v7 }
 0x551   : > { %v2059_v24 = vrot.slane %v2058_v49, 4  ;;  %v2067_v46 = vadd.f32 %v3251_v60, %v2066_v19 }
 0x552   : > { %v2175_v63 = vpack.c.bf16 %v2151_v4, %v2149_v56  ;;  %v2173_v27 = vpack.c.bf16 %v2147_v16, %v2145_v36  ;;  %v2776_v16 = vld [vmem:[%s5536_s4] sm:$0xf] }
 0x553   : > { %v2060_v44 = vadd.f32 %v2059_v24, %v2058_v49  ;;  %v2068_v14 = vrot.slane %v2067_v46, 4 }
 0x554   : > { %2703 = vmatprep.subr.bf16.mxu1 %v2175_v63 }
 0x555   : > { %v2061_v35 = vrot.slane %v2060_v44, 2  ;;  %2704 = vmatpush1.bf16.msra.mxu1 %v2174_v13  ;;  %v2069_v38 = vadd.f32 %v2068_v14, %v2067_v46 }
 0x556   : > { %2705 = vmatprep.subr.bf16.mxu1 %v2173_v27  ;;  %v2779_v27 = vld [vmem:[%s5537_s5] sm:$0xf] }
 0x557   : > { %v2062_v28 = vadd.f32 %v2061_v35, %v2060_v44  ;;  %v2070_v21 = vrot.slane %v2069_v38, 2 }
 0x559   : > { %v2063_v53 = vrot.slane %v2062_v28, 1  ;;  %2706 = vmatpush1.bf16.msra.mxu1 %v2172_v62  ;;  %v2071_v61 = vadd.f32 %v2070_v21, %v2069_v38 }
 0x55b   : > { %v2064_v48 = vadd.f32 %v2063_v53, %v2062_v28  ;;  %v2072_v30 = vrot.slane %v2071_v61, 1 }
 0x55d   : > { %3252 = vrcp.f32 %v2064_v48  ;;  %v2073_v7 = vadd.f32 %v2072_v30, %v2071_v61 }
 0x55f   : > { %3254 = vrcp.f32 %v2073_v7 }
 0x56a   : > { %v3253_v37 = vpop.eup %3252 }
 0x56b   : > { %v2140_v23 = vmul.f32 %v3253_v37, %v3243_v11  ;;  %v2142_v55 = vmul.f32 %v3253_v37, %v3247_v22  ;;  %v2136_v5 = vmul.f32 %v3253_v37, %v3235_v0  ;;  %v2138_v20 = vmul.f32 %v3253_v37, %v3239_v1 }
 0x56c   : > { %v3255_v52 = vpop.eup %3254 }
 0x56d   : > { %v2141_v33 = vmul.f32 %v3255_v52, %v3245_v26  ;;  %v2143_v2 = vmul.f32 %v3255_v52, %v3251_v60  ;;  %v2170_v45 = vpack.c.bf16 %v2142_v55, %v2140_v23  ;;  %v2137_v29 = vmul.f32 %v3255_v52, %v3237_v41 }
 0x56e   : > { %v2139_v40 = vmul.f32 %v3255_v52, %v3241_v12  ;;  %v2168_v6 = vpack.c.bf16 %v2138_v20, %v2136_v5 }
 0x56f   : > { %v2171_v39 = vpack.c.bf16 %v2143_v2, %v2141_v33 }
 0x570   : > { %v2169_v15 = vpack.c.bf16 %v2139_v40, %v2137_v29 }
 0x571   : > { %2707 = vmatprep.subr.bf16.mxu1 %v2171_v39 }
 0x572   : > { %2708 = vmatpush1.bf16.msra.mxu1 %v2170_v45  ;;  %v2693_v32 = vpop.permute.xlu1 %2692 }
 0x573   : > { %2709 = vmatprep.subr.bf16.mxu1 %v2169_v15 }
 0x576   : > { %2710 = vmatpush1.bf16.msra.mxu1 %v2168_v6 }
 0x57f   : > { %v2684_v18 = vpop.f32.mrf.mxu1 }
 0x580   : > { %v2688_v43 = vpack.c.bf16 %v2684_v18, %v2684_v18 }
 0x581   : > { %v2941_v25 = vpop.f32.mrf.mxu1 }
 0x582   : > { %2728 = vmatmul.mubr.bf16.vlgmr.msra.gmra.mxu1 %v2688_v43 }
 0x642   : > { %v2729_v3 = vpop.f32.mrf.mxu1 }
 0x643   : > { %v2730_v8 = vadd.f32 %v2729_v3, %v2693_v32 }
 0x644   : > { %v2731_v9 = vpop.f32.mrf.mxu1 }
 0x645   : > { %v2752_v42 = vmul.f32 %v2730_v8, %v2730_v8  ;;  %v2732_v17 = vadd.f32 %v2731_v9, %v2693_v32  ;;  %v2737_v47 = vsel %vm2736_vm1, %v2730_v8, 0.0 }
 0x646   : > { %v2733_v34 = vpop.f32.mrf.mxu1 }
 0x647   : > { %v2753_v54 = vmul.f32 %v2732_v17, %v2732_v17  ;;  %v2738_v50 = vsel %vm2736_vm1, %v2732_v17, 0.0  ;;  %v2754_v0 = vsel %vm2736_vm1, %v2752_v42, 0.0 }
 0x648   : > { %v2734_v51 = vpop.f32.mrf.mxu1  ;;  %v2739_v10 = vadd.f32 %v2738_v50, %v2737_v47 }
 0x649   : > { %v2755_v13 = vsel %vm2736_vm1, %v2753_v54, 0.0 }
 0x64a   : > { %2740 = vadd.xlane.f32.xlu0 %v2739_v10  ;;  %v2756_v62 = vadd.f32 %v2755_v13, %v2754_v0 }
 0x64c   : > { %2757 = vadd.xlane.f32.xlu1 %v2756_v62 }
 0x6d3   : > { %v2741_v41 = vpop.xlane.xlu0 %2740 }
 0x6d4   : > { %v2742_v1 = vrot.slane %v2741_v41, 4 }
 0x6d5   : > { %v2758_v12 = vpop.xlane.xlu1 %2757 }
 0x6d6   : > { %v2743_v59 = vadd.f32 %v2742_v1, %v2741_v41  ;;  %v2759_v11 = vrot.slane %v2758_v12, 4 }
 0x6d8   : > { %v2744_v57 = vrot.slane %v2743_v59, 2  ;;  %v2760_v26 = vadd.f32 %v2759_v11, %v2758_v12 }
 0x6da   : > { %v2761_v58 = vrot.slane %v2760_v26, 2  ;;  %v2745_v22 = vadd.f32 %v2744_v57, %v2743_v59 }
 0x6dc   : > { %v2746_v19 = vrot.slane %v2745_v22, 1  ;;  %v2762_v31 = vadd.f32 %v2761_v58, %v2760_v26 }
 0x6de   : > { %v2747_v49 = vadd.f32 %v2746_v19, %v2745_v22  ;;  %v2763_v60 = vrot.slane %v2762_v31, 1 }
 0x6e0   : > { %2942 = vpush %v2747_v49  ;;  %v2764_v56 = vadd.f32 %v2763_v60, %v2762_v31 }
 0x6e2   : > { %2944 = vpush %v2764_v56 }
 0x711   : > { %s2943_s29 = spop %2942 }
 0x712   : > { %s2751_s8 = smul.f32 0.0009765625, %s2943_s29  ;;  %s269_s29 = sand.u32 1, %s3310_s25  }
 0x713   : > { %s2945_s9 = spop %2944 }
 0x714   : > { %s2769_s13 = smul.f32 %s2751_s8, %s2751_s8  ;;  %v2780_v63 = vstv %s2751_s8 }
 0x715   : > { %s2768_s14 = smul.f32 0.0009765625, %s2945_s9  ;;  %s2880_s9 = sshll.u32 %s269_s29, 3 }
 0x717   : > { %s2770_s15 = ssub.f32 %s2768_s14, %s2769_s13  ;;  %s2889_s13 = sshll.u32 %s3389_s28, 7 }
 0x718   : > { %s271_s14 = scalar_lea.vmem [#allocation2], %s2880_s9 }
 0x719   : > { %s2771_s17 = smax.f32 %s3326_s16, %s2770_s15  ;;  %s2817_s15 = sshll.u32 %s271_s14, 4  ;;  %s2818_s15 = int_to_ptr.vmem [resolvable:$true] %s2817_s15 }
 0x71a   : > { %s2772_s18 = sadd.f32 1e-05, %s2771_s17  ;;  %s2815_s17 = scalar_lea.hbm %s5539_s7, %s2889_s13 }
 0x71b   : > { %s3258_s19 = scalar_lea.vmem %s2818_s15, 128 }
 0x71c   : > { %v2773_v4 = vstv %s2772_s18  ;;  %s2803_s18 = scalar_lea.sflag [#allocation3], %s269_s29  ;;  %p3259_p11 = scmp.ne.s32.totalorder %s2818_s15, %s3258_s19 }
 0x71d   : > { %3256 = vrsqrt.f32 %v2773_v4 }
 0x71e   : > { %p3260_p12 = pnand %p3259_p11, %p3406_p5 }
 0x720   : > { %p3261_p13 = pneg %p3260_p12 }
 0x72a   : > { %v3257_v36 = vpop.eup %3256 }
 0x72b   : > { %2946 = vpush %v3257_v36 }
 0x75c   : > { %s2947_s21 = spop %2946 }
 0x75d   : > { %v2777_v24 = vstv %s2947_s21  ;;  %s3262_s21 = sshll.u32 %s3327_s20, 4  ;;  %s3263_s21 = int_to_ptr.vmem [resolvable:$false] %s3262_s21 }
 0x75e   : > { %v2778_v46 = vmul.f32 %v2777_v24, %v2776_v16  ;;  %s3264_s28 = scalar_lea.vmem %s3263_s21, 256  ;;  %p3265_p0 = scmp.lt.s32.totalorder %s2818_s15, %s3263_s21 }
 0x75f   : > { %p3266_p1 = scmp.lt.s32.totalorder %s3264_s28, %s3258_s19 }
 0x760   : > { %v2781_v44 = vmul.f32 %v2780_v63, %v2778_v46  ;;  %2785 = vperm.xlu0 %3079, %v2778_v46  }
 0x761   : > { %p3267_p2 = por %p3266_p1, %p3265_p0 }
 0x762   : > { %v2782_v14 = vsub.f32 %v2779_v27, %v2781_v44 }
 0x763   : > { %p3268_p3 = pnand %p3267_p2, %p3261_p13 }
 0x764   : > { %2792 = vperm.xlu1 %3078, %v2782_v14  }
 0x7db   : > { %v2786_v35 = vpop.permute.xlu0 %2785 }
 0x7dc   : > { %v2788_v38 = vmul.f32 %v2786_v35, %v2730_v8  ;;  %v2789_v28 = vmul.f32 %v2786_v35, %v2732_v17 }
 0x7df   : > { %v2793_v21 = vpop.permute.xlu1 %2792 }
 0x7e0   : > { %v2795_v53 = vadd.f32 %v2793_v21, %v2788_v38  ;;  %v2796_v61 = vadd.f32 %v2793_v21, %v2789_v28 }
 0x7e2   : > { %v2799_v48 = vcombine.low %v2795_v53, %v2796_v61 }
 0x7e4   : > { %2801 = vst [vmem:[%s271_s14] sm:$0xff] %v2799_v48 }
 0x7e5   : > { %3271 = shalt.err (!%p3268_p3)
}
 0x7e6   : > { %s3272_s22 = scalar_lea.hbm %s2815_s17, 128  ;;  %s3276_s9 = scalar_lea.hbm %s5539_s7, 256 }
 0x7e7   : > { %p3273_p4 = scmp.ne.s32.totalorder %s2815_s17, %s3272_s22  ;;  %p3277_p9 = scmp.lt.s32.totalorder %s2815_s17, %s5539_s7 }
 0x7e8   : > { %p3278_p10 = scmp.lt.s32.totalorder %s3276_s9, %s3272_s22 }
 0x7e9   : > { %p3274_p7 = pnand %p3273_p4, %p3406_p5 }
 0x7ea   : > { %p3279_p11 = por %p3278_p10, %p3277_p9 }
 0x7eb   : > { %p3275_p8 = pneg %p3274_p7 }
 0x7ed   : > { %p3280_p12 = pnand %p3279_p11, %p3275_p8 }
 0x7ef   : > { %3283 = shalt.err (!%p3280_p12)
}
 0x7f0   : > { %2948 = dma.vmem_to_hbm [thread:$0]  (%p3406_p5), %s2818_s15, 128, %s2815_s17, %s2803_s18  }
 0x7f1 PF: > { %p2954_p13 = scmp.ge.s32.totalorder %s3318_s27, 2  ;;  %s2829_s8 = sand.u32 1, %s3306_s24  }
 0x7f2   : > { %s2830_s16 = scalar_lea.sflag [#allocation3], %s2829_s8 }
 0x7f3   : > { %p2951_p0 = pnand %p2954_p13, %p3410_p6 }
 0x7f5   : > { %p2952_p1 = pneg %p2951_p0 }
 0x7f7   : > { %3301 = dma.done.wait (%p2952_p1), %s2830_s16, 128  }
 0x7f8   : > { %3303 = vsyncadd (%p2952_p1), %s2830_s16, 4294967168  ;;  %p17_p2 = scmp.ge.s32.totalorder %s3393_s30, 4   ;;  %s5876_s24 = smov %s3310_s25 }
 0x7f9   : > { %s5877_s25 = smov %s3314_s26  ;;  %s5878_s26 = smov %s3404_s10 }
 0x7fa   : > { %s5879_s27 = smov %s3393_s30  ;;  %19 = sbr.rel (!%p17_p2) target bundleno = 3 (0x3), region = 83 }
 0x7ff   :  { %2835 = vsyncpa [#allocation3], 1 }
 0x800   :  { %2837 = vsyncpa [#allocation3 + $0x1], 1 }

</bundles_post_ra>
